<compile_context>
chip_gen: v5e
topology: v5e:2x2
jax: 0.10.0
libtpu: 0.0.40
codegen_flags: <defaults>
</compile_context>

<pallas_src>
import math
import functools

import jax
import jax.numpy as jnp
from jax.experimental import pallas as pl
from jax.experimental.pallas import tpu as pltpu


def _round_up(a, m):
    return -(-a // m) * m


def _vmem_capacity_bytes():
    try:
        return int(pltpu.get_tpu_info().vmem_capacity_bytes)
    except Exception:  # non-TPU / older jax: assume v5e/v6e-class VMEM
        return 128 * 2 ** 20


def _encoder_block_kernel(x_ref, wqkv_ref, bqkv_ref, wo_ref, bo_ref,
                          w1_ref, b1_ref, w2_ref, b2_ref,
                          scale_ref, shift_ref, o_ref,
                          *, heads, head_dim, d_pad, approx_recip):
    B, L, Hp = x_ref.shape            # one block = B_blk sequences, padded hidden
    R = B * L
    Ep = heads * d_pad
    mm_dtype = wqkv_ref.dtype         # matmul operand dtype (f32 or bf16)

    # ---- fused Q/K/V projection: one (R, Hp) x (Hp, 3*Ep) matmul ----
    x2 = x_ref[...].reshape(R, Hp).astype(mm_dtype)
    qkv = jnp.dot(x2, wqkv_ref[...], preferred_element_type=jnp.float32) + bqkv_ref[...]
    q = qkv[:, :Ep].reshape(B, L, Ep)          # 128-aligned lane slices
    k = qkv[:, Ep:2 * Ep].reshape(B, L, Ep)
    v = qkv[:, 2 * Ep:].reshape(B, L, Ep)

    # ---- multi-head attention (heads padded to 128-lane slots) ----
    inv_sqrt_d = 1.0 / math.sqrt(head_dim)     # scale uses the *unpadded* head dim
    ctx_heads = []
    for h in range(heads):                     # small static unroll; slices are aligned
        lo = h * d_pad
        qh = q[:, :, lo:lo + d_pad].astype(mm_dtype)   # (B, L, d_pad)
        kh = k[:, :, lo:lo + d_pad].astype(mm_dtype)
        vh = v[:, :, lo:lo + d_pad].astype(mm_dtype)
        s = jnp.einsum('bqd,bkd->bqk', qh, kh,
                       preferred_element_type=jnp.float32) * inv_sqrt_d   # (B, L, L)
        s = s - jnp.max(s, axis=-1, keepdims=True)     # softmax in f32
        p = jnp.exp(s)
        p = p * pl.reciprocal(jnp.sum(p, axis=-1, keepdims=True), approx=approx_recip)
        ctx_heads.append(jnp.einsum('bqk,bkd->bqd', p.astype(mm_dtype), vh,
                                    preferred_element_type=jnp.float32))
    ctx = jnp.concatenate(ctx_heads, axis=-1) if heads > 1 else ctx_heads[0]

    # ---- attention output projection (no scratch round trip) ----
    attn2 = ctx.reshape(R, Ep).astype(mm_dtype)
    attn = jnp.dot(attn2, wo_ref[...], preferred_element_type=jnp.float32) + bo_ref[...]

    # ---- FFN: Linear -> SiLU -> Linear -> Dropout(eval) -> BatchNorm(eval, folded) ----
    h1 = jnp.dot(attn.astype(mm_dtype), w1_ref[...],
                 preferred_element_type=jnp.float32) + b1_ref[...]
    h1 = h1 * jax.nn.sigmoid(h1)               # SiLU in f32 (v5e VPU has no bf16)
    h2 = jnp.dot(h1.astype(mm_dtype), w2_ref[...],
                 preferred_element_type=jnp.float32) + b2_ref[...]

    y = h2 * scale_ref[...] + shift_ref[...]   # folded eval-mode BatchNorm
    o_ref[...] = y.reshape(B, L, Hp).astype(o_ref.dtype)   # lane-dense store (Hp % 128 == 0)


def encoder_block(x, params, *, heads, matmul_dtype=jnp.float32, batch_block=None):
    """x: (N, L, H) float32.  params: dict of weights (see init_params)."""
    N, L, H = x.shape
    E = params["wq"].shape[1]
    F = params["w1"].shape[1]
    assert E % heads == 0
    d = E // heads
    mm_dtype = jnp.dtype(matmul_dtype)

    # ---- pad everything lane-dense / lane-aligned in the wrapper (exact: zero pads) ----
    Hp = _round_up(H, 128)
    dp = _round_up(d, 128)
    Ep = heads * dp
    Fp = _round_up(F, 128)

    def head_cols(w):            # (H, E) -> (Hp, Ep), each head in its own 128-lane slot
        w = w.reshape(H, heads, d)
        w = jnp.pad(w, ((0, Hp - H), (0, 0), (0, dp - d)))
        return w.reshape(Hp, Ep)

    def head_bias(b):            # (1, E) -> (1, Ep)
        b = b.reshape(1, heads, d)
        b = jnp.pad(b, ((0, 0), (0, 0), (0, dp - d)))
        return b.reshape(1, Ep)

    wqkv = jnp.concatenate([head_cols(params["wq"]),
                            head_cols(params["wk"]),
                            head_cols(params["wv"])], axis=1).astype(mm_dtype)
    bqkv = jnp.concatenate([head_bias(params["bq"]),
                            head_bias(params["bk"]),
                            head_bias(params["bv"])], axis=1)
    wo = jnp.pad(params["wo"].reshape(heads, d, H),
                 ((0, 0), (0, dp - d), (0, Hp - H))).reshape(Ep, Hp).astype(mm_dtype)
    bo = jnp.pad(params["bo"], ((0, 0), (0, Hp - H)))
    w1 = jnp.pad(params["w1"], ((0, Hp - H), (0, Fp - F))).astype(mm_dtype)
    b1 = jnp.pad(params["b1"], ((0, 0), (0, Fp - F)))
    w2 = jnp.pad(params["w2"], ((0, Fp - F), (0, Hp - H))).astype(mm_dtype)
    b2 = jnp.pad(params["b2"], ((0, 0), (0, Hp - H)))

    # Fold eval-mode BatchNorm into a single affine: y = h2 * scale + shift.
    scale = params["gamma"] * jax.lax.rsqrt(params["rvar"] + 1e-5)
    shift = params["beta"] - params["rmean"] * scale
    scale = jnp.pad(scale, ((0, 0), (0, Hp - H)))
    shift = jnp.pad(shift, ((0, 0), (0, Hp - H)))

    x_p = jnp.pad(x, ((0, 0), (0, 0), (0, Hp - H)))

    # ---- generation-aware VMEM budget and block sizing (no double counting) ----
    capacity = _vmem_capacity_bytes()
    budget = int(0.80 * capacity)               # leave headroom for compiler scratch
    mm_sz = mm_dtype.itemsize
    w_bytes = mm_sz * (wqkv.size + wo.size + w1.size + w2.size)   # single-buffered weights
    b_bytes = 4 * (bqkv.size + bo.size + b1.size + b2.size + scale.size + shift.size)

    def block_bytes(b):
        R = b * L
        io = 2 * 2 * R * Hp * 4                     # x + out blocks, double-buffered
        acts = R * 4 * (3 * Ep + Ep + Fp + 2 * Hp)  # qkv, ctx, h1, attn/h2 (f32)
        acts += R * 3 * Ep * mm_sz                  # q/k/v matmul-operand copies
        scores = 2 * b * L * L * 4                  # scores + probs for one head
        return w_bytes + b_bytes + io + acts + scores

    if batch_block is None:
        B_blk = 1
        for b in sorted((b for b in range(1, N + 1) if N % b == 0), reverse=True):
            if block_bytes(b) * 1.25 <= budget:
                B_blk = b
                break
        # If even B_blk=1 overflows the budget (huge L/F), the FFN should be row-chunked;
        # not needed at these shapes.
    else:
        B_blk = batch_block
    assert N % B_blk == 0
    grid = (N // B_blk,)

    vmem_limit = int(min(budget, max(32 * 2 ** 20, 1.25 * block_bytes(B_blk))))

    def wspec(shape, pm):
        idx = lambda n: (0,) * len(shape)
        if pm is None:
            return pl.BlockSpec(shape, idx)
        return pl.BlockSpec(shape, idx, pipeline_mode=pm)

    kernel = functools.partial(
        _encoder_block_kernel, heads=heads, head_dim=d, d_pad=dp,
        approx_recip=(mm_dtype == jnp.dtype(jnp.bfloat16)))

    def build(pm):
        return pl.pallas_call(
            kernel,
            out_shape=jax.ShapeDtypeStruct((N, L, Hp), x.dtype),
            grid_spec=pltpu.PrefetchScalarGridSpec(
                num_scalar_prefetch=0,
                grid=grid,
                in_specs=[
                    pl.BlockSpec((B_blk, L, Hp), lambda n: (n, 0, 0)),   # x (streamed)
                    wspec((Hp, 3 * Ep), pm), wspec((1, 3 * Ep), pm),     # wqkv, bqkv
                    wspec((Ep, Hp), pm), wspec((1, Hp), pm),             # wo, bo
                    wspec((Hp, Fp), pm), wspec((1, Fp), pm),             # w1, b1
                    wspec((Fp, Hp), pm), wspec((1, Hp), pm),             # w2, b2
                    wspec((1, Hp), pm), wspec((1, Hp), pm),              # BN scale, shift
                ],
                out_specs=pl.BlockSpec((B_blk, L, Hp), lambda n: (n, 0, 0)),
            ),
            compiler_params=pltpu.CompilerParams(
                dimension_semantics=("parallel",),
                vmem_limit_bytes=vmem_limit,
            ),
        )

    args = (x_p, wqkv, bqkv, wo, bo, w1, b1, w2, b2, scale, shift)
    try:
        # Constant-index weights single-buffered -> ~2x less resident weight VMEM.
        out = jax.block_until_ready(build(pl.Buffered(1))(*args))
    except Exception:
        # Fallback for jax builds that reject single-buffered (Buffered(1)) inputs.
        out = build(None)(*args)
    return out[:, :, :H]


def init_params(key, hidden, enc, ffn):
    ks = jax.random.split(key, 16)
    s = 0.1
    return {
        "wq": s * jax.random.normal(ks[0], (hidden, enc), jnp.float32),
        "bq": s * jax.random.normal(ks[1], (1, enc), jnp.float32),
        "wk": s * jax.random.normal(ks[2], (hidden, enc), jnp.float32),
        "bk": s * jax.random.normal(ks[3], (1, enc), jnp.float32),
        "wv": s * jax.random.normal(ks[4], (hidden, enc), jnp.float32),
        "bv": s * jax.random.normal(ks[5], (1, enc), jnp.float32),
        "wo": s * jax.random.normal(ks[6], (enc, hidden), jnp.float32),
        "bo": s * jax.random.normal(ks[7], (1, hidden), jnp.float32),
        "w1": s * jax.random.normal(ks[8], (hidden, ffn), jnp.float32),
        "b1": s * jax.random.normal(ks[9], (1, ffn), jnp.float32),
        "w2": s * jax.random.normal(ks[10], (ffn, hidden), jnp.float32),
        "b2": s * jax.random.normal(ks[11], (1, hidden), jnp.float32),
        "gamma": 1.0 + s * jax.random.normal(ks[12], (1, hidden), jnp.float32),
        "beta": s * jax.random.normal(ks[13], (1, hidden), jnp.float32),
        "rmean": s * jax.random.normal(ks[14], (1, hidden), jnp.float32),
        "rvar": 1.0 + 0.1 * jax.nn.sigmoid(jax.random.normal(ks[15], (1, hidden), jnp.float32)),
    }


def reference(x, p, *, heads):
    """Plain-JAX reference for correctness checking."""
    N, L, H = x.shape
    E = p["wq"].shape[1]
    d = E // heads
    q = x @ p["wq"] + p["bq"]
    k = x @ p["wk"] + p["bk"]
    v = x @ p["wv"] + p["bv"]
    q = q.reshape(N, L, heads, d).transpose(0, 2, 1, 3)
    k = k.reshape(N, L, heads, d).transpose(0, 2, 1, 3)
    v = v.reshape(N, L, heads, d).transpose(0, 2, 1, 3)
    s = jnp.einsum("nhqd,nhkd->nhqk", q, k) / math.sqrt(d)
    pmat = jax.nn.softmax(s, axis=-1)
    o = jnp.einsum("nhqk,nhkd->nhqd", pmat, v).transpose(0, 2, 1, 3).reshape(N, L, E)
    attn = o @ p["wo"] + p["bo"]
    h1 = attn @ p["w1"] + p["b1"]
    h1 = h1 * jax.nn.sigmoid(h1)
    h2 = h1 @ p["w2"] + p["b2"]
    return (h2 - p["rmean"]) * jax.lax.rsqrt(p["rvar"] + 1e-5) * p["gamma"] + p["beta"]


if __name__ == "__main__":
    # Small shapes: batch N=2, seq L=8, hidden H=32, encoding E=32, heads=4, ffn=64
    N, L, H, HEADS, FFN = 2, 8, 32, 4, 64
    E = H  # EncoderBlock does not pass encoding_size; use encoding_size == hidden_size

    key = jax.random.PRNGKey(0)
    kx, kp = jax.random.split(key)
    x = jax.random.normal(kx, (N, L, H), jnp.float32)
    params = init_params(kp, H, E, FFN)

    ref = reference(x, params, heads=HEADS)

    # f32 matmul path (exact reciprocal) -- tight tolerance.
    out_f32 = jax.block_until_ready(encoder_block(x, params, heads=HEADS))
    assert out_f32.shape == (N, L, H)
    assert jnp.allclose(out_f32, ref, atol=5e-4, rtol=5e-4), "f32 mismatch vs. reference"

    # bf16 matmul-operand path (f32 accumulation, approx reciprocal) -- looser tolerance.
    out_bf16 = jax.block_until_ready(
        encoder_block(x, params, heads=HEADS, matmul_dtype=jnp.bfloat16))
    assert out_bf16.shape == (N, L, H)
    assert jnp.allclose(out_bf16, ref, atol=5e-2, rtol=5e-2), "bf16 mismatch vs. reference"

    print("KERNEL_OK")
</pallas_src>

<mosaic_0001>
module attributes {stable_mosaic.version = 11 : i64} {
  func.func @_encoder_block_kernel(%arg0: i32, %arg1: memref<2x8x128xf32, #tpu.memory_space<vmem>>, %arg2: memref<128x1536xf32, #tpu.memory_space<vmem>>, %arg3: memref<1x1536xf32, #tpu.memory_space<vmem>>, %arg4: memref<512x128xf32, #tpu.memory_space<vmem>>, %arg5: memref<1x128xf32, #tpu.memory_space<vmem>>, %arg6: memref<128x128xf32, #tpu.memory_space<vmem>>, %arg7: memref<1x128xf32, #tpu.memory_space<vmem>>, %arg8: memref<128x128xf32, #tpu.memory_space<vmem>>, %arg9: memref<1x128xf32, #tpu.memory_space<vmem>>, %arg10: memref<1x128xf32, #tpu.memory_space<vmem>>, %arg11: memref<1x128xf32, #tpu.memory_space<vmem>>, %arg12: memref<2x8x128xf32, #tpu.memory_space<vmem>>) attributes {dimension_semantics = [#tpu.dimension_semantics<parallel>], iteration_bounds = array<i64: 1>, scalar_prefetch = 0 : i64, scratch_operands = 0 : i64, tpu.core_type = #tpu.core_type<tc>, window_params = [{transform_indices = @transform_0, window_bounds = array<i64: 2, 8, 128>}, {pipeline_mode = #tpu.pipeline_mode<synchronous>, transform_indices = @transform_1, window_bounds = array<i64: 128, 1536>}, {pipeline_mode = #tpu.pipeline_mode<synchronous>, transform_indices = @transform_2, window_bounds = array<i64: 1, 1536>}, {pipeline_mode = #tpu.pipeline_mode<synchronous>, transform_indices = @transform_3, window_bounds = array<i64: 512, 128>}, {pipeline_mode = #tpu.pipeline_mode<synchronous>, transform_indices = @transform_4, window_bounds = array<i64: 1, 128>}, {pipeline_mode = #tpu.pipeline_mode<synchronous>, transform_indices = @transform_5, window_bounds = array<i64: 128, 128>}, {pipeline_mode = #tpu.pipeline_mode<synchronous>, transform_indices = @transform_6, window_bounds = array<i64: 1, 128>}, {pipeline_mode = #tpu.pipeline_mode<synchronous>, transform_indices = @transform_7, window_bounds = array<i64: 128, 128>}, {pipeline_mode = #tpu.pipeline_mode<synchronous>, transform_indices = @transform_8, window_bounds = array<i64: 1, 128>}, {pipeline_mode = #tpu.pipeline_mode<synchronous>, transform_indices = @transform_9, window_bounds = array<i64: 1, 128>}, {pipeline_mode = #tpu.pipeline_mode<synchronous>, transform_indices = @transform_10, window_bounds = array<i64: 1, 128>}, {transform_indices = @transform_11, window_bounds = array<i64: 2, 8, 128>}]} {
    %c0 = arith.constant 0 : index
    %c0_0 = arith.constant 0 : index
    %c0_1 = arith.constant 0 : index
    %0 = vector.load %arg1[%c0, %c0_0, %c0_1] : memref<2x8x128xf32, #tpu.memory_space<vmem>>, vector<2x8x128xf32>
    %1 = vector.shape_cast %0 : vector<2x8x128xf32> to vector<16x128xf32>
    %c0_2 = arith.constant 0 : index
    %c0_3 = arith.constant 0 : index
    %2 = vector.load %arg2[%c0_2, %c0_3] : memref<128x1536xf32, #tpu.memory_space<vmem>>, vector<128x1536xf32>
    %cst = arith.constant dense<0.000000e+00> : vector<16x1536xf32>
    %3 = tpu.matmul %1, %2, %cst {dimension_numbers = #tpu.dot_dimension_numbers<[1], [0], [0], [1], [0, 0, 1, 1], [], []>} : vector<16x128xf32>, vector<128x1536xf32>, vector<16x1536xf32> -> vector<16x1536xf32>
    %c0_4 = arith.constant 0 : index
    %c0_5 = arith.constant 0 : index
    %4 = vector.load %arg3[%c0_4, %c0_5] : memref<1x1536xf32, #tpu.memory_space<vmem>>, vector<1x1536xf32>
    %5 = vector.broadcast %4 : vector<1x1536xf32> to vector<16x1536xf32>
    %6 = arith.addf %3, %5 : vector<16x1536xf32>
    %7 = vector.extract_strided_slice %6 {offsets = [0, 0], sizes = [16, 512], strides = [1, 1]} : vector<16x1536xf32> to vector<16x512xf32>
    %8 = vector.shape_cast %7 : vector<16x512xf32> to vector<2x8x512xf32>
    %9 = vector.extract_strided_slice %6 {offsets = [0, 512], sizes = [16, 512], strides = [1, 1]} : vector<16x1536xf32> to vector<16x512xf32>
    %10 = vector.shape_cast %9 : vector<16x512xf32> to vector<2x8x512xf32>
    %11 = vector.extract_strided_slice %6 {offsets = [0, 1024], sizes = [16, 512], strides = [1, 1]} : vector<16x1536xf32> to vector<16x512xf32>
    %12 = vector.shape_cast %11 : vector<16x512xf32> to vector<2x8x512xf32>
    %13 = vector.extract_strided_slice %8 {offsets = [0, 0, 0], sizes = [2, 8, 128], strides = [1, 1, 1]} : vector<2x8x512xf32> to vector<2x8x128xf32>
    %14 = vector.extract_strided_slice %10 {offsets = [0, 0, 0], sizes = [2, 8, 128], strides = [1, 1, 1]} : vector<2x8x512xf32> to vector<2x8x128xf32>
    %15 = vector.extract_strided_slice %12 {offsets = [0, 0, 0], sizes = [2, 8, 128], strides = [1, 1, 1]} : vector<2x8x512xf32> to vector<2x8x128xf32>
    "tpu.trace_start"() <{level = 10 : i32, message = "bqd,bkd->bqk"}> : () -> ()
    %cst_6 = arith.constant dense<0.000000e+00> : vector<2x8x8xf32>
    %16 = tpu.matmul %13, %14, %cst_6 {dimension_numbers = #tpu.dot_dimension_numbers<[2], [2], [1], [1], [0, 0, 0, 1, 1, 1], [0], [0]>} : vector<2x8x128xf32>, vector<2x8x128xf32>, vector<2x8x8xf32> -> vector<2x8x8xf32>
    "tpu.trace_stop"() : () -> ()
    %cst_7 = arith.constant 0.353553385 : f32
    %17 = vector.broadcast %cst_7 : f32 to vector<2x8x8xf32>
    %18 = arith.mulf %16, %17 : vector<2x8x8xf32>
    %cst_8 = arith.constant dense<0xFF800000> : vector<2x8xf32>
    %19 = vector.multi_reduction <maximumf>, %18, %cst_8 [2] : vector<2x8x8xf32> to vector<2x8xf32>
    %20 = vector.shape_cast %19 : vector<2x8xf32> to vector<2x8x1xf32>
    %21 = vector.broadcast %20 : vector<2x8x1xf32> to vector<2x8x8xf32>
    %22 = arith.subf %18, %21 : vector<2x8x8xf32>
    %23 = math.exp %22 : vector<2x8x8xf32>
    %cst_9 = arith.constant dense<0.000000e+00> : vector<2x8xf32>
    %24 = vector.multi_reduction <add>, %23, %cst_9 [2] : vector<2x8x8xf32> to vector<2x8xf32>
    %25 = vector.shape_cast %24 : vector<2x8xf32> to vector<2x8x1xf32>
    %26 = tpu.reciprocal %25 : vector<2x8x1xf32> -> vector<2x8x1xf32>
    %27 = vector.broadcast %26 : vector<2x8x1xf32> to vector<2x8x8xf32>
    %28 = arith.mulf %23, %27 : vector<2x8x8xf32>
    "tpu.trace_start"() <{level = 10 : i32, message = "bqk,bkd->bqd"}> : () -> ()
    %cst_10 = arith.constant dense<0.000000e+00> : vector<2x8x128xf32>
    %29 = tpu.matmul %28, %15, %cst_10 {dimension_numbers = #tpu.dot_dimension_numbers<[2], [1], [1], [2], [0, 0, 0, 1, 1, 2], [0], [0]>} : vector<2x8x8xf32>, vector<2x8x128xf32>, vector<2x8x128xf32> -> vector<2x8x128xf32>
    "tpu.trace_stop"() : () -> ()
    %30 = vector.extract_strided_slice %8 {offsets = [0, 0, 128], sizes = [2, 8, 128], strides = [1, 1, 1]} : vector<2x8x512xf32> to vector<2x8x128xf32>
    %31 = vector.extract_strided_slice %10 {offsets = [0, 0, 128], sizes = [2, 8, 128], strides = [1, 1, 1]} : vector<2x8x512xf32> to vector<2x8x128xf32>
    %32 = vector.extract_strided_slice %12 {offsets = [0, 0, 128], sizes = [2, 8, 128], strides = [1, 1, 1]} : vector<2x8x512xf32> to vector<2x8x128xf32>
    "tpu.trace_start"() <{level = 10 : i32, message = "bqd,bkd->bqk"}> : () -> ()
    %cst_11 = arith.constant dense<0.000000e+00> : vector<2x8x8xf32>
    %33 = tpu.matmul %30, %31, %cst_11 {dimension_numbers = #tpu.dot_dimension_numbers<[2], [2], [1], [1], [0, 0, 0, 1, 1, 1], [0], [0]>} : vector<2x8x128xf32>, vector<2x8x128xf32>, vector<2x8x8xf32> -> vector<2x8x8xf32>
    "tpu.trace_stop"() : () -> ()
    %cst_12 = arith.constant 0.353553385 : f32
    %34 = vector.broadcast %cst_12 : f32 to vector<2x8x8xf32>
    %35 = arith.mulf %33, %34 : vector<2x8x8xf32>
    %cst_13 = arith.constant dense<0xFF800000> : vector<2x8xf32>
    %36 = vector.multi_reduction <maximumf>, %35, %cst_13 [2] : vector<2x8x8xf32> to vector<2x8xf32>
    %37 = vector.shape_cast %36 : vector<2x8xf32> to vector<2x8x1xf32>
    %38 = vector.broadcast %37 : vector<2x8x1xf32> to vector<2x8x8xf32>
    %39 = arith.subf %35, %38 : vector<2x8x8xf32>
    %40 = math.exp %39 : vector<2x8x8xf32>
    %cst_14 = arith.constant dense<0.000000e+00> : vector<2x8xf32>
    %41 = vector.multi_reduction <add>, %40, %cst_14 [2] : vector<2x8x8xf32> to vector<2x8xf32>
    %42 = vector.shape_cast %41 : vector<2x8xf32> to vector<2x8x1xf32>
    %43 = tpu.reciprocal %42 : vector<2x8x1xf32> -> vector<2x8x1xf32>
    %44 = vector.broadcast %43 : vector<2x8x1xf32> to vector<2x8x8xf32>
    %45 = arith.mulf %40, %44 : vector<2x8x8xf32>
    "tpu.trace_start"() <{level = 10 : i32, message = "bqk,bkd->bqd"}> : () -> ()
    %cst_15 = arith.constant dense<0.000000e+00> : vector<2x8x128xf32>
    %46 = tpu.matmul %45, %32, %cst_15 {dimension_numbers = #tpu.dot_dimension_numbers<[2], [1], [1], [2], [0, 0, 0, 1, 1, 2], [0], [0]>} : vector<2x8x8xf32>, vector<2x8x128xf32>, vector<2x8x128xf32> -> vector<2x8x128xf32>
    "tpu.trace_stop"() : () -> ()
    %47 = vector.extract_strided_slice %8 {offsets = [0, 0, 256], sizes = [2, 8, 128], strides = [1, 1, 1]} : vector<2x8x512xf32> to vector<2x8x128xf32>
    %48 = vector.extract_strided_slice %10 {offsets = [0, 0, 256], sizes = [2, 8, 128], strides = [1, 1, 1]} : vector<2x8x512xf32> to vector<2x8x128xf32>
    %49 = vector.extract_strided_slice %12 {offsets = [0, 0, 256], sizes = [2, 8, 128], strides = [1, 1, 1]} : vector<2x8x512xf32> to vector<2x8x128xf32>
    "tpu.trace_start"() <{level = 10 : i32, message = "bqd,bkd->bqk"}> : () -> ()
    %cst_16 = arith.constant dense<0.000000e+00> : vector<2x8x8xf32>
    %50 = tpu.matmul %47, %48, %cst_16 {dimension_numbers = #tpu.dot_dimension_numbers<[2], [2], [1], [1], [0, 0, 0, 1, 1, 1], [0], [0]>} : vector<2x8x128xf32>, vector<2x8x128xf32>, vector<2x8x8xf32> -> vector<2x8x8xf32>
    "tpu.trace_stop"() : () -> ()
    %cst_17 = arith.constant 0.353553385 : f32
    %51 = vector.broadcast %cst_17 : f32 to vector<2x8x8xf32>
    %52 = arith.mulf %50, %51 : vector<2x8x8xf32>
    %cst_18 = arith.constant dense<0xFF800000> : vector<2x8xf32>
    %53 = vector.multi_reduction <maximumf>, %52, %cst_18 [2] : vector<2x8x8xf32> to vector<2x8xf32>
    %54 = vector.shape_cast %53 : vector<2x8xf32> to vector<2x8x1xf32>
    %55 = vector.broadcast %54 : vector<2x8x1xf32> to vector<2x8x8xf32>
    %56 = arith.subf %52, %55 : vector<2x8x8xf32>
    %57 = math.exp %56 : vector<2x8x8xf32>
    %cst_19 = arith.constant dense<0.000000e+00> : vector<2x8xf32>
    %58 = vector.multi_reduction <add>, %57, %cst_19 [2] : vector<2x8x8xf32> to vector<2x8xf32>
    %59 = vector.shape_cast %58 : vector<2x8xf32> to vector<2x8x1xf32>
    %60 = tpu.reciprocal %59 : vector<2x8x1xf32> -> vector<2x8x1xf32>
    %61 = vector.broadcast %60 : vector<2x8x1xf32> to vector<2x8x8xf32>
    %62 = arith.mulf %57, %61 : vector<2x8x8xf32>
    "tpu.trace_start"() <{level = 10 : i32, message = "bqk,bkd->bqd"}> : () -> ()
    %cst_20 = arith.constant dense<0.000000e+00> : vector<2x8x128xf32>
    %63 = tpu.matmul %62, %49, %cst_20 {dimension_numbers = #tpu.dot_dimension_numbers<[2], [1], [1], [2], [0, 0, 0, 1, 1, 2], [0], [0]>} : vector<2x8x8xf32>, vector<2x8x128xf32>, vector<2x8x128xf32> -> vector<2x8x128xf32>
    "tpu.trace_stop"() : () -> ()
    %64 = vector.extract_strided_slice %8 {offsets = [0, 0, 384], sizes = [2, 8, 128], strides = [1, 1, 1]} : vector<2x8x512xf32> to vector<2x8x128xf32>
    %65 = vector.extract_strided_slice %10 {offsets = [0, 0, 384], sizes = [2, 8, 128], strides = [1, 1, 1]} : vector<2x8x512xf32> to vector<2x8x128xf32>
    %66 = vector.extract_strided_slice %12 {offsets = [0, 0, 384], sizes = [2, 8, 128], strides = [1, 1, 1]} : vector<2x8x512xf32> to vector<2x8x128xf32>
    "tpu.trace_start"() <{level = 10 : i32, message = "bqd,bkd->bqk"}> : () -> ()
    %cst_21 = arith.constant dense<0.000000e+00> : vector<2x8x8xf32>
    %67 = tpu.matmul %64, %65, %cst_21 {dimension_numbers = #tpu.dot_dimension_numbers<[2], [2], [1], [1], [0, 0, 0, 1, 1, 1], [0], [0]>} : vector<2x8x128xf32>, vector<2x8x128xf32>, vector<2x8x8xf32> -> vector<2x8x8xf32>
    "tpu.trace_stop"() : () -> ()
    %cst_22 = arith.constant 0.353553385 : f32
    %68 = vector.broadcast %cst_22 : f32 to vector<2x8x8xf32>
    %69 = arith.mulf %67, %68 : vector<2x8x8xf32>
    %cst_23 = arith.constant dense<0xFF800000> : vector<2x8xf32>
    %70 = vector.multi_reduction <maximumf>, %69, %cst_23 [2] : vector<2x8x8xf32> to vector<2x8xf32>
    %71 = vector.shape_cast %70 : vector<2x8xf32> to vector<2x8x1xf32>
    %72 = vector.broadcast %71 : vector<2x8x1xf32> to vector<2x8x8xf32>
    %73 = arith.subf %69, %72 : vector<2x8x8xf32>
    %74 = math.exp %73 : vector<2x8x8xf32>
    %cst_24 = arith.constant dense<0.000000e+00> : vector<2x8xf32>
    %75 = vector.multi_reduction <add>, %74, %cst_24 [2] : vector<2x8x8xf32> to vector<2x8xf32>
    %76 = vector.shape_cast %75 : vector<2x8xf32> to vector<2x8x1xf32>
    %77 = tpu.reciprocal %76 : vector<2x8x1xf32> -> vector<2x8x1xf32>
    %78 = vector.broadcast %77 : vector<2x8x1xf32> to vector<2x8x8xf32>
    %79 = arith.mulf %74, %78 : vector<2x8x8xf32>
    "tpu.trace_start"() <{level = 10 : i32, message = "bqk,bkd->bqd"}> : () -> ()
    %cst_25 = arith.constant dense<0.000000e+00> : vector<2x8x128xf32>
    %80 = tpu.matmul %79, %66, %cst_25 {dimension_numbers = #tpu.dot_dimension_numbers<[2], [1], [1], [2], [0, 0, 0, 1, 1, 2], [0], [0]>} : vector<2x8x8xf32>, vector<2x8x128xf32>, vector<2x8x128xf32> -> vector<2x8x128xf32>
    "tpu.trace_stop"() : () -> ()
    %81 = tpu.concatenate %29, %46, %63, %80 in 2 : vector<2x8x128xf32>, vector<2x8x128xf32>, vector<2x8x128xf32>, vector<2x8x128xf32> -> vector<2x8x512xf32>
    %82 = vector.shape_cast %81 : vector<2x8x512xf32> to vector<16x512xf32>
    %c0_26 = arith.constant 0 : index
    %c0_27 = arith.constant 0 : index
    %83 = vector.load %arg4[%c0_26, %c0_27] : memref<512x128xf32, #tpu.memory_space<vmem>>, vector<512x128xf32>
    %cst_28 = arith.constant dense<0.000000e+00> : vector<16x128xf32>
    %84 = tpu.matmul %82, %83, %cst_28 {dimension_numbers = #tpu.dot_dimension_numbers<[1], [0], [0], [1], [0, 0, 1, 1], [], []>} : vector<16x512xf32>, vector<512x128xf32>, vector<16x128xf32> -> vector<16x128xf32>
    %c0_29 = arith.constant 0 : index
    %c0_30 = arith.constant 0 : index
    %85 = vector.load %arg5[%c0_29, %c0_30] : memref<1x128xf32, #tpu.memory_space<vmem>>, vector<1x128xf32>
    %86 = vector.broadcast %85 : vector<1x128xf32> to vector<16x128xf32>
    %87 = arith.addf %84, %86 : vector<16x128xf32>
    %c0_31 = arith.constant 0 : index
    %c0_32 = arith.constant 0 : index
    %88 = vector.load %arg6[%c0_31, %c0_32] : memref<128x128xf32, #tpu.memory_space<vmem>>, vector<128x128xf32>
    %cst_33 = arith.constant dense<0.000000e+00> : vector<16x128xf32>
    %89 = tpu.matmul %87, %88, %cst_33 {dimension_numbers = #tpu.dot_dimension_numbers<[1], [0], [0], [1], [0, 0, 1, 1], [], []>} : vector<16x128xf32>, vector<128x128xf32>, vector<16x128xf32> -> vector<16x128xf32>
    %c0_34 = arith.constant 0 : index
    %c0_35 = arith.constant 0 : index
    %90 = vector.load %arg7[%c0_34, %c0_35] : memref<1x128xf32, #tpu.memory_space<vmem>>, vector<1x128xf32>
    %91 = vector.broadcast %90 : vector<1x128xf32> to vector<16x128xf32>
    %92 = arith.addf %89, %91 : vector<16x128xf32>
    %93 = arith.negf %92 : vector<16x128xf32>
    %94 = math.exp %93 : vector<16x128xf32>
    %cst_36 = arith.constant 1.000000e+00 : f32
    %95 = vector.broadcast %cst_36 : f32 to vector<16x128xf32>
    %96 = arith.addf %95, %94 : vector<16x128xf32>
    %97 = arith.divf %95, %96 : vector<16x128xf32>
    %98 = arith.mulf %92, %97 : vector<16x128xf32>
    %c0_37 = arith.constant 0 : index
    %c0_38 = arith.constant 0 : index
    %99 = vector.load %arg8[%c0_37, %c0_38] : memref<128x128xf32, #tpu.memory_space<vmem>>, vector<128x128xf32>
    %cst_39 = arith.constant dense<0.000000e+00> : vector<16x128xf32>
    %100 = tpu.matmul %98, %99, %cst_39 {dimension_numbers = #tpu.dot_dimension_numbers<[1], [0], [0], [1], [0, 0, 1, 1], [], []>} : vector<16x128xf32>, vector<128x128xf32>, vector<16x128xf32> -> vector<16x128xf32>
    %c0_40 = arith.constant 0 : index
    %c0_41 = arith.constant 0 : index
    %101 = vector.load %arg9[%c0_40, %c0_41] : memref<1x128xf32, #tpu.memory_space<vmem>>, vector<1x128xf32>
    %102 = vector.broadcast %101 : vector<1x128xf32> to vector<16x128xf32>
    %103 = arith.addf %100, %102 : vector<16x128xf32>
    %c0_42 = arith.constant 0 : index
    %c0_43 = arith.constant 0 : index
    %104 = vector.load %arg10[%c0_42, %c0_43] : memref<1x128xf32, #tpu.memory_space<vmem>>, vector<1x128xf32>
    %105 = vector.broadcast %104 : vector<1x128xf32> to vector<16x128xf32>
    %106 = arith.mulf %103, %105 : vector<16x128xf32>
    %c0_44 = arith.constant 0 : index
    %c0_45 = arith.constant 0 : index
    %107 = vector.load %arg11[%c0_44, %c0_45] : memref<1x128xf32, #tpu.memory_space<vmem>>, vector<1x128xf32>
    %108 = vector.broadcast %107 : vector<1x128xf32> to vector<16x128xf32>
    %109 = arith.addf %106, %108 : vector<16x128xf32>
    %110 = vector.shape_cast %109 : vector<16x128xf32> to vector<2x8x128xf32>
    %c0_46 = arith.constant 0 : index
    %c0_47 = arith.constant 0 : index
    %c0_48 = arith.constant 0 : index
    %111 = vector.load %arg12[%c0_46, %c0_47, %c0_48] : memref<2x8x128xf32, #tpu.memory_space<vmem>>, vector<2x8x128xf32>
    tpu.vector_store %arg12[%c0_46, %c0_47, %c0_48], %110 {strides = array<i32>} : memref<2x8x128xf32, #tpu.memory_space<vmem>>, vector<2x8x128xf32>,
    return
  }
  func.func @transform_0(%arg0: i32) -> (i32, i32, i32) {
    %c0_i32 = arith.constant 0 : i32
    %c0_i32_0 = arith.constant 0 : i32
    %c0_i32_1 = arith.constant 0 : i32
    return %arg0, %c0_i32, %c0_i32_0 : i32, i32, i32
  }
  func.func @transform_1(%arg0: i32) -> (i32, i32) {
    %c0_i32 = arith.constant 0 : i32
    %c0_i32_0 = arith.constant 0 : i32
    %c0_i32_1 = arith.constant 0 : i32
    return %c0_i32, %c0_i32_0 : i32, i32
  }
  func.func @transform_2(%arg0: i32) -> (i32, i32) {
    %c0_i32 = arith.constant 0 : i32
    %c0_i32_0 = arith.constant 0 : i32
    %c0_i32_1 = arith.constant 0 : i32
    return %c0_i32, %c0_i32_0 : i32, i32
  }
  func.func @transform_3(%arg0: i32) -> (i32, i32) {
    %c0_i32 = arith.constant 0 : i32
    %c0_i32_0 = arith.constant 0 : i32
    %c0_i32_1 = arith.constant 0 : i32
    return %c0_i32, %c0_i32_0 : i32, i32
  }
  func.func @transform_4(%arg0: i32) -> (i32, i32) {
    %c0_i32 = arith.constant 0 : i32
    %c0_i32_0 = arith.constant 0 : i32
    %c0_i32_1 = arith.constant 0 : i32
    return %c0_i32, %c0_i32_0 : i32, i32
  }
  func.func @transform_5(%arg0: i32) -> (i32, i32) {
    %c0_i32 = arith.constant 0 : i32
    %c0_i32_0 = arith.constant 0 : i32
    %c0_i32_1 = arith.constant 0 : i32
    return %c0_i32, %c0_i32_0 : i32, i32
  }
  func.func @transform_6(%arg0: i32) -> (i32, i32) {
    %c0_i32 = arith.constant 0 : i32
    %c0_i32_0 = arith.constant 0 : i32
    %c0_i32_1 = arith.constant 0 : i32
    return %c0_i32, %c0_i32_0 : i32, i32
  }
  func.func @transform_7(%arg0: i32) -> (i32, i32) {
    %c0_i32 = arith.constant 0 : i32
    %c0_i32_0 = arith.constant 0 : i32
    %c0_i32_1 = arith.constant 0 : i32
    return %c0_i32, %c0_i32_0 : i32, i32
  }
  func.func @transform_8(%arg0: i32) -> (i32, i32) {
    %c0_i32 = arith.constant 0 : i32
    %c0_i32_0 = arith.constant 0 : i32
    %c0_i32_1 = arith.constant 0 : i32
    return %c0_i32, %c0_i32_0 : i32, i32
  }
  func.func @transform_9(%arg0: i32) -> (i32, i32) {
    %c0_i32 = arith.constant 0 : i32
    %c0_i32_0 = arith.constant 0 : i32
    %c0_i32_1 = arith.constant 0 : i32
    return %c0_i32, %c0_i32_0 : i32, i32
  }
  func.func @transform_10(%arg0: i32) -> (i32, i32) {
    %c0_i32 = arith.constant 0 : i32
    %c0_i32_0 = arith.constant 0 : i32
    %c0_i32_1 = arith.constant 0 : i32
    return %c0_i32, %c0_i32_0 : i32, i32
  }
  func.func @transform_11(%arg0: i32) -> (i32, i32, i32) {
    %c0_i32 = arith.constant 0 : i32
    %c0_i32_0 = arith.constant 0 : i32
    %c0_i32_1 = arith.constant 0 : i32
    return %arg0, %c0_i32, %c0_i32_0 : i32, i32, i32
  }
}

module attributes {stable_mosaic.version = 11 : i64} {
  func.func @_encoder_block_kernel(%arg0: i32, %arg1: memref<2x8x128xf32, #tpu.memory_space<vmem>>, %arg2: memref<128x1536xf32, #tpu.memory_space<vmem>>, %arg3: memref<1x1536xf32, #tpu.memory_space<vmem>>, %arg4: memref<512x128xf32, #tpu.memory_space<vmem>>, %arg5: memref<1x128xf32, #tpu.memory_space<vmem>>, %arg6: memref<128x128xf32, #tpu.memory_space<vmem>>, %arg7: memref<1x128xf32, #tpu.memory_space<vmem>>, %arg8: memref<128x128xf32, #tpu.memory_space<vmem>>, %arg9: memref<1x128xf32, #tpu.memory_space<vmem>>, %arg10: memref<1x128xf32, #tpu.memory_space<vmem>>, %arg11: memref<1x128xf32, #tpu.memory_space<vmem>>, %arg12: memref<2x8x128xf32, #tpu.memory_space<vmem>>) attributes {dimension_semantics = [#tpu.dimension_semantics<parallel>], iteration_bounds = array<i64: 1>, scalar_prefetch = 0 : i64, scratch_operands = 0 : i64, tpu.core_type = #tpu.core_type<tc>, window_params = [{transform_indices = @transform_0, window_bounds = array<i64: 2, 8, 128>}, {pipeline_mode = #tpu.pipeline_mode<synchronous>, transform_indices = @transform_1, window_bounds = array<i64: 128, 1536>}, {pipeline_mode = #tpu.pipeline_mode<synchronous>, transform_indices = @transform_2, window_bounds = array<i64: 1, 1536>}, {pipeline_mode = #tpu.pipeline_mode<synchronous>, transform_indices = @transform_3, window_bounds = array<i64: 512, 128>}, {pipeline_mode = #tpu.pipeline_mode<synchronous>, transform_indices = @transform_4, window_bounds = array<i64: 1, 128>}, {pipeline_mode = #tpu.pipeline_mode<synchronous>, transform_indices = @transform_5, window_bounds = array<i64: 128, 128>}, {pipeline_mode = #tpu.pipeline_mode<synchronous>, transform_indices = @transform_6, window_bounds = array<i64: 1, 128>}, {pipeline_mode = #tpu.pipeline_mode<synchronous>, transform_indices = @transform_7, window_bounds = array<i64: 128, 128>}, {pipeline_mode = #tpu.pipeline_mode<synchronous>, transform_indices = @transform_8, window_bounds = array<i64: 1, 128>}, {pipeline_mode = #tpu.pipeline_mode<synchronous>, transform_indices = @transform_9, window_bounds = array<i64: 1, 128>}, {pipeline_mode = #tpu.pipeline_mode<synchronous>, transform_indices = @transform_10, window_bounds = array<i64: 1, 128>}, {transform_indices = @transform_11, window_bounds = array<i64: 2, 8, 128>}]} {
    %c0 = arith.constant 0 : index
    %c0_0 = arith.constant 0 : index
    %c0_1 = arith.constant 0 : index
    %0 = vector.load %arg1[%c0, %c0_0, %c0_1] : memref<2x8x128xf32, #tpu.memory_space<vmem>>, vector<2x8x128xf32>
    %1 = vector.shape_cast %0 : vector<2x8x128xf32> to vector<16x128xf32>
    %c0_2 = arith.constant 0 : index
    %c0_3 = arith.constant 0 : index
    %2 = vector.load %arg2[%c0_2, %c0_3] : memref<128x1536xf32, #tpu.memory_space<vmem>>, vector<128x1536xf32>
    %cst = arith.constant dense<0.000000e+00> : vector<16x1536xf32>
    %3 = tpu.matmul %1, %2, %cst {dimension_numbers = #tpu.dot_dimension_numbers<[1], [0], [0], [1], [0, 0, 1, 1], [], []>} : vector<16x128xf32>, vector<128x1536xf32>, vector<16x1536xf32> -> vector<16x1536xf32>
    %c0_4 = arith.constant 0 : index
    %c0_5 = arith.constant 0 : index
    %4 = vector.load %arg3[%c0_4, %c0_5] : memref<1x1536xf32, #tpu.memory_space<vmem>>, vector<1x1536xf32>
    %5 = vector.broadcast %4 : vector<1x1536xf32> to vector<16x1536xf32>
    %6 = arith.addf %3, %5 : vector<16x1536xf32>
    %7 = vector.extract_strided_slice %6 {offsets = [0, 0], sizes = [16, 512], strides = [1, 1]} : vector<16x1536xf32> to vector<16x512xf32>
    %8 = vector.shape_cast %7 : vector<16x512xf32> to vector<2x8x512xf32>
    %9 = vector.extract_strided_slice %6 {offsets = [0, 512], sizes = [16, 512], strides = [1, 1]} : vector<16x1536xf32> to vector<16x512xf32>
    %10 = vector.shape_cast %9 : vector<16x512xf32> to vector<2x8x512xf32>
    %11 = vector.extract_strided_slice %6 {offsets = [0, 1024], sizes = [16, 512], strides = [1, 1]} : vector<16x1536xf32> to vector<16x512xf32>
    %12 = vector.shape_cast %11 : vector<16x512xf32> to vector<2x8x512xf32>
    %13 = vector.extract_strided_slice %8 {offsets = [0, 0, 0], sizes = [2, 8, 128], strides = [1, 1, 1]} : vector<2x8x512xf32> to vector<2x8x128xf32>
    %14 = vector.extract_strided_slice %10 {offsets = [0, 0, 0], sizes = [2, 8, 128], strides = [1, 1, 1]} : vector<2x8x512xf32> to vector<2x8x128xf32>
    %15 = vector.extract_strided_slice %12 {offsets = [0, 0, 0], sizes = [2, 8, 128], strides = [1, 1, 1]} : vector<2x8x512xf32> to vector<2x8x128xf32>
    "tpu.trace_start"() <{level = 10 : i32, message = "bqd,bkd->bqk"}> : () -> ()
    %cst_6 = arith.constant dense<0.000000e+00> : vector<2x8x8xf32>
    %16 = tpu.matmul %13, %14, %cst_6 {dimension_numbers = #tpu.dot_dimension_numbers<[2], [2], [1], [1], [0, 0, 0, 1, 1, 1], [0], [0]>} : vector<2x8x128xf32>, vector<2x8x128xf32>, vector<2x8x8xf32> -> vector<2x8x8xf32>
    "tpu.trace_stop"() : () -> ()
    %cst_7 = arith.constant 0.353553385 : f32
    %17 = vector.broadcast %cst_7 : f32 to vector<2x8x8xf32>
    %18 = arith.mulf %16, %17 : vector<2x8x8xf32>
    %cst_8 = arith.constant dense<0xFF800000> : vector<2x8xf32>
    %19 = vector.multi_reduction <maximumf>, %18, %cst_8 [2] : vector<2x8x8xf32> to vector<2x8xf32>
    %20 = vector.shape_cast %19 : vector<2x8xf32> to vector<2x8x1xf32>
    %21 = vector.broadcast %20 : vector<2x8x1xf32> to vector<2x8x8xf32>
    %22 = arith.subf %18, %21 : vector<2x8x8xf32>
    %23 = math.exp %22 : vector<2x8x8xf32>
    %cst_9 = arith.constant dense<0.000000e+00> : vector<2x8xf32>
    %24 = vector.multi_reduction <add>, %23, %cst_9 [2] : vector<2x8x8xf32> to vector<2x8xf32>
    %25 = vector.shape_cast %24 : vector<2x8xf32> to vector<2x8x1xf32>
    %26 = tpu.reciprocal %25 : vector<2x8x1xf32> -> vector<2x8x1xf32>
    %27 = vector.broadcast %26 : vector<2x8x1xf32> to vector<2x8x8xf32>
    %28 = arith.mulf %23, %27 : vector<2x8x8xf32>
    "tpu.trace_start"() <{level = 10 : i32, message = "bqk,bkd->bqd"}> : () -> ()
    %cst_10 = arith.constant dense<0.000000e+00> : vector<2x8x128xf32>
    %29 = tpu.matmul %28, %15, %cst_10 {dimension_numbers = #tpu.dot_dimension_numbers<[2], [1], [1], [2], [0, 0, 0, 1, 1, 2], [0], [0]>} : vector<2x8x8xf32>, vector<2x8x128xf32>, vector<2x8x128xf32> -> vector<2x8x128xf32>
    "tpu.trace_stop"() : () -> ()
    %30 = vector.extract_strided_slice %8 {offsets = [0, 0, 128], sizes = [2, 8, 128], strides = [1, 1, 1]} : vector<2x8x512xf32> to vector<2x8x128xf32>
    %31 = vector.extract_strided_slice %10 {offsets = [0, 0, 128], sizes = [2, 8, 128], strides = [1, 1, 1]} : vector<2x8x512xf32> to vector<2x8x128xf32>
    %32 = vector.extract_strided_slice %12 {offsets = [0, 0, 128], sizes = [2, 8, 128], strides = [1, 1, 1]} : vector<2x8x512xf32> to vector<2x8x128xf32>
    "tpu.trace_start"() <{level = 10 : i32, message = "bqd,bkd->bqk"}> : () -> ()
    %cst_11 = arith.constant dense<0.000000e+00> : vector<2x8x8xf32>
    %33 = tpu.matmul %30, %31, %cst_11 {dimension_numbers = #tpu.dot_dimension_numbers<[2], [2], [1], [1], [0, 0, 0, 1, 1, 1], [0], [0]>} : vector<2x8x128xf32>, vector<2x8x128xf32>, vector<2x8x8xf32> -> vector<2x8x8xf32>
    "tpu.trace_stop"() : () -> ()
    %cst_12 = arith.constant 0.353553385 : f32
    %34 = vector.broadcast %cst_12 : f32 to vector<2x8x8xf32>
    %35 = arith.mulf %33, %34 : vector<2x8x8xf32>
    %cst_13 = arith.constant dense<0xFF800000> : vector<2x8xf32>
    %36 = vector.multi_reduction <maximumf>, %35, %cst_13 [2] : vector<2x8x8xf32> to vector<2x8xf32>
    %37 = vector.shape_cast %36 : vector<2x8xf32> to vector<2x8x1xf32>
    %38 = vector.broadcast %37 : vector<2x8x1xf32> to vector<2x8x8xf32>
    %39 = arith.subf %35, %38 : vector<2x8x8xf32>
    %40 = math.exp %39 : vector<2x8x8xf32>
    %cst_14 = arith.constant dense<0.000000e+00> : vector<2x8xf32>
    %41 = vector.multi_reduction <add>, %40, %cst_14 [2] : vector<2x8x8xf32> to vector<2x8xf32>
    %42 = vector.shape_cast %41 : vector<2x8xf32> to vector<2x8x1xf32>
    %43 = tpu.reciprocal %42 : vector<2x8x1xf32> -> vector<2x8x1xf32>
    %44 = vector.broadcast %43 : vector<2x8x1xf32> to vector<2x8x8xf32>
    %45 = arith.mulf %40, %44 : vector<2x8x8xf32>
    "tpu.trace_start"() <{level = 10 : i32, message = "bqk,bkd->bqd"}> : () -> ()
    %cst_15 = arith.constant dense<0.000000e+00> : vector<2x8x128xf32>
    %46 = tpu.matmul %45, %32, %cst_15 {dimension_numbers = #tpu.dot_dimension_numbers<[2], [1], [1], [2], [0, 0, 0, 1, 1, 2], [0], [0]>} : vector<2x8x8xf32>, vector<2x8x128xf32>, vector<2x8x128xf32> -> vector<2x8x128xf32>
    "tpu.trace_stop"() : () -> ()
    %47 = vector.extract_strided_slice %8 {offsets = [0, 0, 256], sizes = [2, 8, 128], strides = [1, 1, 1]} : vector<2x8x512xf32> to vector<2x8x128xf32>
    %48 = vector.extract_strided_slice %10 {offsets = [0, 0, 256], sizes = [2, 8, 128], strides = [1, 1, 1]} : vector<2x8x512xf32> to vector<2x8x128xf32>
    %49 = vector.extract_strided_slice %12 {offsets = [0, 0, 256], sizes = [2, 8, 128], strides = [1, 1, 1]} : vector<2x8x512xf32> to vector<2x8x128xf32>
    "tpu.trace_start"() <{level = 10 : i32, message = "bqd,bkd->bqk"}> : () -> ()
    %cst_16 = arith.constant dense<0.000000e+00> : vector<2x8x8xf32>
    %50 = tpu.matmul %47, %48, %cst_16 {dimension_numbers = #tpu.dot_dimension_numbers<[2], [2], [1], [1], [0, 0, 0, 1, 1, 1], [0], [0]>} : vector<2x8x128xf32>, vector<2x8x128xf32>, vector<2x8x8xf32> -> vector<2x8x8xf32>
    "tpu.trace_stop"() : () -> ()
    %cst_17 = arith.constant 0.353553385 : f32
    %51 = vector.broadcast %cst_17 : f32 to vector<2x8x8xf32>
    %52 = arith.mulf %50, %51 : vector<2x8x8xf32>
    %cst_18 = arith.constant dense<0xFF800000> : vector<2x8xf32>
    %53 = vector.multi_reduction <maximumf>, %52, %cst_18 [2] : vector<2x8x8xf32> to vector<2x8xf32>
    %54 = vector.shape_cast %53 : vector<2x8xf32> to vector<2x8x1xf32>
    %55 = vector.broadcast %54 : vector<2x8x1xf32> to vector<2x8x8xf32>
    %56 = arith.subf %52, %55 : vector<2x8x8xf32>
    %57 = math.exp %56 : vector<2x8x8xf32>
    %cst_19 = arith.constant dense<0.000000e+00> : vector<2x8xf32>
    %58 = vector.multi_reduction <add>, %57, %cst_19 [2] : vector<2x8x8xf32> to vector<2x8xf32>
    %59 = vector.shape_cast %58 : vector<2x8xf32> to vector<2x8x1xf32>
    %60 = tpu.reciprocal %59 : vector<2x8x1xf32> -> vector<2x8x1xf32>
    %61 = vector.broadcast %60 : vector<2x8x1xf32> to vector<2x8x8xf32>
    %62 = arith.mulf %57, %61 : vector<2x8x8xf32>
    "tpu.trace_start"() <{level = 10 : i32, message = "bqk,bkd->bqd"}> : () -> ()
    %cst_20 = arith.constant dense<0.000000e+00> : vector<2x8x128xf32>
    %63 = tpu.matmul %62, %49, %cst_20 {dimension_numbers = #tpu.dot_dimension_numbers<[2], [1], [1], [2], [0, 0, 0, 1, 1, 2], [0], [0]>} : vector<2x8x8xf32>, vector<2x8x128xf32>, vector<2x8x128xf32> -> vector<2x8x128xf32>
    "tpu.trace_stop"() : () -> ()
    %64 = vector.extract_strided_slice %8 {offsets = [0, 0, 384], sizes = [2, 8, 128], strides = [1, 1, 1]} : vector<2x8x512xf32> to vector<2x8x128xf32>
    %65 = vector.extract_strided_slice %10 {offsets = [0, 0, 384], sizes = [2, 8, 128], strides = [1, 1, 1]} : vector<2x8x512xf32> to vector<2x8x128xf32>
    %66 = vector.extract_strided_slice %12 {offsets = [0, 0, 384], sizes = [2, 8, 128], strides = [1, 1, 1]} : vector<2x8x512xf32> to vector<2x8x128xf32>
    "tpu.trace_start"() <{level = 10 : i32, message = "bqd,bkd->bqk"}> : () -> ()
    %cst_21 = arith.constant dense<0.000000e+00> : vector<2x8x8xf32>
    %67 = tpu.matmul %64, %65, %cst_21 {dimension_numbers = #tpu.dot_dimension_numbers<[2], [2], [1], [1], [0, 0, 0, 1, 1, 1], [0], [0]>} : vector<2x8x128xf32>, vector<2x8x128xf32>, vector<2x8x8xf32> -> vector<2x8x8xf32>
    "tpu.trace_stop"() : () -> ()
    %cst_22 = arith.constant 0.353553385 : f32
    %68 = vector.broadcast %cst_22 : f32 to vector<2x8x8xf32>
    %69 = arith.mulf %67, %68 : vector<2x8x8xf32>
    %cst_23 = arith.constant dense<0xFF800000> : vector<2x8xf32>
    %70 = vector.multi_reduction <maximumf>, %69, %cst_23 [2] : vector<2x8x8xf32> to vector<2x8xf32>
    %71 = vector.shape_cast %70 : vector<2x8xf32> to vector<2x8x1xf32>
    %72 = vector.broadcast %71 : vector<2x8x1xf32> to vector<2x8x8xf32>
    %73 = arith.subf %69, %72 : vector<2x8x8xf32>
    %74 = math.exp %73 : vector<2x8x8xf32>
    %cst_24 = arith.constant dense<0.000000e+00> : vector<2x8xf32>
    %75 = vector.multi_reduction <add>, %74, %cst_24 [2] : vector<2x8x8xf32> to vector<2x8xf32>
    %76 = vector.shape_cast %75 : vector<2x8xf32> to vector<2x8x1xf32>
    %77 = tpu.reciprocal %76 : vector<2x8x1xf32> -> vector<2x8x1xf32>
    %78 = vector.broadcast %77 : vector<2x8x1xf32> to vector<2x8x8xf32>
    %79 = arith.mulf %74, %78 : vector<2x8x8xf32>
    "tpu.trace_start"() <{level = 10 : i32, message = "bqk,bkd->bqd"}> : () -> ()
    %cst_25 = arith.constant dense<0.000000e+00> : vector<2x8x128xf32>
    %80 = tpu.matmul %79, %66, %cst_25 {dimension_numbers = #tpu.dot_dimension_numbers<[2], [1], [1], [2], [0, 0, 0, 1, 1, 2], [0], [0]>} : vector<2x8x8xf32>, vector<2x8x128xf32>, vector<2x8x128xf32> -> vector<2x8x128xf32>
    "tpu.trace_stop"() : () -> ()
    %81 = tpu.concatenate %29, %46, %63, %80 in 2 : vector<2x8x128xf32>, vector<2x8x128xf32>, vector<2x8x128xf32>, vector<2x8x128xf32> -> vector<2x8x512xf32>
    %82 = vector.shape_cast %81 : vector<2x8x512xf32> to vector<16x512xf32>
    %c0_26 = arith.constant 0 : index
    %c0_27 = arith.constant 0 : index
    %83 = vector.load %arg4[%c0_26, %c0_27] : memref<512x128xf32, #tpu.memory_space<vmem>>, vector<512x128xf32>
    %cst_28 = arith.constant dense<0.000000e+00> : vector<16x128xf32>
    %84 = tpu.matmul %82, %83, %cst_28 {dimension_numbers = #tpu.dot_dimension_numbers<[1], [0], [0], [1], [0, 0, 1, 1], [], []>} : vector<16x512xf32>, vector<512x128xf32>, vector<16x128xf32> -> vector<16x128xf32>
    %c0_29 = arith.constant 0 : index
    %c0_30 = arith.constant 0 : index
    %85 = vector.load %arg5[%c0_29, %c0_30] : memref<1x128xf32, #tpu.memory_space<vmem>>, vector<1x128xf32>
    %86 = vector.broadcast %85 : vector<1x128xf32> to vector<16x128xf32>
    %87 = arith.addf %84, %86 : vector<16x128xf32>
    %c0_31 = arith.constant 0 : index
    %c0_32 = arith.constant 0 : index
    %88 = vector.load %arg6[%c0_31, %c0_32] : memref<128x128xf32, #tpu.memory_space<vmem>>, vector<128x128xf32>
    %cst_33 = arith.constant dense<0.000000e+00> : vector<16x128xf32>
    %89 = tpu.matmul %87, %88, %cst_33 {dimension_numbers = #tpu.dot_dimension_numbers<[1], [0], [0], [1], [0, 0, 1, 1], [], []>} : vector<16x128xf32>, vector<128x128xf32>, vector<16x128xf32> -> vector<16x128xf32>
    %c0_34 = arith.constant 0 : index
    %c0_35 = arith.constant 0 : index
    %90 = vector.load %arg7[%c0_34, %c0_35] : memref<1x128xf32, #tpu.memory_space<vmem>>, vector<1x128xf32>
    %91 = vector.broadcast %90 : vector<1x128xf32> to vector<16x128xf32>
    %92 = arith.addf %89, %91 : vector<16x128xf32>
    %93 = arith.negf %92 : vector<16x128xf32>
    %94 = math.exp %93 : vector<16x128xf32>
    %cst_36 = arith.constant 1.000000e+00 : f32
    %95 = vector.broadcast %cst_36 : f32 to vector<16x128xf32>
    %96 = arith.addf %95, %94 : vector<16x128xf32>
    %97 = arith.divf %95, %96 : vector<16x128xf32>
    %98 = arith.mulf %92, %97 : vector<16x128xf32>
    %c0_37 = arith.constant 0 : index
    %c0_38 = arith.constant 0 : index
    %99 = vector.load %arg8[%c0_37, %c0_38] : memref<128x128xf32, #tpu.memory_space<vmem>>, vector<128x128xf32>
    %cst_39 = arith.constant dense<0.000000e+00> : vector<16x128xf32>
    %100 = tpu.matmul %98, %99, %cst_39 {dimension_numbers = #tpu.dot_dimension_numbers<[1], [0], [0], [1], [0, 0, 1, 1], [], []>} : vector<16x128xf32>, vector<128x128xf32>, vector<16x128xf32> -> vector<16x128xf32>
    %c0_40 = arith.constant 0 : index
    %c0_41 = arith.constant 0 : index
    %101 = vector.load %arg9[%c0_40, %c0_41] : memref<1x128xf32, #tpu.memory_space<vmem>>, vector<1x128xf32>
    %102 = vector.broadcast %101 : vector<1x128xf32> to vector<16x128xf32>
    %103 = arith.addf %100, %102 : vector<16x128xf32>
    %c0_42 = arith.constant 0 : index
    %c0_43 = arith.constant 0 : index
    %104 = vector.load %arg10[%c0_42, %c0_43] : memref<1x128xf32, #tpu.memory_space<vmem>>, vector<1x128xf32>
    %105 = vector.broadcast %104 : vector<1x128xf32> to vector<16x128xf32>
    %106 = arith.mulf %103, %105 : vector<16x128xf32>
    %c0_44 = arith.constant 0 : index
    %c0_45 = arith.constant 0 : index
    %107 = vector.load %arg11[%c0_44, %c0_45] : memref<1x128xf32, #tpu.memory_space<vmem>>, vector<1x128xf32>
    %108 = vector.broadcast %107 : vector<1x128xf32> to vector<16x128xf32>
    %109 = arith.addf %106, %108 : vector<16x128xf32>
    %110 = vector.shape_cast %109 : vector<16x128xf32> to vector<2x8x128xf32>
    %c0_46 = arith.constant 0 : index
    %c0_47 = arith.constant 0 : index
    %c0_48 = arith.constant 0 : index
    %111 = vector.load %arg12[%c0_46, %c0_47, %c0_48] : memref<2x8x128xf32, #tpu.memory_space<vmem>>, vector<2x8x128xf32>
    tpu.vector_store %arg12[%c0_46, %c0_47, %c0_48], %110 {strides = array<i32>} : memref<2x8x128xf32, #tpu.memory_space<vmem>>, vector<2x8x128xf32>,
    return
  }
  func.func @transform_0(%arg0: i32) -> (i32, i32, i32) {
    %c0_i32 = arith.constant 0 : i32
    %c0_i32_0 = arith.constant 0 : i32
    %c0_i32_1 = arith.constant 0 : i32
    return %arg0, %c0_i32, %c0_i32_0 : i32, i32, i32
  }
  func.func @transform_1(%arg0: i32) -> (i32, i32) {
    %c0_i32 = arith.constant 0 : i32
    %c0_i32_0 = arith.constant 0 : i32
    %c0_i32_1 = arith.constant 0 : i32
    return %c0_i32, %c0_i32_0 : i32, i32
  }
  func.func @transform_2(%arg0: i32) -> (i32, i32) {
    %c0_i32 = arith.constant 0 : i32
    %c0_i32_0 = arith.constant 0 : i32
    %c0_i32_1 = arith.constant 0 : i32
    return %c0_i32, %c0_i32_0 : i32, i32
  }
  func.func @transform_3(%arg0: i32) -> (i32, i32) {
    %c0_i32 = arith.constant 0 : i32
    %c0_i32_0 = arith.constant 0 : i32
    %c0_i32_1 = arith.constant 0 : i32
    return %c0_i32, %c0_i32_0 : i32, i32
  }
  func.func @transform_4(%arg0: i32) -> (i32, i32) {
    %c0_i32 = arith.constant 0 : i32
    %c0_i32_0 = arith.constant 0 : i32
    %c0_i32_1 = arith.constant 0 : i32
    return %c0_i32, %c0_i32_0 : i32, i32
  }
  func.func @transform_5(%arg0: i32) -> (i32, i32) {
    %c0_i32 = arith.constant 0 : i32
    %c0_i32_0 = arith.constant 0 : i32
    %c0_i32_1 = arith.constant 0 : i32
    return %c0_i32, %c0_i32_0 : i32, i32
  }
  func.func @transform_6(%arg0: i32) -> (i32, i32) {
    %c0_i32 = arith.constant 0 : i32
    %c0_i32_0 = arith.constant 0 : i32
    %c0_i32_1 = arith.constant 0 : i32
    return %c0_i32, %c0_i32_0 : i32, i32
  }
  func.func @transform_7(%arg0: i32) -> (i32, i32) {
    %c0_i32 = arith.constant 0 : i32
    %c0_i32_0 = arith.constant 0 : i32
    %c0_i32_1 = arith.constant 0 : i32
    return %c0_i32, %c0_i32_0 : i32, i32
  }
  func.func @transform_8(%arg0: i32) -> (i32, i32) {
    %c0_i32 = arith.constant 0 : i32
    %c0_i32_0 = arith.constant 0 : i32
    %c0_i32_1 = arith.constant 0 : i32
    return %c0_i32, %c0_i32_0 : i32, i32
  }
  func.func @transform_9(%arg0: i32) -> (i32, i32) {
    %c0_i32 = arith.constant 0 : i32
    %c0_i32_0 = arith.constant 0 : i32
    %c0_i32_1 = arith.constant 0 : i32
    return %c0_i32, %c0_i32_0 : i32, i32
  }
  func.func @transform_10(%arg0: i32) -> (i32, i32) {
    %c0_i32 = arith.constant 0 : i32
    %c0_i32_0 = arith.constant 0 : i32
    %c0_i32_1 = arith.constant 0 : i32
    return %c0_i32, %c0_i32_0 : i32, i32
  }
  func.func @transform_11(%arg0: i32) -> (i32, i32, i32) {
    %c0_i32 = arith.constant 0 : i32
    %c0_i32_0 = arith.constant 0 : i32
    %c0_i32_1 = arith.constant 0 : i32
    return %arg0, %c0_i32, %c0_i32_0 : i32, i32, i32
  }
}

</mosaic_0001>

<bundles_post_ra>
// kernel: tpu_custom_call.1
= control target key start
LH: loop header
LB: loop body
LE: loop exit
PB: predicated region body
PF: predicated region fallthrough
CT: control target
= control target key end

     0   :  { %16 = vsyncpa [#allocation3], 0  ;;  %s2058_s0 = inlined_call_operand.hbm [shape: f32[2,8,128], index: 0, kind: input, shape index: {}]   ;;  %s2059_s1 = inlined_call_operand.hbm [shape: f32[128,1536], index: 1, kind: input, shape index: {}]   ;;  %s2060_s2 = inlined_call_operand.hbm [shape: f32[1,1536], index: 2, kind: input, shape index: {}]   ;;  %s2061_s3 = inlined_call_operand.hbm [shape: f32[512,128], index: 3, kind: input, shape index: {}]   ;;  %s2062_s4 = inlined_call_operand.vmem [shape: f32[1,128], index: 4, kind: input, shape index: {}]   ;;  %s2063_s5 = inlined_call_operand.hbm [shape: f32[128,128], index: 5, kind: input, shape index: {}]   ;;  %s2064_s6 = inlined_call_operand.vmem [shape: f32[1,128], index: 6, kind: input, shape index: {}]   ;;  %s2065_s7 = inlined_call_operand.hbm [shape: f32[128,128], index: 7, kind: input, shape index: {}]   ;;  %s2066_s8 = inlined_call_operand.vmem [shape: f32[1,128], index: 8, kind: input, shape index: {}]   ;;  %s2067_s9 = inlined_call_operand.vmem [shape: f32[1,128], index: 9, kind: input, shape index: {}]   ;;  %s2068_s10 = inlined_call_operand.vmem [shape: f32[1,128], index: 10, kind: input, shape index: {}]   ;;  %s2069_s11 = inlined_call_operand.hbm [shape: f32[2,8,128], index: 11, kind: output, shape index: {}]  }
   0x1   :  { %17 = vsyncpa [#allocation6], 0 }
   0x2   :  { %18 = vsyncpa [#allocation9], 0 }
   0x3   :  { %19 = vsyncpa [#allocation12], 0  ;;  %s38_s19 = sshll.u32 %s2059_s1, 4  ;;  %s39_s19 = int_to_ptr.hbm [resolvable:$true] %s38_s19 }
   0x4   :  { %20 = vsyncpa [#allocation4], 0  ;;  %s1740_s20 = smov [#allocation5]   ;;  %s1741_s22 = smov 1536  }
   0x5   :  { %s40_s21 = sshll.u32 %s1740_s20, 4  ;;  %s1742_s23 = smov 96   ;;  %s41_s21 = int_to_ptr.vmem [resolvable:$true] %s40_s21 }
   0x6   :  { %46 = dma.hbm_to_vmem [thread:$0]  %s39_s19, 24576, %s41_s21, [#allocation6], %s1741_s22, %s1741_s22, %s1742_s23  }
   0x7   :  { %s62_s26 = sshll.u32 %s2061_s3, 4  ;;  %s1743_s27 = smov [#allocation8]   ;;  %s63_s26 = int_to_ptr.hbm [resolvable:$true] %s62_s26 }
   0x8   :  { %s64_s28 = sshll.u32 %s1743_s27, 4  ;;  %s25_s12 = sshll.u32 %s2058_s0, 4  ;;  %s65_s28 = int_to_ptr.vmem [resolvable:$true] %s64_s28  ;;  %s26_s12 = int_to_ptr.hbm [resolvable:$true] %s25_s12 }
   0x9   :  { %s1744_s1 = smov 128   ;;  %s1745_s13 = smov 8  }
   0xa   :  { %70 = dma.hbm_to_vmem [thread:$0]  %s63_s26, 8192, %s65_s28, [#allocation9], %s1744_s1, %s1744_s1, %s1745_s13  }
   0xb   :  { %s52_s16 = sshll.u32 %s2060_s2, 4  ;;  %s1746_s3 = smov [#allocation2]   ;;  %s53_s16 = int_to_ptr.hbm [resolvable:$true] %s52_s16 }
   0xc   :  { %s27_s17 = sshll.u32 %s1746_s3, 4  ;;  %s1747_s0 = smov [#allocation7]   ;;  %s28_s17 = int_to_ptr.vmem [resolvable:$true] %s27_s17 }
   0xd   :  { %33 = dma.hbm_to_vmem [thread:$0]  %s26_s12, 256, %s28_s17, [#allocation3], %s1744_s1, %s1744_s1, %s1745_s13  }
   0xe   :  { %s54_s18 = sshll.u32 %s1747_s0, 4  ;;  %s77_s21 = sshll.u32 %s2063_s5, 4  ;;  %s55_s18 = int_to_ptr.vmem [resolvable:$true] %s54_s18  ;;  %s78_s21 = int_to_ptr.hbm [resolvable:$true] %s77_s21 }
   0xf   :  { %57 = dma.hbm_to_vmem [thread:$0]  %s53_s16, 192, %s55_s18, [#allocation6]  }
  0x10   :  { %s92_s2 = sshll.u32 %s2065_s7, 4  ;;  %s1748_s24 = smov [#allocation10]   ;;  %s93_s2 = int_to_ptr.hbm [resolvable:$true] %s92_s2 }
  0x11   :  { %s79_s25 = sshll.u32 %s1748_s24, 4  ;;  %s1749_s26 = smov [#allocation11]   ;;  %s80_s25 = int_to_ptr.vmem [resolvable:$true] %s79_s25 }
  0x12   :  { %85 = dma.hbm_to_vmem [thread:$0]  %s78_s21, 2048, %s80_s25, [#allocation9], %s1744_s1, %s1744_s1, %s1745_s13  }
  0x13   :  { %s94_s27 = sshll.u32 %s1749_s26, 4  ;;  %s95_s27 = int_to_ptr.vmem [resolvable:$true] %s94_s27 }
  0x14   :  { %100 = dma.hbm_to_vmem [thread:$0]  %s93_s2, 2048, %s95_s27, [#allocation12], %s1744_s1, %s1744_s1, %s1745_s13  }
  0x15   :  { %1730 = dma.done.wait [#allocation3], 256  }
  0x16   :  { %1731 = vsyncadd [#allocation3], 4294967040 }
  0x17   :  { %1732 = dma.done.wait [#allocation6], 24768  }
  0x18   :  { %1733 = vsyncadd [#allocation6], 4294942528 }
  0x19   :  { %1734 = dma.done.wait [#allocation9], 10240  }
  0x1a   :  { %1735 = vsyncadd [#allocation9], 4294957056 }
  0x1b   :  { %1736 = dma.done.wait [#allocation12], 2048  }
  0x1c   :  { %1737 = vsyncadd [#allocation12], 4294965248  ;;  %v313_v0 = vld [vmem:[#allocation5 + $0x5a0] sm:$0xff]  ;;  %v315_v2 = vld [vmem:[#allocation5 + $0x5b0] sm:$0xff]  ;;  %vm671_vm0 = vcmask 64512   ;;  %s1750_s16 = smov [#allocation13]  }
  0x1d   :  { %v301_v1 = vld [vmem:[#allocation5 + $0x540] sm:$0xff]  ;;  %353 = vmatpush.msra.mxu0 %v313_v0  ;;  %399 = vmatpush.msra.mxu2 %v315_v2  ;;  %v303_v4 = vld [vmem:[#allocation5 + $0x550] sm:$0xff]  ;;  %v316_v7 = vld [vmem:[#allocation5 + $0x5b8] sm:$0xff]  ;;  %s1478_s3 = sshll.u32 %s1750_s16, 4  ;;  %s1479_s3 = int_to_ptr.vmem [resolvable:$true] %s1478_s3 }
  0x1e   :  { %v289_v3 = vld [vmem:[#allocation5 + $0x4e0] sm:$0xff]  ;;  %v291_v5 = vld [vmem:[#allocation5 + $0x4f0] sm:$0xff]  ;;  %422 = vmatpush.msra.mxu3 %v316_v7  ;;  %v304_v9 = vld [vmem:[#allocation5 + $0x558] sm:$0xff] }
  0x1f   :  { %354 = vmatpush.msra.mxu0 %v301_v1  ;;  %v277_v6 = vld [vmem:[#allocation5 + $0x480] sm:$0xff]  ;;  %400 = vmatpush.msra.mxu2 %v303_v4  ;;  %v279_v8 = vld [vmem:[#allocation5 + $0x490] sm:$0xff]  ;;  %v292_v11 = vld [vmem:[#allocation5 + $0x4f8] sm:$0xff] }
  0x20   :  { %v265_v10 = vld [vmem:[#allocation5 + $0x420] sm:$0xff]  ;;  %v267_v12 = vld [vmem:[#allocation5 + $0x430] sm:$0xff]  ;;  %423 = vmatpush.msra.mxu3 %v304_v9  ;;  %v280_v14 = vld [vmem:[#allocation5 + $0x498] sm:$0xff] }
  0x21   :  { %355 = vmatpush.msra.mxu0 %v289_v3  ;;  %401 = vmatpush.msra.mxu2 %v291_v5  ;;  %v253_v13 = vld [vmem:[#allocation5 + $0x3c0] sm:$0xff]  ;;  %v255_v15 = vld [vmem:[#allocation5 + $0x3d0] sm:$0xff]  ;;  %v268_v17 = vld [vmem:[#allocation5 + $0x438] sm:$0xff] }
  0x22   :  { %424 = vmatpush.msra.mxu3 %v292_v11  ;;  %v241_v16 = vld [vmem:[#allocation5 + $0x360] sm:$0xff]  ;;  %v243_v18 = vld [vmem:[#allocation5 + $0x370] sm:$0xff]  ;;  %v256_v20 = vld [vmem:[#allocation5 + $0x3d8] sm:$0xff] }
  0x23   :  { %356 = vmatpush.msra.mxu0 %v277_v6  ;;  %402 = vmatpush.msra.mxu2 %v279_v8  ;;  %v229_v19 = vld [vmem:[#allocation5 + $0x300] sm:$0xff]  ;;  %v231_v21 = vld [vmem:[#allocation5 + $0x310] sm:$0xff]  ;;  %v244_v23 = vld [vmem:[#allocation5 + $0x378] sm:$0xff] }
  0x24   :  { %425 = vmatpush.msra.mxu3 %v280_v14  ;;  %v217_v22 = vld [vmem:[#allocation5 + $0x2a0] sm:$0xff]  ;;  %v219_v24 = vld [vmem:[#allocation5 + $0x2b0] sm:$0xff]  ;;  %v232_v26 = vld [vmem:[#allocation5 + $0x318] sm:$0xff] }
  0x25   :  { %357 = vmatpush.msra.mxu0 %v265_v10  ;;  %403 = vmatpush.msra.mxu2 %v267_v12  ;;  %v205_v25 = vld [vmem:[#allocation5 + $0x240] sm:$0xff]  ;;  %v207_v27 = vld [vmem:[#allocation5 + $0x250] sm:$0xff]  ;;  %v220_v29 = vld [vmem:[#allocation5 + $0x2b8] sm:$0xff] }
  0x26   :  { %426 = vmatpush.msra.mxu3 %v268_v17  ;;  %v193_v28 = vld [vmem:[#allocation5 + $0x1e0] sm:$0xff]  ;;  %v195_v30 = vld [vmem:[#allocation5 + $0x1f0] sm:$0xff]  ;;  %v208_v32 = vld [vmem:[#allocation5 + $0x258] sm:$0xff] }
  0x27   :  { %358 = vmatpush.msra.mxu0 %v253_v13  ;;  %404 = vmatpush.msra.mxu2 %v255_v15  ;;  %v181_v31 = vld [vmem:[#allocation5 + $0x180] sm:$0xff]  ;;  %v183_v33 = vld [vmem:[#allocation5 + $0x190] sm:$0xff]  ;;  %v196_v35 = vld [vmem:[#allocation5 + $0x1f8] sm:$0xff] }
  0x28   :  { %427 = vmatpush.msra.mxu3 %v256_v20  ;;  %v169_v34 = vld [vmem:[#allocation5 + $0x120] sm:$0xff]  ;;  %v171_v36 = vld [vmem:[#allocation5 + $0x130] sm:$0xff]  ;;  %v184_v38 = vld [vmem:[#allocation5 + $0x198] sm:$0xff] }
  0x29   :  { %359 = vmatpush.msra.mxu0 %v241_v16  ;;  %405 = vmatpush.msra.mxu2 %v243_v18  ;;  %v157_v37 = vld [vmem:[#allocation5 + $0xc0] sm:$0xff]  ;;  %v159_v39 = vld [vmem:[#allocation5 + $0xd0] sm:$0xff]  ;;  %v172_v41 = vld [vmem:[#allocation5 + $0x138] sm:$0xff] }
  0x2a   :  { %428 = vmatpush.msra.mxu3 %v244_v23  ;;  %v145_v40 = vld [vmem:[#allocation5 + $0x60] sm:$0xff]  ;;  %v147_v43 = vld [vmem:[#allocation5 + $0x70] sm:$0xff]  ;;  %v160_v44 = vld [vmem:[#allocation5 + $0xd8] sm:$0xff] }
  0x2b   :  { %360 = vmatpush.msra.mxu0 %v229_v19  ;;  %406 = vmatpush.msra.mxu2 %v231_v21  ;;  %v133_v42 = vld [vmem:[#allocation5] sm:$0xff]  ;;  %v135_v46 = vld [vmem:[#allocation5 + $0x10] sm:$0xff]  ;;  %v148_v48 = vld [vmem:[#allocation5 + $0x78] sm:$0xff] }
  0x2c   :  { %429 = vmatpush.msra.mxu3 %v232_v26  ;;  %v317_v45 = vld [vmem:[#allocation5 + $0x5c0] sm:$0xff]  ;;  %v319_v47 = vld [vmem:[#allocation5 + $0x5d0] sm:$0xff]  ;;  %v136_v53 = vld [vmem:[#allocation5 + $0x18] sm:$0xff] }
  0x2d   :  { %361 = vmatpush.msra.mxu0 %v217_v22  ;;  %407 = vmatpush.msra.mxu2 %v219_v24  ;;  %v305_v49 = vld [vmem:[#allocation5 + $0x560] sm:$0xff]  ;;  %v307_v50 = vld [vmem:[#allocation5 + $0x570] sm:$0xff]  ;;  %v320_v55 = vld [vmem:[#allocation5 + $0x5d8] sm:$0xff] }
  0x2e   :  { %430 = vmatpush.msra.mxu3 %v220_v29  ;;  %v1841_v51 = vld [vmem:[#allocation2] sm:$0xff]  ;;  %v293_v52 = vld [vmem:[#allocation5 + $0x500] sm:$0xff]  ;;  %v308_v58 = vld [vmem:[#allocation5 + $0x578] sm:$0xff] }
  0x2f   :  { %362 = vmatpush.msra.mxu0 %v205_v25  ;;  %408 = vmatpush.msra.mxu2 %v207_v27  ;;  %v295_v54 = vld [vmem:[#allocation5 + $0x510] sm:$0xff]  ;;  %v281_v56 = vld [vmem:[#allocation5 + $0x4a0] sm:$0xff]  ;;  %v296_v61 = vld [vmem:[#allocation5 + $0x518] sm:$0xff] }
  0x30   :  { %431 = vmatpush.msra.mxu3 %v208_v32  ;;  %v283_v57 = vld [vmem:[#allocation5 + $0x4b0] sm:$0xff]  ;;  %v269_v59 = vld [vmem:[#allocation5 + $0x440] sm:$0xff]  ;;  %v284_v0 = vld [vmem:[#allocation5 + $0x4b8] sm:$0xff] }
  0x31   :  { %363 = vmatpush.msra.mxu0 %v193_v28  ;;  %409 = vmatpush.msra.mxu2 %v195_v30  ;;  %v271_v60 = vld [vmem:[#allocation5 + $0x450] sm:$0xff]  ;;  %v257_v62 = vld [vmem:[#allocation5 + $0x3e0] sm:$0xff]  ;;  %v1846_v2 = vld [vmem:[#allocation2 + $0x8] sm:$0xff] }
  0x32   :  { %432 = vmatpush.msra.mxu3 %v196_v35  ;;  %v259_v63 = vld [vmem:[#allocation5 + $0x3f0] sm:$0xff]  ;;  %v245_v1 = vld [vmem:[#allocation5 + $0x380] sm:$0xff]  ;;  %v272_v5 = vld [vmem:[#allocation5 + $0x458] sm:$0xff] }
  0x33   :  { %364 = vmatpush.msra.mxu0 %v181_v31  ;;  %410 = vmatpush.msra.mxu2 %v183_v33  ;;  %v247_v3 = vld [vmem:[#allocation5 + $0x390] sm:$0xff]  ;;  %v233_v4 = vld [vmem:[#allocation5 + $0x320] sm:$0xff]  ;;  %v260_v8 = vld [vmem:[#allocation5 + $0x3f8] sm:$0xff] }
  0x34   :  { %433 = vmatpush.msra.mxu3 %v184_v38  ;;  %v235_v6 = vld [vmem:[#allocation5 + $0x330] sm:$0xff]  ;;  %v221_v7 = vld [vmem:[#allocation5 + $0x2c0] sm:$0xff]  ;;  %v314_v10 = vld [vmem:[#allocation5 + $0x5a8] sm:$0xff] }
  0x35   :  { %365 = vmatpush.msra.mxu0 %v169_v34  ;;  %411 = vmatpush.msra.mxu2 %v171_v36  ;;  %v223_v9 = vld [vmem:[#allocation5 + $0x2d0] sm:$0xff]  ;;  %v209_v11 = vld [vmem:[#allocation5 + $0x260] sm:$0xff]  ;;  %v248_v12 = vld [vmem:[#allocation5 + $0x398] sm:$0xff] }
  0x36   :  { %434 = vmatpush.msra.mxu3 %v172_v41  ;;  %v211_v13 = vld [vmem:[#allocation5 + $0x270] sm:$0xff]  ;;  %v302_v14 = vld [vmem:[#allocation5 + $0x548] sm:$0xff]  ;;  %v197_v15 = vld [vmem:[#allocation5 + $0x200] sm:$0xff]  ;;  %376 = vmatpush.msra.mxu1 %v314_v10 }
  0x37   :  { %366 = vmatpush.msra.mxu0 %v157_v37  ;;  %412 = vmatpush.msra.mxu2 %v159_v39  ;;  %v236_v16 = vld [vmem:[#allocation5 + $0x338] sm:$0xff]  ;;  %v199_v17 = vld [vmem:[#allocation5 + $0x210] sm:$0xff]  ;;  %v290_v18 = vld [vmem:[#allocation5 + $0x4e8] sm:$0xff] }
  0x38   :  { %435 = vmatpush.msra.mxu3 %v160_v44  ;;  %v185_v19 = vld [vmem:[#allocation5 + $0x1a0] sm:$0xff]  ;;  %v224_v20 = vld [vmem:[#allocation5 + $0x2d8] sm:$0xff]  ;;  %377 = vmatpush.msra.mxu1 %v302_v14  ;;  %v187_v21 = vld [vmem:[#allocation5 + $0x1b0] sm:$0xff] }
  0x39   :  { %367 = vmatpush.msra.mxu0 %v145_v40  ;;  %413 = vmatpush.msra.mxu2 %v147_v43  ;;  %v278_v22 = vld [vmem:[#allocation5 + $0x488] sm:$0xff]  ;;  %v173_v23 = vld [vmem:[#allocation5 + $0x140] sm:$0xff]  ;;  %v212_v24 = vld [vmem:[#allocation5 + $0x278] sm:$0xff] }
  0x3a   :  { %436 = vmatpush.msra.mxu3 %v148_v48  ;;  %378 = vmatpush.msra.mxu1 %v290_v18  ;;  %v175_v25 = vld [vmem:[#allocation5 + $0x150] sm:$0xff]  ;;  %v266_v26 = vld [vmem:[#allocation5 + $0x428] sm:$0xff]  ;;  %v161_v27 = vld [vmem:[#allocation5 + $0xe0] sm:$0xff] }
  0x3b   :  { %368 = vmatpush.msra.mxu0 %v133_v42  ;;  %414 = vmatpush.msra.mxu2 %v135_v46  ;;  %v200_v28 = vld [vmem:[#allocation5 + $0x218] sm:$0xff]  ;;  %v163_v29 = vld [vmem:[#allocation5 + $0xf0] sm:$0xff]  ;;  %v254_v30 = vld [vmem:[#allocation5 + $0x3c8] sm:$0xff] }
  0x3c   :  { %415 = vmatmul.f32.vlgmr.msra.gmra.mxu2 %v1841_v51  ;;  %369 = vmatmul.f32.vlgmr.msra.gmra.mxu0 %v1841_v51  ;;  %v149_v31 = vld [vmem:[#allocation5 + $0x80] sm:$0xff]  ;;  %v188_v32 = vld [vmem:[#allocation5 + $0x1b8] sm:$0xff]  ;;  %v151_v33 = vld [vmem:[#allocation5 + $0x90] sm:$0xff] }
  0x3d   :  { %445 = vmatpush.msrb.mxu0 %v317_v45  ;;  %491 = vmatpush.msrb.mxu2 %v319_v47  ;;  %v242_v34 = vld [vmem:[#allocation5 + $0x368] sm:$0xff]  ;;  %v137_v35 = vld [vmem:[#allocation5 + $0x20] sm:$0xff]  ;;  %v176_v36 = vld [vmem:[#allocation5 + $0x158] sm:$0xff] }
  0x3e   :  { %437 = vmatpush.msra.mxu3 %v136_v53  ;;  %379 = vmatpush.msra.mxu1 %v278_v22  ;;  %v139_v37 = vld [vmem:[#allocation5 + $0x30] sm:$0xff]  ;;  %v164_v38 = vld [vmem:[#allocation5 + $0xf8] sm:$0xff]  ;;  %v230_v39 = vld [vmem:[#allocation5 + $0x308] sm:$0xff] }
  0x3f   :  { %446 = vmatpush.msrb.mxu0 %v305_v49  ;;  %492 = vmatpush.msrb.mxu2 %v307_v50  ;;  %v323_v40 = vld [vmem:[#allocation5 + $0x5f0] sm:$0xff]  ;;  %v152_v41 = vld [vmem:[#allocation5 + $0x98] sm:$0xff]  ;;  %v218_v42 = vld [vmem:[#allocation5 + $0x2a8] sm:$0xff] }
  0x40   :  { %514 = vmatpush.msrb.mxu3 %v320_v55  ;;  %380 = vmatpush.msra.mxu1 %v266_v26  ;;  %v311_v43 = vld [vmem:[#allocation5 + $0x590] sm:$0xff]  ;;  %v140_v44 = vld [vmem:[#allocation5 + $0x38] sm:$0xff]  ;;  %v206_v45 = vld [vmem:[#allocation5 + $0x248] sm:$0xff] }
  0x41   :  { %447 = vmatpush.msrb.mxu0 %v293_v52  ;;  %493 = vmatpush.msrb.mxu2 %v295_v54  ;;  %v299_v46 = vld [vmem:[#allocation5 + $0x530] sm:$0xff]  ;;  %v324_v47 = vld [vmem:[#allocation5 + $0x5f8] sm:$0xff]  ;;  %v194_v48 = vld [vmem:[#allocation5 + $0x1e8] sm:$0xff] }
  0x42   :  { %438 = vmatmul.f32.vlgmr.msra.gmra.mxu3 %v1841_v51  ;;  %381 = vmatpush.msra.mxu1 %v254_v30  ;;  %v312_v49 = vld [vmem:[#allocation5 + $0x598] sm:$0xff]  ;;  %v182_v50 = vld [vmem:[#allocation5 + $0x188] sm:$0xff]  ;;  %v287_v52 = vld [vmem:[#allocation5 + $0x4d0] sm:$0xff] }
  0x43   :  { %448 = vmatpush.msrb.mxu0 %v281_v56  ;;  %494 = vmatpush.msrb.mxu2 %v283_v57  ;;  %v300_v53 = vld [vmem:[#allocation5 + $0x538] sm:$0xff]  ;;  %v170_v54 = vld [vmem:[#allocation5 + $0x128] sm:$0xff]  ;;  %v275_v55 = vld [vmem:[#allocation5 + $0x470] sm:$0xff] }
  0x44   :  { %515 = vmatpush.msrb.mxu3 %v308_v58  ;;  %418 = vmatmul.f32.gmra.mxu2 %v1846_v2  ;;  %v288_v56 = vld [vmem:[#allocation5 + $0x4d8] sm:$0xff]  ;;  %v158_v57 = vld [vmem:[#allocation5 + $0xc8] sm:$0xff]  ;;  %v263_v58 = vld [vmem:[#allocation5 + $0x410] sm:$0xff] }
  0x45   :  { %449 = vmatpush.msrb.mxu0 %v269_v59  ;;  %495 = vmatpush.msrb.mxu2 %v271_v60  ;;  %v276_v59 = vld [vmem:[#allocation5 + $0x478] sm:$0xff]  ;;  %v146_v60 = vld [vmem:[#allocation5 + $0x68] sm:$0xff]  ;;  %v215_v10 = vld [vmem:[#allocation5 + $0x290] sm:$0xff] }
  0x46   :  { %516 = vmatpush.msrb.mxu3 %v296_v61  ;;  %372 = vmatmul.f32.gmra.mxu0 %v1846_v2  ;;  %v251_v61 = vld [vmem:[#allocation5 + $0x3b0] sm:$0xff]  ;;  %v270_v14 = vld [vmem:[#allocation5 + $0x448] sm:$0xff]  ;;  %v297_v30 = vld [vmem:[#allocation5 + $0x520] sm:$0xff] }
  0x47   :  { %450 = vmatpush.msrb.mxu0 %v257_v62  ;;  %496 = vmatpush.msrb.mxu2 %v259_v63  ;;  %v264_v62 = vld [vmem:[#allocation5 + $0x418] sm:$0xff]  ;;  %v134_v63 = vld [vmem:[#allocation5 + $0x8] sm:$0xff] }
  0x48   :  { %517 = vmatpush.msrb.mxu3 %v284_v0  ;;  %382 = vmatpush.msra.mxu1 %v242_v34  ;;  %v318_v0 = vld [vmem:[#allocation5 + $0x5c8] sm:$0xff]  ;;  %v285_v34 = vld [vmem:[#allocation5 + $0x4c0] sm:$0xff] }
  0x49   :  { %451 = vmatpush.msrb.mxu0 %v245_v1  ;;  %497 = vmatpush.msrb.mxu2 %v247_v3  ;;  %v239_v1 = vld [vmem:[#allocation5 + $0x350] sm:$0xff]  ;;  %v252_v3 = vld [vmem:[#allocation5 + $0x3b8] sm:$0xff]  ;;  %v246_v18 = vld [vmem:[#allocation5 + $0x388] sm:$0xff] }
  0x4a   :  { %518 = vmatpush.msrb.mxu3 %v272_v5  ;;  %383 = vmatpush.msra.mxu1 %v230_v39  ;;  %v306_v5 = vld [vmem:[#allocation5 + $0x568] sm:$0xff] }
  0x4b   :  { %452 = vmatpush.msrb.mxu0 %v233_v4  ;;  %498 = vmatpush.msrb.mxu2 %v235_v6  ;;  %v321_v4 = vld [vmem:[#allocation5 + $0x5e0] sm:$0xff]  ;;  %v227_v6 = vld [vmem:[#allocation5 + $0x2f0] sm:$0xff]  ;;  %v198_v22 = vld [vmem:[#allocation5 + $0x208] sm:$0xff] }
  0x4c   :  { %441 = vmatmul.f32.gmra.mxu3 %v1846_v2  ;;  %384 = vmatpush.msra.mxu1 %v218_v42  ;;  %v150_v26 = vld [vmem:[#allocation5 + $0x88] sm:$0xff]  ;;  %v261_v42 = vld [vmem:[#allocation5 + $0x400] sm:$0xff] }
  0x4d   :  { %453 = vmatpush.msrb.mxu0 %v221_v7  ;;  %519 = vmatpush.msrb.mxu3 %v260_v8  ;;  %v240_v7 = vld [vmem:[#allocation5 + $0x358] sm:$0xff]  ;;  %v309_v8 = vld [vmem:[#allocation5 + $0x580] sm:$0xff]  ;;  %v274_v39 = vld [vmem:[#allocation5 + $0x468] sm:$0xff] }
  0x4e   :  { %499 = vmatpush.msrb.mxu2 %v223_v9  ;;  %385 = vmatpush.msra.mxu1 %v206_v45  ;;  %v294_v9 = vld [vmem:[#allocation5 + $0x508] sm:$0xff]  ;;  %v249_v45 = vld [vmem:[#allocation5 + $0x3a0] sm:$0xff] }
  0x4f   :  { %454 = vmatpush.msrb.mxu0 %v209_v11  ;;  %520 = vmatpush.msrb.mxu3 %v248_v12  ;;  %v228_v11 = vld [vmem:[#allocation5 + $0x2f8] sm:$0xff]  ;;  %v282_v12 = vld [vmem:[#allocation5 + $0x4a8] sm:$0xff] }
  0x50   :  { %500 = vmatpush.msrb.mxu2 %v211_v13  ;;  %386 = vmatpush.msra.mxu1 %v194_v48  ;;  %v203_v13 = vld [vmem:[#allocation5 + $0x230] sm:$0xff]  ;;  %v237_v48 = vld [vmem:[#allocation5 + $0x340] sm:$0xff] }
  0x51   :  { %455 = vmatpush.msrb.mxu0 %v197_v15  ;;  %521 = vmatpush.msrb.mxu3 %v236_v16  ;;  %v191_v15 = vld [vmem:[#allocation5 + $0x1d0] sm:$0xff]  ;;  %v258_v16 = vld [vmem:[#allocation5 + $0x3e8] sm:$0xff] }
  0x52   :  { %501 = vmatpush.msrb.mxu2 %v199_v17  ;;  %387 = vmatpush.msra.mxu1 %v182_v50  ;;  %v179_v17 = vld [vmem:[#allocation5 + $0x170] sm:$0xff]  ;;  %v156_v50 = vld [vmem:[#allocation5 + $0xb8] sm:$0xff] }
  0x53   :  { %456 = vmatpush.msrb.mxu0 %v185_v19  ;;  %522 = vmatpush.msrb.mxu3 %v224_v20  ;;  %v234_v19 = vld [vmem:[#allocation5 + $0x328] sm:$0xff] }
  0x54   :  { %502 = vmatpush.msrb.mxu2 %v187_v21  ;;  %388 = vmatpush.msra.mxu1 %v170_v54  ;;  %v222_v20 = vld [vmem:[#allocation5 + $0x2c8] sm:$0xff]  ;;  %v144_v54 = vld [vmem:[#allocation5 + $0x58] sm:$0xff] }
  0x55   :  { %457 = vmatpush.msrb.mxu0 %v173_v23  ;;  %523 = vmatpush.msrb.mxu3 %v212_v24  ;;  %v210_v21 = vld [vmem:[#allocation5 + $0x268] sm:$0xff] }
  0x56   :  { %503 = vmatpush.msrb.mxu2 %v175_v25  ;;  %389 = vmatpush.msra.mxu1 %v158_v57  ;;  %v186_v23 = vld [vmem:[#allocation5 + $0x1a8] sm:$0xff]  ;;  %v201_v57 = vld [vmem:[#allocation5 + $0x220] sm:$0xff] }
  0x57   :  { %458 = vmatpush.msrb.mxu0 %v161_v27  ;;  %524 = vmatpush.msrb.mxu3 %v200_v28  ;;  %v174_v24 = vld [vmem:[#allocation5 + $0x148] sm:$0xff] }
  0x58   :  { %504 = vmatpush.msrb.mxu2 %v163_v29  ;;  %390 = vmatpush.msra.mxu1 %v146_v60  ;;  %v162_v25 = vld [vmem:[#allocation5 + $0xe8] sm:$0xff] }
  0x59   :  { %459 = vmatpush.msrb.mxu0 %v149_v31  ;;  %525 = vmatpush.msrb.mxu3 %v188_v32  ;;  %v138_v27 = vld [vmem:[#allocation5 + $0x28] sm:$0xff]  ;;  %v167_v32 = vld [vmem:[#allocation5 + $0x110] sm:$0xff] }
  0x5a   :  { %505 = vmatpush.msrb.mxu2 %v151_v33  ;;  %391 = vmatpush.msra.mxu1 %v134_v63  ;;  %v322_v28 = vld [vmem:[#allocation5 + $0x5e8] sm:$0xff]  ;;  %v216_v33 = vld [vmem:[#allocation5 + $0x298] sm:$0xff]  ;;  %v165_v63 = vld [vmem:[#allocation5 + $0x100] sm:$0xff] }
  0x5b   :  { %460 = vmatpush.msrb.mxu0 %v137_v35  ;;  %526 = vmatpush.msrb.mxu3 %v176_v36  ;;  %v310_v29 = vld [vmem:[#allocation5 + $0x588] sm:$0xff]  ;;  %v155_v36 = vld [vmem:[#allocation5 + $0xb0] sm:$0xff] }
  0x5c   :  { %461 = vmatmul.f32.vlgmr.msrb.gmra.mxu0 %v1841_v51  ;;  %506 = vmatpush.msrb.mxu2 %v139_v37  ;;  %v298_v31 = vld [vmem:[#allocation5 + $0x528] sm:$0xff]  ;;  %v204_v37 = vld [vmem:[#allocation5 + $0x238] sm:$0xff] }
  0x5d   :  { %507 = vmatmul.f32.vlgmr.msrb.gmra.mxu2 %v1841_v51  ;;  %527 = vmatpush.msrb.mxu3 %v164_v38  ;;  %v286_v35 = vld [vmem:[#allocation5 + $0x4c8] sm:$0xff]  ;;  %v273_v38 = vld [vmem:[#allocation5 + $0x460] sm:$0xff] }
  0x5e   :  { %583 = vmatpush.msra.mxu2 %v323_v40  ;;  %537 = vmatpush.msra.mxu0 %v321_v4  ;;  %v143_v40 = vld [vmem:[#allocation5 + $0x50] sm:$0xff]  ;;  %v190_v60 = vld [vmem:[#allocation5 + $0x1c8] sm:$0xff]  ;;  %v141_v4 = vld [vmem:[#allocation5 + $0x40] sm:$0xff] }
  0x5f   :  { %528 = vmatpush.msrb.mxu3 %v152_v41  ;;  %468 = vmatpush.msrb.mxu1 %v318_v0  ;;  %v192_v41 = vld [vmem:[#allocation5 + $0x1d8] sm:$0xff]  ;;  %v166_v0 = vld [vmem:[#allocation5 + $0x108] sm:$0xff] }
  0x60   :  { %584 = vmatpush.msra.mxu2 %v311_v43  ;;  %392 = vmatmul.f32.vlgmr.msra.gmra.mxu1 %v1841_v51  ;;  %v262_v43 = vld [vmem:[#allocation5 + $0x408] sm:$0xff] }
  0x61   :  { %529 = vmatpush.msrb.mxu3 %v140_v44  ;;  %469 = vmatpush.msrb.mxu1 %v306_v5  ;;  %v180_v44 = vld [vmem:[#allocation5 + $0x178] sm:$0xff]  ;;  %v142_v5 = vld [vmem:[#allocation5 + $0x48] sm:$0xff] }
  0x62   :  { %530 = vmatmul.f32.vlgmr.msrb.gmra.mxu3 %v1841_v51  ;;  %585 = vmatpush.msra.mxu2 %v299_v46  ;;  %v250_v46 = vld [vmem:[#allocation5 + $0x3a8] sm:$0xff] }
  0x63   :  { %606 = vmatpush.msra.mxu3 %v324_v47  ;;  %538 = vmatpush.msra.mxu0 %v309_v8  ;;  %v168_v47 = vld [vmem:[#allocation5 + $0x118] sm:$0xff] }
  0x64   :  { %464 = vmatmul.f32.gmra.mxu0 %v1846_v2  ;;  %586 = vmatpush.msra.mxu2 %v287_v52  ;;  %v225_v52 = vld [vmem:[#allocation5 + $0x2e0] sm:$0xff] }
  0x65   :  { %510 = vmatmul.f32.gmra.mxu2 %v1846_v2  ;;  %607 = vmatpush.msra.mxu3 %v312_v49  ;;  %v238_v49 = vld [vmem:[#allocation5 + $0x348] sm:$0xff] }
  0x66   :  { %587 = vmatpush.msra.mxu2 %v275_v55  ;;  %470 = vmatpush.msrb.mxu1 %v294_v9  ;;  %v213_v55 = vld [vmem:[#allocation5 + $0x280] sm:$0xff] }
  0x67   :  { %608 = vmatpush.msra.mxu3 %v300_v53  ;;  %539 = vmatpush.msra.mxu0 %v297_v30  ;;  %v226_v53 = vld [vmem:[#allocation5 + $0x2e8] sm:$0xff] }
  0x68   :  { %588 = vmatpush.msra.mxu2 %v263_v58  ;;  %471 = vmatpush.msrb.mxu1 %v282_v12  ;;  %v202_v58 = vld [vmem:[#allocation5 + $0x228] sm:$0xff] }
  0x69   :  { %609 = vmatpush.msra.mxu3 %v288_v56  ;;  %395 = vmatmul.f32.gmra.mxu1 %v1846_v2  ;;  %v214_v56 = vld [vmem:[#allocation5 + $0x288] sm:$0xff] }
  0x6a   :  { %533 = vmatmul.f32.gmra.mxu3 %v1846_v2  ;;  %589 = vmatpush.msra.mxu2 %v251_v61  ;;  %v177_v61 = vld [vmem:[#allocation5 + $0x160] sm:$0xff] }
  0x6b   :  { %610 = vmatpush.msra.mxu3 %v276_v59  ;;  %472 = vmatpush.msrb.mxu1 %v270_v14  ;;  %v189_v59 = vld [vmem:[#allocation5 + $0x1c0] sm:$0xff] }
  0x6c   :  { %590 = vmatpush.msra.mxu2 %v239_v1  ;;  %540 = vmatpush.msra.mxu0 %v285_v34  ;;  %v153_v1 = vld [vmem:[#allocation5 + $0xa0] sm:$0xff] }
  0x6d   :  { %611 = vmatpush.msra.mxu3 %v264_v62  ;;  %473 = vmatpush.msrb.mxu1 %v258_v16  ;;  %v178_v62 = vld [vmem:[#allocation5 + $0x168] sm:$0xff] }
  0x6e   :  { %591 = vmatpush.msra.mxu2 %v227_v6  ;;  %541 = vmatpush.msra.mxu0 %v273_v38 }
  0x6f   :  { %612 = vmatpush.msra.mxu3 %v252_v3  ;;  %474 = vmatpush.msrb.mxu1 %v246_v18  ;;  %v154_v3 = vld [vmem:[#allocation5 + $0xa8] sm:$0xff] }
  0x70   :  { %592 = vmatpush.msra.mxu2 %v215_v10  ;;  %542 = vmatpush.msra.mxu0 %v261_v42  ;;  %v1869_v10 = vld [vmem:[#allocation7] sm:$0xff] }
  0x71   :  { %613 = vmatpush.msra.mxu3 %v240_v7  ;;  %475 = vmatpush.msrb.mxu1 %v234_v19  ;;  %v331_v18 = vperm.slane %v1869_v10, 2 }
  0x72   :  { %593 = vmatpush.msra.mxu2 %v203_v13  ;;  %543 = vmatpush.msra.mxu0 %v249_v45  ;;  %v329_v13 = vperm.slane %v1869_v10, 0 }
  0x73   :  { %614 = vmatpush.msra.mxu3 %v228_v11  ;;  %476 = vmatpush.msrb.mxu1 %v222_v20  ;;  %v333_v11 = vperm.slane %v1869_v10, 4 }
  0x74   :  { %594 = vmatpush.msra.mxu2 %v191_v15  ;;  %544 = vmatpush.msra.mxu0 %v237_v48 }
  0x75   :  { %477 = vmatpush.msrb.mxu1 %v210_v21  ;;  %615 = vmatpush.msra.mxu3 %v216_v33 }
  0x76   :  { %595 = vmatpush.msra.mxu2 %v179_v17  ;;  %545 = vmatpush.msra.mxu0 %v225_v52 }
  0x77   :  { %478 = vmatpush.msrb.mxu1 %v198_v22  ;;  %616 = vmatpush.msra.mxu3 %v204_v37 }
  0x78   :  { %596 = vmatpush.msra.mxu2 %v167_v32  ;;  %546 = vmatpush.msra.mxu0 %v213_v55 }
  0x79   :  { %479 = vmatpush.msrb.mxu1 %v186_v23  ;;  %617 = vmatpush.msra.mxu3 %v192_v41  ;;  %v336_v23 = vperm.slane %v1869_v10, 7 }
  0x7a   :  { %597 = vmatpush.msra.mxu2 %v155_v36  ;;  %547 = vmatpush.msra.mxu0 %v201_v57  ;;  %v326_v36 = vld [vmem:[#allocation7 + $0x8] sm:$0xf] }
  0x7b   :  { %480 = vmatpush.msrb.mxu1 %v174_v24  ;;  %618 = vmatpush.msra.mxu3 %v180_v44  ;;  %v339_v38 = vperm.slane %v326_v36, 2  ;;  %v340_v42 = vperm.slane %v326_v36, 3  ;;  %v337_v52 = vperm.slane %v326_v36, 0 }
  0x7c   :  { %598 = vmatpush.msra.mxu2 %v143_v40  ;;  %548 = vmatpush.msra.mxu0 %v189_v59 }
  0x7d   :  { %481 = vmatpush.msrb.mxu1 %v162_v25  ;;  %599 = vmatmul.f32.vlgmr.msra.gmra.mxu2 %v1841_v51 }
  0x7e   :  { %619 = vmatpush.msra.mxu3 %v168_v47  ;;  %549 = vmatpush.msra.mxu0 %v177_v61 }
  0x7f   :  { %482 = vmatpush.msrb.mxu1 %v150_v26 }
  0x80   :  { %620 = vmatpush.msra.mxu3 %v156_v50  ;;  %550 = vmatpush.msra.mxu0 %v165_v63  ;;  %v334_v50 = vperm.slane %v1869_v10, 5 }
  0x81   :  { %483 = vmatpush.msrb.mxu1 %v138_v27  ;;  %v332_v27 = vperm.slane %v1869_v10, 3 }
  0x82   :  { %484 = vmatmul.f32.vlgmr.msrb.gmra.mxu1 %v1841_v51  ;;  %621 = vmatpush.msra.mxu3 %v144_v54 }
  0x83   :  { %560 = vmatpush.msra.mxu1 %v322_v28  ;;  %622 = vmatmul.f32.vlgmr.msra.gmra.mxu3 %v1841_v51 }
  0x84   :  { %551 = vmatpush.msra.mxu0 %v153_v1 }
  0x85   :  { %561 = vmatpush.msra.mxu1 %v310_v29  ;;  %602 = vmatmul.f32.gmra.mxu2 %v1846_v2 }
  0x86   :  { %552 = vmatpush.msra.mxu0 %v141_v4 }
  0x87   :  { %562 = vmatpush.msra.mxu1 %v298_v31  ;;  %553 = vmatmul.f32.vlgmr.msra.gmra.mxu0 %v1841_v51 }
  0x89   :  { %563 = vmatpush.msra.mxu1 %v286_v35 }
  0x8a   :  { %487 = vmatmul.f32.gmra.mxu1 %v1846_v2 }
  0x8b   :  { %564 = vmatpush.msra.mxu1 %v274_v39  ;;  %625 = vmatmul.f32.gmra.mxu3 %v1846_v2 }
  0x8d   :  { %565 = vmatpush.msra.mxu1 %v262_v43 }
  0x8f   :  { %566 = vmatpush.msra.mxu1 %v250_v46  ;;  %556 = vmatmul.f32.gmra.mxu0 %v1846_v2 }
  0x91   :  { %567 = vmatpush.msra.mxu1 %v238_v49 }
  0x93   :  { %568 = vmatpush.msra.mxu1 %v226_v53  ;;  %v338_v53 = vperm.slane %v326_v36, 1 }
  0x95   :  { %569 = vmatpush.msra.mxu1 %v214_v56 }
  0x97   :  { %570 = vmatpush.msra.mxu1 %v202_v58 }
  0x99   :  { %571 = vmatpush.msra.mxu1 %v190_v60 }
  0x9b   :  { %572 = vmatpush.msra.mxu1 %v178_v62 }
  0x9d   :  { %573 = vmatpush.msra.mxu1 %v166_v0 }
  0x9f   :  { %574 = vmatpush.msra.mxu1 %v154_v3 }
  0xa1   :  { %575 = vmatpush.msra.mxu1 %v142_v5 }
  0xa2   :  { %576 = vmatmul.f32.vlgmr.msra.gmra.mxu1 %v1841_v51  ;;  %v335_v51 = vperm.slane %v1869_v10, 6 }
  0xaa   :  { %579 = vmatmul.f32.gmra.mxu1 %v1846_v2 }
  0xb9   :  { %v370_v6 = vpop.f32.mrf.mxu0 }
  0xba   :  { %v371_v17 = vadd.f32 %v370_v6, %v329_v13 }
  0xbf   :  { %v416_v7 = vpop.f32.mrf.mxu2 }
  0xc0   :  { %v417_v21 = vadd.f32 %v416_v7, %v331_v18 }
  0xc3   :  { %v373_v8 = vpop.f32.mrf.mxu0 }
  0xc4   :  { %v374_v24 = vadd.f32 %v373_v8, %v329_v13 }
  0xc5   :  { %v439_v9 = vpop.f32.mrf.mxu3 }
  0xc6   :  { %v440_v31 = vadd.f32 %v439_v9, %v332_v27 }
  0xc7   :  { %v419_v12 = vpop.f32.mrf.mxu2 }
  0xc8   :  { %v420_v30 = vadd.f32 %v419_v12, %v331_v18 }
  0xcf   :  { %v442_v16 = vpop.f32.mrf.mxu3 }
  0xd0   :  { %v443_v34 = vadd.f32 %v442_v16, %v332_v27 }
  0xd9   :  { %v462_v14 = vpop.f32.mrf.mxu0 }
  0xda   :  { %v463_v15 = vadd.f32 %v462_v14, %v333_v11 }
  0xdc   :  { %644 = vmatpush.xpose.msrb.mxu2 %v463_v15 }
  0xdd   :  { %v1877_v35 = vpop.f32.mrf.mxu1 }
  0xdf   :  { %645 = vmatmul.f32.vlgmr.msrb.gmra.mxu2 %v371_v17 }
  0xe0   :  { %v508_v2 = vpop.f32.mrf.mxu2 }
  0xe1   :  { %v465_v19 = vpop.f32.mrf.mxu0  ;;  %v509_v20 = vadd.f32 %v508_v2, %v335_v51 }
  0xe2   :  { %v466_v22 = vadd.f32 %v465_v19, %v333_v11 }
  0xe3   :  { %917 = vmatpush.xpose.msrb.mxu0 %v509_v20 }
  0xe4   :  { %664 = vmatpush.xpose.msrb.mxu3 %v466_v22 }
  0xe5   :  { %v531_v25 = vpop.f32.mrf.mxu3 }
  0xe6   :  { %v532_v26 = vadd.f32 %v531_v25, %v336_v23  ;;  %918 = vmatmul.f32.vlgmr.msrb.gmra.mxu0 %v417_v21  ;;  %v1879_v37 = vpop.f32.mrf.mxu1 }
  0xe7   :  { %665 = vmatmul.f32.vlgmr.msrb.gmra.mxu3 %v374_v24 }
  0xe8   :  { %v511_v28 = vpop.f32.mrf.mxu2  ;;  %1053 = vmatpush.xpose.msra.mxu0 %v532_v26 }
  0xe9   :  { %v512_v29 = vadd.f32 %v511_v28, %v335_v51 }
  0xeb   :  { %937 = vmatpush.xpose.msrb.mxu1 %v512_v29 }
  0xed   :  { %v534_v32 = vpop.f32.mrf.mxu3 }
  0xee   :  { %938 = vmatmul.f32.vlgmr.msrb.gmra.mxu1 %v420_v30  ;;  %v535_v33 = vadd.f32 %v534_v32, %v336_v23  ;;  %1054 = vmatmul.f32.vlgmr.msra.gmra.mxu0 %v440_v31 }
  0xf0   :  { %1073 = vmatpush.xpose.msra.mxu1 %v535_v33 }
  0xf6   :  { %1074 = vmatmul.f32.vlgmr.msra.gmra.mxu1 %v443_v34 }
  0xff   :  { %v485_v41 = vpop.f32.mrf.mxu1 }
 0x100   :  { %v600_v39 = vpop.f32.mrf.mxu2  ;;  %v486_v54 = vadd.f32 %v485_v41, %v334_v50 }
 0x101   :  { %v1881_v40 = vadd.f32 %v600_v39, %v339_v38 }
 0x104   :  { %v554_v55 = vpop.f32.mrf.mxu0 }
 0x105   :  { %v555_v57 = vadd.f32 %v554_v55, %v337_v52 }
 0x106   :  { %v623_v45 = vpop.f32.mrf.mxu3 }
 0x107   :  { %v1885_v46 = vadd.f32 %v623_v45, %v340_v42  ;;  %v488_v47 = vpop.f32.mrf.mxu1  ;;  %738 = vmatpush.msra.mxu2 %v555_v57  ;;  %v1188_v45 = vld [vmem:[#allocation8 + $0x70] sm:$0xff] }
 0x108   :  { %v603_v43 = vpop.f32.mrf.mxu2  ;;  %v489_v59 = vadd.f32 %v488_v47, %v334_v50 }
 0x109   :  { %v1883_v44 = vadd.f32 %v603_v43, %v339_v38  ;;  %781 = vmatpush.xpose.msrb.mxu2 %v486_v54  ;;  %v1189_v43 = vld [vmem:[#allocation8 + $0x78] sm:$0xff]  ;;  %v1186_v54 = vld [vmem:[#allocation8 + $0x60] sm:$0xff] }
 0x10a   :  { %1242 = vmatpush.msrb.mxu0 %v1189_v43 }
 0x10c   :  { %v557_v60 = vpop.f32.mrf.mxu0  ;;  %1243 = vmatpush.msrb.mxu0 %v1188_v45 }
 0x10d   :  { %v558_v62 = vadd.f32 %v557_v60, %v337_v52  ;;  %v1187_v52 = vld [vmem:[#allocation8 + $0x68] sm:$0xff]  ;;  %v1185_v60 = vld [vmem:[#allocation8 + $0x58] sm:$0xff] }
 0x10e   :  { %v626_v48 = vpop.f32.mrf.mxu3  ;;  %1244 = vmatpush.msrb.mxu0 %v1187_v52 }
 0x10f   :  { %v1887_v49 = vadd.f32 %v626_v48, %v340_v42  ;;  %761 = vmatpush.msra.mxu3 %v558_v62 }
 0x110   :  { %1245 = vmatpush.msrb.mxu0 %v1186_v54 }
 0x111   :  { %801 = vmatpush.xpose.msrb.mxu3 %v489_v59 }
 0x112   :  { %1246 = vmatpush.msrb.mxu0 %v1185_v60 }
 0x11f   :  { %v577_v56 = vpop.f32.mrf.mxu1 }
 0x120   :  { %v1890_v58 = vadd.f32 %v577_v56, %v338_v53 }
 0x127   :  { %v580_v61 = vpop.f32.mrf.mxu1 }
 0x128   :  { %v1892_v63 = vadd.f32 %v580_v61, %v338_v53 }
 0x162   :  { %v646_v0 = vpop.f32.mrf.mxu2 }
 0x163   :  { %v669_v1 = vmul.f32 0.35355338, %v646_v0  ;;  %v919_v7 = vpop.f32.mrf.mxu0 }
 0x164   :  { %v942_v9 = vmul.f32 0.35355338, %v919_v7  ;;  %v330_v7 = vperm.slane %v1869_v10, 1  ;;  %v1179_v10 = vld [vmem:[#allocation8 + $0x28] sm:$0xff] }
 0x165   :  { %v672_v3 = vsel %vm671_vm0, %v669_v1, -inf }
 0x166   :  { %673 = vmax.xlane.f32.xlu0 %v672_v3  ;;  %v944_v11 = vsel %vm671_vm0, %v942_v9, -inf }
 0x16a   :  { %v666_v4 = vpop.f32.mrf.mxu3 }
 0x16b   :  { %v670_v5 = vmul.f32 0.35355338, %v666_v4  ;;  %v939_v6 = vpop.f32.mrf.mxu1 }
 0x16c   :  { %v1903_v26 = vmul.f32 0.35355338, %v939_v6  ;;  %v1183_v6 = vld [vmem:[#allocation8 + $0x48] sm:$0xff] }
 0x16d   :  { %v675_v8 = vsel %vm671_vm0, %v670_v5, -inf }
 0x16e   :  { %676 = vmax.xlane.f32.xlu0 %v675_v8  ;;  %v947_v31 = vsel %vm671_vm0, %v1903_v26, -inf }
 0x173   :  { %v1075_v12 = vpop.f32.mrf.mxu1 }
 0x174   :  { %v1079_v13 = vmul.f32 0.35355338, %v1075_v12 }
 0x176   :  { %945 = vmax.xlane.f32.xlu0 %v944_v11  ;;  %v1083_v14 = vsel %vm671_vm0, %v1079_v13, -inf }
 0x17e   :  { %1084 = vmax.xlane.f32.xlu0 %v1083_v14 }
 0x1d9   :  { %v674_v15 = vpop.xlane.xlu0 %673 }
 0x1da   :  { %v678_v16 = vsub.f32 %v669_v1, %v674_v15  ;;  %v1184_v1 = vld [vmem:[#allocation8 + $0x50] sm:$0xff]  ;;  %v394_v15 = vadd.f32 %v1877_v35, %v330_v7 }
 0x1db   :  { %1247 = vmatpush.msrb.mxu0 %v1184_v1  ;;  %v1176_v35 = vld [vmem:[#allocation8 + $0x10] sm:$0xff] }
 0x1dc   :  { %v680_v17 = vmul.f32 1.442695, %v678_v16 }
 0x1dd   :  { %1248 = vmatpush.msrb.mxu0 %v1183_v6 }
 0x1de   :  { %1522 = vpow2.f32 %v680_v17  ;;  %v1178_v17 = vld [vmem:[#allocation8 + $0x20] sm:$0xff] }
 0x1e1   :  { %v677_v51 = vpop.xlane.xlu0 %676 }
 0x1e2   :  { %v679_v18 = vsub.f32 %v670_v5, %v677_v51  ;;  %v1177_v51 = vld [vmem:[#allocation8 + $0x18] sm:$0xff] }
 0x1e4   :  { %v1523_v2 = vpop.eup %1522  ;;  %v682_v19 = vmul.f32 1.442695, %v679_v18  ;;  %v397_v18 = vadd.f32 %v1879_v37, %v330_v7 }
 0x1e5   :  { %v684_v20 = vsel %vm671_vm0, %v1523_v2, 0.0 }
 0x1e6   :  { %1524 = vpow2.f32 %v682_v19  ;;  %685 = vadd.xlane.f32.xlu1 %v684_v20  ;;  %v1174_v19 = vld [vmem:[#allocation8] sm:$0xff] }
 0x1e9   :  { %v946_v21 = vpop.xlane.xlu0 %945 }
 0x1ea   :  { %v950_v22 = vsub.f32 %v942_v9, %v946_v21  ;;  %v1182_v9 = vld [vmem:[#allocation8 + $0x40] sm:$0xff] }
 0x1eb   :  { %1249 = vmatpush.msrb.mxu0 %v1182_v9 }
 0x1ec   :  { %v1899_v23 = vpop.eup %1524  ;;  %v952_v24 = vmul.f32 1.442695, %v950_v22 }
 0x1ed   :  { %v687_v25 = vsel %vm671_vm0, %v1899_v23, 0.0 }
 0x1ee   :  { %1526 = vpow2.f32 %v952_v24  ;;  %688 = vadd.xlane.f32.xlu1 %v687_v25  ;;  %v1055_v25 = vpop.f32.mrf.mxu0 }
 0x1f1   :  { %v1085_v27 = vpop.xlane.xlu0 %1084 }
 0x1f2   :  { %v1087_v28 = vsub.f32 %v1079_v13, %v1085_v27  ;;  %v1181_v13 = vld [vmem:[#allocation8 + $0x38] sm:$0xff] }
 0x1f3   :  { %1250 = vmatpush.msrb.mxu0 %v1181_v13 }
 0x1f4   :  { %v1905_v29 = vpop.eup %1526  ;;  %v1090_v30 = vmul.f32 1.442695, %v1087_v28 }
 0x1f5   :  { %v956_v32 = vsel %vm671_vm0, %v1905_v29, 0.0 }
 0x1f6   :  { %1528 = vpow2.f32 %v1090_v30  ;;  %948 = vmax.xlane.f32.xlu1 %v947_v31  ;;  %957 = vadd.xlane.f32.xlu0 %v956_v32 }
 0x1fc   :  { %v1911_v33 = vpop.eup %1528 }
 0x1fd   :  { %v1095_v34 = vsel %vm671_vm0, %v1911_v33, 0.0 }
 0x1fe   :  { %1096 = vadd.xlane.f32.xlu0 %v1095_v34 }
 0x259   :  { %v686_v36 = vpop.xlane.xlu1 %685 }
 0x25a   :  { %1530 = vrcp.f32 %v686_v36  ;;  %v701_v47 = vand.u32 2147483648, %v686_v36  ;;  %v699_v50 = vand.u32 2147483647, %v686_v36  ;;  %vm695_vm2 = vweird.f32 %v686_v36 }
 0x25c   :  { %v702_v56 = vor.u32 1.1754944e-38, %v701_v47  ;;  %vm700_vm4 = vcmp.eq.f32.partialorder %v699_v50, 8.507059e+37 }
 0x260   :  { %v1531_v38 = vpop.eup %1530 }
 0x261   :  { %v691_v39 = vmul.f32 %v1531_v38, %v686_v36  ;;  %v689_v41 = vpop.xlane.xlu1 %688  ;;  %vm696_vm1 = vweird.f32 %v1531_v38 }
 0x262   :  { %1532 = vrcp.f32 %v689_v41  ;;  %vm697_vm3 = vmor %vm695_vm2, %vm696_vm1  ;;  %v715_v3 = vand.u32 2147483648, %v689_v41  ;;  %v713_v5 = vand.u32 2147483647, %v689_v41  ;;  %vm709_vm6 = vweird.f32 %v689_v41 }
 0x263   :  { %v692_v42 = vsub.f32 1.0, %v691_v39 }
 0x264   :  { %v716_v11 = vor.u32 1.1754944e-38, %v715_v3  ;;  %vm714_vm8 = vcmp.eq.f32.partialorder %v713_v5, 8.507059e+37 }
 0x265   :  { %v693_v48 = vmul.f32 %v1531_v38, %v692_v42 }
 0x267   :  { %v694_v53 = vadd.f32 %v1531_v38, %v693_v48 }
 0x268   :  { %v1533_v55 = vpop.eup %1532 }
 0x269   :  { %v698_v57 = vsel %vm697_vm3, %v1531_v38, %v694_v53  ;;  %v705_v59 = vmul.f32 %v1533_v55, %v689_v41  ;;  %vm710_vm5 = vweird.f32 %v1533_v55  ;;  %v949_v28 = vpop.xlane.xlu1 %948 }
 0x26a   :  { %v703_v61 = vsel %vm700_vm4, %v702_v56, %v698_v57  ;;  %vm711_vm7 = vmor %vm709_vm6, %vm710_vm5  ;;  %v951_v32 = vsub.f32 %v1903_v26, %v949_v28  ;;  %v1945_v56 = vpop.xlane.xlu0 %957 }
 0x26b   :  { %v706_v62 = vsub.f32 1.0, %v705_v59  ;;  %v718_v0 = vmul.f32 %v1523_v2, %v703_v61  ;;  %v1175_v2 = vld [vmem:[#allocation8 + $0x8] sm:$0xff]  ;;  %vm967_vm14 = vweird.f32 %v1945_v56 }
 0x26c   :  { %v954_v36 = vmul.f32 1.442695, %v951_v32 }
 0x26d   :  { %v707_v4 = vmul.f32 %v1533_v55, %v706_v62  ;;  %1496 = vmatmul.msk.f32.vlgmr.msra.gmra.mxu2 %vm671_vm0, %v718_v0 }
 0x26e   :  { %874 = vmatpush.msra.mxu2 %v1890_v58  ;;  %v1180_v58 = vld [vmem:[#allocation8 + $0x30] sm:$0xff] }
 0x26f   :  { %v708_v8 = vadd.f32 %v1533_v55, %v707_v4  ;;  %1251 = vmatpush.msrb.mxu0 %v1180_v58 }
 0x271   :  { %v712_v12 = vsel %vm711_vm7, %v1533_v55, %v708_v8  ;;  %1252 = vmatpush.msrb.mxu0 %v1179_v10 }
 0x272   :  { %v717_v14 = vsel %vm714_vm8, %v716_v11, %v712_v12  ;;  %v1952_v61 = vpop.xlane.xlu0 %1096  ;;  %v1205_v11 = vld [vmem:[#allocation8 + $0xf8] sm:$0xff]  ;;  %v1204_v12 = vld [vmem:[#allocation8 + $0xf0] sm:$0xff] }
 0x273   :  { %v719_v16 = vmul.f32 %v1899_v23, %v717_v14  ;;  %1253 = vmatpush.msrb.mxu0 %v1178_v17  ;;  %1265 = vmatpush.msrb.mxu1 %v1205_v11 }
 0x275   :  { %1497 = vmatmul.msk.f32.vlgmr.msra.gmra.mxu3 %vm671_vm0, %v719_v16  ;;  %782 = vmatmul.f32.vlgmr.msrb.gmra.mxu2 %v394_v15  ;;  %v1203_v15 = vld [vmem:[#allocation8 + $0xe8] sm:$0xff] }
 0x276   :  { %1010 = vmatpush.msrb.mxu2 %v1881_v40  ;;  %897 = vmatpush.msra.mxu3 %v1892_v63 }
 0x277   :  { %1254 = vmatpush.msrb.mxu0 %v1177_v51  ;;  %1266 = vmatpush.msrb.mxu1 %v1204_v12  ;;  %v1219_v12 = vld [vmem:[#allocation8 + $0x168] sm:$0xff] }
 0x279   :  { %1255 = vmatpush.msrb.mxu0 %v1176_v35  ;;  %1267 = vmatpush.msrb.mxu1 %v1203_v15 }
 0x27b   :  { %1256 = vmatpush.msrb.mxu0 %v1175_v2  ;;  %v1202_v2 = vld [vmem:[#allocation8 + $0xe0] sm:$0xff] }
 0x27c   :  { %1268 = vmatpush.msrb.mxu1 %v1202_v2 }
 0x27d   :  { %802 = vmatmul.f32.vlgmr.msrb.gmra.mxu3 %v397_v18  ;;  %1257 = vmatpush.msrb.mxu0 %v1174_v19  ;;  %v973_v19 = vand.u32 2147483648, %v1945_v56 }
 0x27e   :  { %1033 = vmatpush.msrb.mxu3 %v1883_v44  ;;  %v1078_v44 = vmul.f32 0.35355338, %v1055_v25 }
 0x27f   :  { %v974_v32 = vor.u32 1.1754944e-38, %v973_v19  ;;  %v1217_v19 = vld [vmem:[#allocation8 + $0x158] sm:$0xff] }
 0x280   :  { %v1080_v27 = vsel %vm671_vm0, %v1078_v44, -inf }
 0x2f0   :  { %v740_v40 = vpop.f32.mrf.mxu2 }
 0x2f1   :  { %1258 = vmatmul.f32.vlgmr.msrb.gmra.mxu0 %v740_v40 }
 0x2f8   :  { %v763_v63 = vpop.f32.mrf.mxu3  ;;  %v783_v20 = vpop.f32.mrf.mxu2 }
 0x2f9   :  { %v806_v21 = vmul.f32 0.35355338, %v783_v20  ;;  %1261 = vmatmul.f32.gmra.mxu0 %v763_v63  ;;  %v971_v20 = vand.u32 2147483647, %v1945_v56 }
 0x2fb   :  { %v808_v22 = vsel %vm671_vm0, %v806_v21, -inf  ;;  %vm972_vm2 = vcmp.eq.f32.partialorder %v971_v20, 8.507059e+37  ;;  %v1193_v20 = vld [vmem:[#allocation8 + $0x98] sm:$0xff] }
 0x2fc   :  { %809 = vmax.xlane.f32.xlu2 %v808_v22 }
 0x300   :  { %v803_v37 = vpop.f32.mrf.mxu3 }
 0x301   :  { %v807_v23 = vmul.f32 0.35355338, %v803_v37  ;;  %v1201_v37 = vld [vmem:[#allocation8 + $0xd8] sm:$0xff] }
 0x302   :  { %1269 = vmatpush.msrb.mxu1 %v1201_v37  ;;  %v1215_v37 = vld [vmem:[#allocation8 + $0x148] sm:$0xff] }
 0x303   :  { %v811_v24 = vsel %vm671_vm0, %v807_v23, -inf }
 0x304   :  { %812 = vmax.xlane.f32.xlu2 %v811_v24 }
 0x30c   :  { %1081 = vmax.xlane.f32.xlu2 %v1080_v27 }
 0x36f   :  { %v810_v30 = vpop.xlane.xlu2 %809 }
 0x370   :  { %v814_v31 = vsub.f32 %v806_v21, %v810_v30 }
 0x372   :  { %v816_v34 = vmul.f32 1.442695, %v814_v31  ;;  %v1200_v31 = vld [vmem:[#allocation8 + $0xd0] sm:$0xff] }
 0x373   :  { %1270 = vmatpush.msrb.mxu1 %v1200_v31  ;;  %v1212_v31 = vld [vmem:[#allocation8 + $0x130] sm:$0xff] }
 0x374   :  { %1534 = vpow2.f32 %v816_v34 }
 0x375   :  { %1536 = vpow2.f32 %v954_v36 }
 0x377   :  { %v813_v38 = vpop.xlane.xlu2 %812 }
 0x378   :  { %v815_v39 = vsub.f32 %v807_v23, %v813_v38  ;;  %v1199_v38 = vld [vmem:[#allocation8 + $0xc8] sm:$0xff]  ;;  %v1192_v23 = vld [vmem:[#allocation8 + $0x90] sm:$0xff] }
 0x379   :  { %1271 = vmatpush.msrb.mxu1 %v1199_v38  ;;  %v1230_v38 = vld [vmem:[#allocation8 + $0x1c0] sm:$0xff] }
 0x37a   :  { %v1929_v41 = vpop.eup %1534  ;;  %v818_v42 = vmul.f32 1.442695, %v815_v39 }
 0x37b   :  { %v820_v43 = vsel %vm671_vm0, %v1929_v41, 0.0  ;;  %v1933_v47 = vpop.eup %1536 }
 0x37c   :  { %1538 = vpow2.f32 %v818_v42  ;;  %821 = vadd.xlane.f32.xlu1 %v820_v43  ;;  %v959_v53 = vsel %vm671_vm0, %v1933_v47, 0.0 }
 0x37f   :  { %v1082_v45 = vpop.xlane.xlu2 %1081 }
 0x380   :  { %v1086_v48 = vsub.f32 %v1078_v44, %v1082_v45 }
 0x382   :  { %v1935_v50 = vpop.eup %1538  ;;  %v1088_v26 = vmul.f32 1.442695, %v1086_v48 }
 0x383   :  { %v823_v52 = vsel %vm671_vm0, %v1935_v50, 0.0 }
 0x384   :  { %1540 = vpow2.f32 %v1088_v26  ;;  %824 = vadd.xlane.f32.xlu2 %v823_v52  ;;  %960 = vadd.xlane.f32.xlu1 %v959_v53  ;;  %v1198_v52 = vld [vmem:[#allocation8 + $0xc0] sm:$0xff] }
 0x385   :  { %1542 = vrcp.f32 %v1945_v56  ;;  %1272 = vmatpush.msrb.mxu1 %v1198_v52  ;;  %v1226_v52 = vld [vmem:[#allocation8 + $0x1a0] sm:$0xff] }
 0x38a   :  { %v1941_v54 = vpop.eup %1540 }
 0x38b   :  { %v1092_v55 = vsel %vm671_vm0, %v1941_v54, 0.0  ;;  %v1948_v59 = vpop.eup %1542 }
 0x38c   :  { %1093 = vadd.xlane.f32.xlu2 %v1092_v55  ;;  %v963_v60 = vmul.f32 %v1948_v59, %v1945_v56  ;;  %vm968_vm11 = vweird.f32 %v1948_v59 }
 0x38d   :  { %vm1981_vm15 = vmor %vm967_vm14, %vm968_vm11 }
 0x38e   :  { %v964_v0 = vsub.f32 1.0, %v963_v60  ;;  %v1347_v60 = vld [vmem:[#allocation10 + $0x68] sm:$0xff] }
 0x390   :  { %v965_v7 = vmul.f32 %v1948_v59, %v964_v0 }
 0x392   :  { %v966_v17 = vadd.f32 %v1948_v59, %v965_v7  ;;  %v1220_v7 = vld [vmem:[#allocation8 + $0x170] sm:$0xff] }
 0x394   :  { %v970_v28 = vsel %vm1981_vm15, %v1948_v59, %v966_v17  ;;  %vm1117_vm15 = vweird.f32 %v1952_v61  ;;  %v1121_v17 = vand.u32 2147483647, %v1952_v61 }
 0x3ef   :  { %v822_v57 = vpop.xlane.xlu1 %821 }
 0x3f0   :  { %1544 = vrcp.f32 %v822_v57  ;;  %v837_v6 = vand.u32 2147483648, %v822_v57  ;;  %v835_v9 = vand.u32 2147483647, %v822_v57  ;;  %vm831_vm10 = vweird.f32 %v822_v57 }
 0x3f1   :  { %1546 = vrcp.f32 %v1952_v61 }
 0x3f2   :  { %v838_v58 = vor.u32 1.1754944e-38, %v837_v6  ;;  %vm836_vm13 = vcmp.eq.f32.partialorder %v835_v9, 8.507059e+37 }
 0x3f6   :  { %v1545_v62 = vpop.eup %1544 }
 0x3f7   :  { %v827_v1 = vmul.f32 %v1545_v62, %v822_v57  ;;  %v1955_v3 = vpop.xlane.xlu2 %824  ;;  %v1957_v4 = vpop.xlane.xlu1 %960  ;;  %vm832_vm9 = vweird.f32 %v1545_v62 }
 0x3f8   :  { %1548 = vrcp.f32 %v1955_v3  ;;  %v1962_v13 = vpop.eup %1546  ;;  %vm833_vm12 = vmor %vm831_vm10, %vm832_vm9  ;;  %v849_v24 = vand.u32 2147483647, %v1955_v3  ;;  %v851_v25 = vand.u32 2147483648, %v1955_v3  ;;  %vm845_vm3 = vweird.f32 %v1955_v3 }
 0x3f9   :  { %v828_v5 = vsub.f32 1.0, %v827_v1  ;;  %1550 = vrcp.f32 %v1957_v4  ;;  %v1113_v21 = vmul.f32 %v1962_v13, %v1952_v61  ;;  %v987_v55 = vand.u32 2147483648, %v1957_v4  ;;  %v1221_v1 = vld [vmem:[#allocation8 + $0x178] sm:$0xff] }
 0x3fa   :  { %vm850_vm5 = vcmp.eq.f32.partialorder %v849_v24, 8.507059e+37  ;;  %v852_v43 = vor.u32 1.1754944e-38, %v851_v25  ;;  %vm981_vm7 = vweird.f32 %v1957_v4  ;;  %v1214_v24 = vld [vmem:[#allocation8 + $0x140] sm:$0xff] }
 0x3fb   :  { %v829_v8 = vmul.f32 %v1545_v62, %v828_v5  ;;  %v1114_v42 = vsub.f32 1.0, %v1113_v21  ;;  %v988_v6 = vor.u32 1.1754944e-38, %v987_v55  ;;  %v1235_v21 = vld [vmem:[#allocation8 + $0x1e8] sm:$0xff]  ;;  %v1224_v55 = vld [vmem:[#allocation8 + $0x190] sm:$0xff] }
 0x3fd   :  { %v830_v14 = vadd.f32 %v1545_v62, %v829_v8  ;;  %v1115_v59 = vmul.f32 %v1962_v13, %v1114_v42  ;;  %v1208_v42 = vld [vmem:[#allocation8 + $0x110] sm:$0xff] }
 0x3fe   :  { %v1549_v16 = vpop.eup %1548 }
 0x3ff   :  { %v1965_v10 = vpop.eup %1550  ;;  %v834_v51 = vsel %vm833_vm12, %v1545_v62, %v830_v14  ;;  %v841_v18 = vmul.f32 %v1549_v16, %v1955_v3  ;;  %v1969_v35 = vpop.xlane.xlu2 %1093  ;;  %vm846_vm1 = vweird.f32 %v1549_v16  ;;  %v1197_v3 = vld [vmem:[#allocation8 + $0xb8] sm:$0xff]  ;;  %v1195_v14 = vld [vmem:[#allocation8 + $0xa8] sm:$0xff]  ;;  %v1116_v15 = vadd.f32 %v1962_v13, %v1115_v59  ;;  %v1348_v59 = vld [vmem:[#allocation10 + $0x70] sm:$0xff] }
 0x400   :  { %v839_v40 = vsel %vm836_vm13, %v838_v58, %v834_v51  ;;  %v977_v63 = vmul.f32 %v1965_v10, %v1957_v4  ;;  %1552 = vrcp.f32 %v1969_v35  ;;  %vm847_vm4 = vmor %vm845_vm3, %vm846_vm1  ;;  %vm982_vm6 = vweird.f32 %v1965_v10  ;;  %1273 = vmatpush.msrb.mxu1 %v1197_v3 }
 0x401   :  { %v842_v22 = vsub.f32 1.0, %v841_v18  ;;  %v854_v27 = vmul.f32 %v1929_v41, %v839_v40  ;;  %v975_v41 = vsel %vm972_vm2, %v974_v32, %v970_v28  ;;  %vm2003_vm8 = vmor %vm981_vm7, %vm982_vm6  ;;  %v1109_v62 = vand.u32 2147483648, %v1969_v35  ;;  %v1194_v40 = vld [vmem:[#allocation8 + $0xa0] sm:$0xff]  ;;  %v1213_v28 = vld [vmem:[#allocation8 + $0x138] sm:$0xff] }
 0x402   :  { %v978_v44 = vsub.f32 1.0, %v977_v63  ;;  %v990_v0 = vmul.f32 %v1905_v29, %v975_v41  ;;  %v1196_v29 = vld [vmem:[#allocation8 + $0xb0] sm:$0xff]  ;;  %vm1103_vm11 = vweird.f32 %v1969_v35  ;;  %vm1118_vm13 = vweird.f32 %v1962_v13  ;;  %v1231_v32 = vld [vmem:[#allocation8 + $0x1c8] sm:$0xff]  ;;  %v1229_v41 = vld [vmem:[#allocation8 + $0x1b8] sm:$0xff] }
 0x403   :  { %v843_v30 = vmul.f32 %v1549_v16, %v842_v22  ;;  %1498 = vmatmul.msk.f32.vlgmr.msra.gmra.mxu2 %vm671_vm0, %v854_v27  ;;  %v1110_v11 = vor.u32 1.1754944e-38, %v1109_v62  ;;  %1274 = vmatpush.msrb.mxu1 %v1196_v29  ;;  %vm2026_vm1 = vmor %vm1117_vm15, %vm1118_vm13  ;;  %vm1122_vm2 = vcmp.eq.f32.partialorder %v1121_v17, 8.507059e+37  ;;  %v1191_v27 = vld [vmem:[#allocation8 + $0x88] sm:$0xff]  ;;  %v1517_v17 = vld [vmem:[%s2062_s4] ss:$0 sm:$0xff] }
 0x404   :  { %v979_v34 = vmul.f32 %v1965_v10, %v978_v44  ;;  %1146 = vmatpush.msra.mxu2 %v1885_v46  ;;  %v985_v46 = vand.u32 2147483647, %v1957_v4  ;;  %v1120_v63 = vsel %vm2026_vm1, %v1962_v13, %v1116_v15  ;;  %v1234_v13 = vld [vmem:[#allocation8 + $0x1e0] sm:$0xff]  ;;  %v1233_v44 = vld [vmem:[#allocation8 + $0x1d8] sm:$0xff]  ;;  %v1343_v29 = vld [vmem:[#allocation10 + $0x48] sm:$0xff] }
 0x405   :  { %v844_v36 = vadd.f32 %v1549_v16, %v843_v30  ;;  %1275 = vmatpush.msrb.mxu1 %v1195_v14  ;;  %v1232_v30 = vld [vmem:[#allocation8 + $0x1d0] sm:$0xff]  ;;  %v1338_v14 = vld [vmem:[#allocation10 + $0x20] sm:$0xff]  ;;  %v1337_v15 = vld [vmem:[#allocation10 + $0x18] sm:$0xff] }
 0x406   :  { %v1553_v39 = vpop.eup %1552  ;;  %v980_v48 = vadd.f32 %v1965_v10, %v979_v34  ;;  %vm986_vm10 = vcmp.eq.f32.partialorder %v985_v46, 8.507059e+37  ;;  %v1211_v34 = vld [vmem:[#allocation8 + $0x128] sm:$0xff] }
 0x407   :  { %v848_v45 = vsel %vm847_vm4, %v1549_v16, %v844_v36  ;;  %v1099_v26 = vmul.f32 %v1553_v39, %v1969_v35  ;;  %vm1104_vm9 = vweird.f32 %v1553_v39  ;;  %1276 = vmatpush.msrb.mxu1 %v1194_v40  ;;  %v1210_v36 = vld [vmem:[#allocation8 + $0x120] sm:$0xff]  ;;  %v1223_v46 = vld [vmem:[#allocation8 + $0x188] sm:$0xff] }
 0x408   :  { %v853_v53 = vsel %vm850_vm5, %v852_v43, %v848_v45  ;;  %v984_v4 = vsel %vm2003_vm8, %v1965_v10, %v980_v48  ;;  %vm1105_vm12 = vmor %vm1103_vm11, %vm1104_vm9  ;;  %v1218_v10 = vld [vmem:[#allocation8 + $0x160] sm:$0xff]  ;;  %v1228_v43 = vld [vmem:[#allocation8 + $0x1b0] sm:$0xff] }
 0x409   :  { %v1100_v56 = vsub.f32 1.0, %v1099_v26  ;;  %v855_v57 = vmul.f32 %v1935_v50, %v853_v53  ;;  %v1107_v50 = vand.u32 2147483647, %v1969_v35  ;;  %v989_v9 = vsel %vm986_vm10, %v988_v6, %v984_v4  ;;  %v1237_v35 = vld [vmem:[#allocation8 + $0x1f8] sm:$0xff]  ;;  %1277 = vmatpush.msrb.mxu1 %v1193_v20  ;;  %v1207_v45 = vld [vmem:[#allocation8 + $0x108] sm:$0xff]  ;;  %v1206_v26 = vld [vmem:[#allocation8 + $0x100] sm:$0xff] }
 0x40a   :  { %v991_v51 = vmul.f32 %v1933_v47, %v989_v9  ;;  %v1236_v47 = vld [vmem:[#allocation8 + $0x1f0] sm:$0xff]  ;;  %v1227_v48 = vld [vmem:[#allocation8 + $0x1a8] sm:$0xff]  ;;  %v1225_v53 = vld [vmem:[#allocation8 + $0x198] sm:$0xff] }
 0x40b   :  { %v1101_v5 = vmul.f32 %v1553_v39, %v1100_v56  ;;  %1499 = vmatmul.msk.f32.vlgmr.msra.gmra.mxu3 %vm671_vm0, %v855_v57  ;;  %1500 = vmatmul.msk.f32.vlgmr.msrb.gmra.mxu2 %vm671_vm0, %v990_v0  ;;  %vm1108_vm14 = vcmp.eq.f32.partialorder %v1107_v50, 8.507059e+37  ;;  %v1222_v56 = vld [vmem:[#allocation8 + $0x180] sm:$0xff]  ;;  %v1349_v57 = vld [vmem:[#allocation10 + $0x78] sm:$0xff] }
 0x40c   :  { %1169 = vmatpush.msra.mxu3 %v1887_v49  ;;  %1288 = vmatpush.msrb.mxu2 %v1221_v1  ;;  %v1123_v49 = vand.u32 2147483648, %v1952_v61  ;;  %v1216_v61 = vld [vmem:[#allocation8 + $0x150] sm:$0xff]  ;;  %v1346_v50 = vld [vmem:[#allocation10 + $0x60] sm:$0xff]  ;;  %v1345_v6 = vld [vmem:[#allocation10 + $0x58] sm:$0xff] }
 0x40d   :  { %v1102_v8 = vadd.f32 %v1553_v39, %v1101_v5  ;;  %1278 = vmatpush.msrb.mxu1 %v1192_v23  ;;  %1354 = vmatpush.msra.mxu0 %v1349_v57  ;;  %v1341_v9 = vld [vmem:[#allocation10 + $0x38] sm:$0xff] }
 0x40e   :  { %1289 = vmatpush.msrb.mxu2 %v1220_v7  ;;  %v1344_v7 = vld [vmem:[#allocation10 + $0x50] sm:$0xff] }
 0x40f   :  { %v1106_v16 = vsel %vm1105_vm12, %v1553_v39, %v1102_v8  ;;  %1279 = vmatpush.msrb.mxu1 %v1191_v27  ;;  %v1209_v39 = vld [vmem:[#allocation8 + $0x118] sm:$0xff]  ;;  %1355 = vmatpush.msra.mxu0 %v1348_v59  ;;  %v1342_v8 = vld [vmem:[#allocation10 + $0x40] sm:$0xff] }
 0x410   :  { %v1111_v58 = vsel %vm1108_vm14, %v1110_v11, %v1106_v16  ;;  %1290 = vmatpush.msrb.mxu2 %v1219_v12  ;;  %v1340_v11 = vld [vmem:[#allocation10 + $0x30] sm:$0xff]  ;;  %v1339_v12 = vld [vmem:[#allocation10 + $0x28] sm:$0xff]  ;;  %v1428_v27 = vld [vmem:[#allocation11 + $0x58] sm:$0xff] }
 0x411   :  { %v1126_v18 = vmul.f32 %v1941_v54, %v1111_v58  ;;  %v1124_v54 = vor.u32 1.1754944e-38, %v1123_v49  ;;  %1356 = vmatpush.msra.mxu0 %v1347_v60  ;;  %v1336_v16 = vld [vmem:[#allocation10 + $0x10] sm:$0xff]  ;;  %v1335_v49 = vld [vmem:[#allocation10 + $0x8] sm:$0xff]  ;;  %v1334_v58 = vld [vmem:[#allocation10] sm:$0xff] }
 0x412   :  { %1291 = vmatpush.msrb.mxu2 %v1218_v10  ;;  %v1259_v10 = vpop.f32.mrf.mxu0 }
 0x413   :  { %1501 = vmatmul.msk.f32.vlgmr.msrb.gmra.mxu3 %vm671_vm0, %v991_v51  ;;  %1502 = vmatmul.msk.f32.vlgmr.msra.gmra.mxu2 %vm671_vm0, %v1126_v18  ;;  %v1125_v22 = vsel %vm1122_vm2, %v1124_v54, %v1120_v63 }
 0x414   :  { %1311 = vmatpush.msrb.mxu3 %v1237_v35  ;;  %1292 = vmatpush.msrb.mxu2 %v1217_v19  ;;  %v1127_v25 = vmul.f32 %v1911_v33, %v1125_v22  ;;  %v1190_v33 = vld [vmem:[#allocation8 + $0x80] sm:$0xff]  ;;  %v1260_v35 = vadd.f32 %v1517_v17, %v1259_v10 }
 0x415   :  { %1280 = vmatpush.msrb.mxu1 %v1190_v33  ;;  %1357 = vmatpush.msra.mxu0 %v1346_v50  ;;  %v1422_v33 = vld [vmem:[#allocation11 + $0x28] sm:$0xff] }
 0x416   :  { %1312 = vmatpush.msrb.mxu3 %v1236_v47  ;;  %1293 = vmatpush.msrb.mxu2 %v1216_v61 }
 0x417   :  { %1358 = vmatpush.msra.mxu0 %v1345_v6 }
 0x418   :  { %1313 = vmatpush.msrb.mxu3 %v1235_v21  ;;  %1294 = vmatpush.msrb.mxu2 %v1215_v37 }
 0x419   :  { %1359 = vmatpush.msra.mxu0 %v1344_v7 }
 0x41a   :  { %1314 = vmatpush.msrb.mxu3 %v1234_v13  ;;  %1295 = vmatpush.msrb.mxu2 %v1214_v24  ;;  %v1262_v40 = vpop.f32.mrf.mxu0  ;;  %v1432_v13 = vld [vmem:[#allocation11 + $0x78] sm:$0xff]  ;;  %v1431_v24 = vld [vmem:[#allocation11 + $0x70] sm:$0xff] }
 0x41b   :  { %1503 = vmatmul.msk.f32.vlgmr.msra.gmra.mxu3 %vm671_vm0, %v1127_v25  ;;  %1360 = vmatpush.msra.mxu0 %v1343_v29  ;;  %v1263_v61 = vadd.f32 %v1517_v17, %v1262_v40  ;;  %v1430_v25 = vld [vmem:[#allocation11 + $0x68] sm:$0xff] }
 0x41c   :  { %1315 = vmatpush.msrb.mxu3 %v1233_v44  ;;  %1296 = vmatpush.msrb.mxu2 %v1213_v28  ;;  %v1429_v44 = vld [vmem:[#allocation11 + $0x60] sm:$0xff]  ;;  %v1427_v28 = vld [vmem:[#allocation11 + $0x50] sm:$0xff] }
 0x41d   :  { %1361 = vmatpush.msra.mxu0 %v1342_v8  ;;  %1437 = vmatpush.msra.mxu1 %v1432_v13 }
 0x41e   :  { %1316 = vmatpush.msrb.mxu3 %v1232_v30  ;;  %1297 = vmatpush.msrb.mxu2 %v1212_v31  ;;  %v1426_v30 = vld [vmem:[#allocation11 + $0x48] sm:$0xff]  ;;  %v1425_v31 = vld [vmem:[#allocation11 + $0x40] sm:$0xff] }
 0x41f   :  { %1362 = vmatpush.msra.mxu0 %v1341_v9  ;;  %1438 = vmatpush.msra.mxu1 %v1431_v24 }
 0x420   :  { %1317 = vmatpush.msrb.mxu3 %v1231_v32  ;;  %1298 = vmatpush.msrb.mxu2 %v1211_v34  ;;  %v1424_v32 = vld [vmem:[#allocation11 + $0x38] sm:$0xff]  ;;  %v1423_v34 = vld [vmem:[#allocation11 + $0x30] sm:$0xff] }
 0x421   :  { %1363 = vmatpush.msra.mxu0 %v1340_v11  ;;  %1439 = vmatpush.msra.mxu1 %v1430_v25 }
 0x422   :  { %1299 = vmatpush.msrb.mxu2 %v1210_v36  ;;  %1318 = vmatpush.msrb.mxu3 %v1230_v38  ;;  %v1421_v36 = vld [vmem:[#allocation11 + $0x20] sm:$0xff]  ;;  %v1420_v38 = vld [vmem:[#allocation11 + $0x18] sm:$0xff] }
 0x423   :  { %1364 = vmatpush.msra.mxu0 %v1339_v12  ;;  %1440 = vmatpush.msra.mxu1 %v1429_v44 }
 0x424   :  { %1300 = vmatpush.msrb.mxu2 %v1209_v39  ;;  %1319 = vmatpush.msrb.mxu3 %v1229_v41  ;;  %v1419_v39 = vld [vmem:[#allocation11 + $0x10] sm:$0xff]  ;;  %v1518_v41 = vld [vmem:[%s2064_s6] ss:$0 sm:$0xff] }
 0x425   :  { %1365 = vmatpush.msra.mxu0 %v1338_v14  ;;  %1441 = vmatpush.msra.mxu1 %v1428_v27 }
 0x426   :  { %1301 = vmatpush.msrb.mxu2 %v1208_v42  ;;  %1320 = vmatpush.msrb.mxu3 %v1228_v43  ;;  %v1418_v42 = vld [vmem:[#allocation11 + $0x8] sm:$0xff]  ;;  %v1417_v43 = vld [vmem:[#allocation11] sm:$0xff] }
 0x427   :  { %1366 = vmatpush.msra.mxu0 %v1337_v15  ;;  %1442 = vmatpush.msra.mxu1 %v1427_v28 }
 0x428   :  { %1302 = vmatpush.msrb.mxu2 %v1207_v45  ;;  %1321 = vmatpush.msrb.mxu3 %v1227_v48 }
 0x429   :  { %1367 = vmatpush.msra.mxu0 %v1336_v16  ;;  %1443 = vmatpush.msra.mxu1 %v1426_v30 }
 0x42a   :  { %1303 = vmatpush.msrb.mxu2 %v1206_v26  ;;  %1322 = vmatpush.msrb.mxu3 %v1226_v52 }
 0x42b   :  { %1368 = vmatpush.msra.mxu0 %v1335_v49  ;;  %1444 = vmatpush.msra.mxu1 %v1425_v31 }
 0x42c   :  { %1323 = vmatpush.msrb.mxu3 %v1225_v53 }
 0x42d   :  { %1369 = vmatpush.msra.mxu0 %v1334_v58  ;;  %1445 = vmatpush.msra.mxu1 %v1424_v32 }
 0x42e   :  { %1324 = vmatpush.msrb.mxu3 %v1224_v55 }
 0x42f   :  { %1446 = vmatpush.msra.mxu1 %v1423_v34 }
 0x430   :  { %1325 = vmatpush.msrb.mxu3 %v1223_v46 }
 0x431   :  { %1447 = vmatpush.msra.mxu1 %v1422_v33 }
 0x432   :  { %1326 = vmatpush.msrb.mxu3 %v1222_v56 }
 0x433   :  { %1448 = vmatpush.msra.mxu1 %v1421_v36 }
 0x435   :  { %1449 = vmatpush.msra.mxu1 %v1420_v38 }
 0x437   :  { %1450 = vmatpush.msra.mxu1 %v1419_v39 }
 0x439   :  { %1451 = vmatpush.msra.mxu1 %v1418_v42 }
 0x43b   :  { %1452 = vmatpush.msra.mxu1 %v1417_v43 }
 0x486   :  { %v876_v62 = vpop.f32.mrf.mxu2 }
 0x487   :  { %1281 = vmatmul.f32.vlgmr.msrb.gmra.mxu1 %v876_v62 }
 0x48e   :  { %v899_v0 = vpop.f32.mrf.mxu3  ;;  %v1012_v1 = vpop.f32.mrf.mxu2 }
 0x48f   :  { %1284 = vmatmul.f32.gmra.mxu1 %v899_v0  ;;  %1304 = vmatmul.f32.vlgmr.msrb.gmra.mxu2 %v1012_v1 }
 0x496   :  { %v1035_v3 = vpop.f32.mrf.mxu3  ;;  %v1148_v4 = vpop.f32.mrf.mxu2 }
 0x497   :  { %1307 = vmatmul.f32.gmra.mxu2 %v1035_v3  ;;  %1327 = vmatmul.f32.vlgmr.msrb.gmra.mxu3 %v1148_v4 }
 0x49e   :  { %v1171_v5 = vpop.f32.mrf.mxu3 }
 0x49f   :  { %1330 = vmatmul.f32.gmra.mxu3 %v1171_v5 }
 0x504   :  { %v1282_v51 = vpop.f32.mrf.mxu1 }
 0x505   :  { %v1283_v2 = vadd.f32 %v1282_v51, %v1260_v35  ;;  %v1519_v51 = vld [vmem:[%s2066_s8] ss:$0 sm:$0xff]  ;;  %s1480_s8 = sshll.u32 %s2069_s11, 4  ;;  %s1481_s8 = int_to_ptr.hbm [resolvable:$true] %s1480_s8 }
 0x50c   :  { %v1285_v54 = vpop.f32.mrf.mxu1 }
 0x50d   :  { %v1286_v21 = vadd.f32 %v1285_v54, %v1263_v61 }
 0x512   :  { %v1305_v18 = vpop.f32.mrf.mxu2 }
 0x513   :  { %v1306_v19 = vadd.f32 %v1305_v18, %v1283_v2  ;;  %v1520_v18 = vld [vmem:[%s2067_s9] ss:$0 sm:$0xff] }
 0x51a   :  { %v1328_v63 = vpop.f32.mrf.mxu3  ;;  %v1308_v20 = vpop.f32.mrf.mxu2 }
 0x51b   :  { %v1329_v47 = vadd.f32 %v1328_v63, %v1306_v19  ;;  %v1309_v22 = vadd.f32 %v1308_v20, %v1286_v21  ;;  %v1521_v19 = vld [vmem:[%s2068_s10] ss:$0 sm:$0xff] }
 0x51d   :  { %1370 = vmatmul.f32.vlgmr.msra.gmra.mxu0 %v1329_v47 }
 0x522   :  { %v1331_v37 = vpop.f32.mrf.mxu3 }
 0x523   :  { %v1332_v23 = vadd.f32 %v1331_v37, %v1309_v22 }
 0x525   :  { %1373 = vmatmul.f32.gmra.mxu0 %v1332_v23 }
 0x59a   :  { %v1371_v45 = vpop.f32.mrf.mxu0 }
 0x59b   :  { %v1372_v48 = vadd.f32 %v1518_v41, %v1371_v45 }
 0x59d   :  { %v1504_v26 = vmul.f32 -1.442695, %v1372_v48 }
 0x59f   :  { %1554 = vpow2.f32 %v1504_v26 }
 0x5a2   :  { %v1374_v52 = vpop.f32.mrf.mxu0 }
 0x5a3   :  { %v1375_v53 = vadd.f32 %v1518_v41, %v1374_v52 }
 0x5a5   :  { %v1555_v55 = vpop.eup %1554  ;;  %v1505_v46 = vmul.f32 -1.442695, %v1375_v53 }
 0x5a6   :  { %v1383_v56 = vadd.f32 1.0, %v1555_v55 }
 0x5a7   :  { %1556 = vpow2.f32 %v1505_v46 }
 0x5a8   :  { %1558 = vrcp.f32 %v1383_v56  ;;  %v1396_v1 = vand.u32 2147483648, %v1383_v56  ;;  %v1394_v4 = vand.u32 2147483647, %v1383_v56  ;;  %vm1390_vm3 = vweird.f32 %v1383_v56 }
 0x5aa   :  { %v1397_v6 = vor.u32 1.1754944e-38, %v1396_v1  ;;  %vm1395_vm5 = vcmp.eq.f32.partialorder %v1394_v4, 8.507059e+37 }
 0x5ad   :  { %v1557_v57 = vpop.eup %1556 }
 0x5ae   :  { %v1559_v59 = vpop.eup %1558  ;;  %v1384_v60 = vadd.f32 1.0, %v1557_v57 }
 0x5af   :  { %v1386_v62 = vmul.f32 %v1559_v59, %v1383_v56  ;;  %vm1391_vm0 = vweird.f32 %v1559_v59 }
 0x5b0   :  { %1560 = vrcp.f32 %v1384_v60  ;;  %vm1392_vm4 = vmor %vm1390_vm3, %vm1391_vm0  ;;  %v1411_v12 = vand.u32 2147483648, %v1384_v60  ;;  %v1409_v15 = vand.u32 2147483647, %v1384_v60  ;;  %vm1405_vm7 = vweird.f32 %v1384_v60 }
 0x5b1   :  { %v1387_v0 = vsub.f32 1.0, %v1386_v62 }
 0x5b2   :  { %v1412_v49 = vor.u32 1.1754944e-38, %v1411_v12  ;;  %vm1410_vm9 = vcmp.eq.f32.partialorder %v1409_v15, 8.507059e+37 }
 0x5b3   :  { %v1388_v3 = vmul.f32 %v1559_v59, %v1387_v0 }
 0x5b5   :  { %v1389_v5 = vadd.f32 %v1559_v59, %v1388_v3 }
 0x5b6   :  { %v1561_v50 = vpop.eup %1560 }
 0x5b7   :  { %v1393_v7 = vsel %vm1392_vm4, %v1559_v59, %v1389_v5  ;;  %v1401_v29 = vmul.f32 %v1561_v50, %v1384_v60  ;;  %vm1406_vm6 = vweird.f32 %v1561_v50 }
 0x5b8   :  { %v1398_v8 = vsel %vm1395_vm5, %v1397_v6, %v1393_v7  ;;  %vm1407_vm8 = vmor %vm1405_vm7, %vm1406_vm6 }
 0x5b9   :  { %v1415_v9 = vmul.f32 %v1398_v8, %v1372_v48  ;;  %v1402_v11 = vsub.f32 1.0, %v1401_v29 }
 0x5bb   :  { %1453 = vmatmul.f32.vlgmr.msra.gmra.mxu1 %v1415_v9  ;;  %v1403_v14 = vmul.f32 %v1561_v50, %v1402_v11 }
 0x5bd   :  { %v1404_v16 = vadd.f32 %v1561_v50, %v1403_v14 }
 0x5bf   :  { %v1408_v58 = vsel %vm1407_vm8, %v1561_v50, %v1404_v16 }
 0x5c0   :  { %v1413_v10 = vsel %vm1410_vm9, %v1412_v49, %v1408_v58 }
 0x5c1   :  { %v1416_v17 = vmul.f32 %v1413_v10, %v1375_v53 }
 0x5c3   :  { %1456 = vmatmul.f32.gmra.mxu1 %v1416_v17 }
 0x638   :  { %v1454_v35 = vpop.f32.mrf.mxu1 }
 0x639   :  { %v1455_v2 = vadd.f32 %v1519_v51, %v1454_v35 }
 0x63b   :  { %v1464_v40 = vmul.f32 %v1520_v18, %v1455_v2 }
 0x63d   :  { %v1470_v63 = vadd.f32 %v1521_v19, %v1464_v40 }
 0x63f   :  { %1472 = vst [vmem:[#allocation13] sm:$0xff] %v1470_v63 }
 0x640   :  { %v1457_v47 = vpop.f32.mrf.mxu1 }
 0x641   :  { %v1458_v54 = vadd.f32 %v1519_v51, %v1457_v47 }
 0x643   :  { %v1465_v61 = vmul.f32 %v1520_v18, %v1458_v54 }
 0x645   :  { %v1471_v20 = vadd.f32 %v1521_v19, %v1465_v61 }
 0x647   :  { %1473 = vst [vmem:[#allocation13 + $0x8] sm:$0xff] %v1471_v20 }
 0x648   :  { %1486 = dma.vmem_to_hbm [thread:$0]  %s1479_s3, 256, %s1481_s8, [#allocation4], %s1744_s1, %s1744_s1, %s1745_s13  }
 0x649   :  { %1738 = dma.done.wait [#allocation4], 256  }
 0x64a   :  { %1739 = vsyncadd [#allocation4], 4294967040 }
 0x64b   :  { %1491 = vsyncpa [#allocation3], 1 }
 0x64c   :  { %1492 = vsyncpa [#allocation6], 1 }
 0x64d   :  { %1493 = vsyncpa [#allocation9], 1 }
 0x64e   :  { %1494 = vsyncpa [#allocation12], 1 }
 0x64f   :  { %1495 = vsyncpa [#allocation4], 1 }

// kernel: tpu_custom_call.1
= control target key start
LH: loop header
LB: loop body
LE: loop exit
PB: predicated region body
PF: predicated region fallthrough
CT: control target
= control target key end

     0   :  { %16 = vsyncpa [#allocation3], 0  ;;  %s2058_s0 = inlined_call_operand.hbm [shape: f32[2,8,128], index: 0, kind: input, shape index: {}]   ;;  %s2059_s1 = inlined_call_operand.hbm [shape: f32[128,1536], index: 1, kind: input, shape index: {}]   ;;  %s2060_s2 = inlined_call_operand.hbm [shape: f32[1,1536], index: 2, kind: input, shape index: {}]   ;;  %s2061_s3 = inlined_call_operand.hbm [shape: f32[512,128], index: 3, kind: input, shape index: {}]   ;;  %s2062_s4 = inlined_call_operand.vmem [shape: f32[1,128], index: 4, kind: input, shape index: {}]   ;;  %s2063_s5 = inlined_call_operand.hbm [shape: f32[128,128], index: 5, kind: input, shape index: {}]   ;;  %s2064_s6 = inlined_call_operand.vmem [shape: f32[1,128], index: 6, kind: input, shape index: {}]   ;;  %s2065_s7 = inlined_call_operand.hbm [shape: f32[128,128], index: 7, kind: input, shape index: {}]   ;;  %s2066_s8 = inlined_call_operand.vmem [shape: f32[1,128], index: 8, kind: input, shape index: {}]   ;;  %s2067_s9 = inlined_call_operand.vmem [shape: f32[1,128], index: 9, kind: input, shape index: {}]   ;;  %s2068_s10 = inlined_call_operand.vmem [shape: f32[1,128], index: 10, kind: input, shape index: {}]   ;;  %s2069_s11 = inlined_call_operand.hbm [shape: f32[2,8,128], index: 11, kind: output, shape index: {}]  }
   0x1   :  { %17 = vsyncpa [#allocation6], 0 }
   0x2   :  { %18 = vsyncpa [#allocation9], 0 }
   0x3   :  { %19 = vsyncpa [#allocation12], 0  ;;  %s38_s19 = sshll.u32 %s2059_s1, 4  ;;  %s39_s19 = int_to_ptr.hbm [resolvable:$true] %s38_s19 }
   0x4   :  { %20 = vsyncpa [#allocation4], 0  ;;  %s1740_s20 = smov [#allocation5]   ;;  %s1741_s22 = smov 1536  }
   0x5   :  { %s40_s21 = sshll.u32 %s1740_s20, 4  ;;  %s1742_s23 = smov 96   ;;  %s41_s21 = int_to_ptr.vmem [resolvable:$true] %s40_s21 }
   0x6   :  { %46 = dma.hbm_to_vmem [thread:$0]  %s39_s19, 24576, %s41_s21, [#allocation6], %s1741_s22, %s1741_s22, %s1742_s23  }
   0x7   :  { %s62_s26 = sshll.u32 %s2061_s3, 4  ;;  %s1743_s27 = smov [#allocation8]   ;;  %s63_s26 = int_to_ptr.hbm [resolvable:$true] %s62_s26 }
   0x8   :  { %s64_s28 = sshll.u32 %s1743_s27, 4  ;;  %s25_s12 = sshll.u32 %s2058_s0, 4  ;;  %s65_s28 = int_to_ptr.vmem [resolvable:$true] %s64_s28  ;;  %s26_s12 = int_to_ptr.hbm [resolvable:$true] %s25_s12 }
   0x9   :  { %s1744_s1 = smov 128   ;;  %s1745_s13 = smov 8  }
   0xa   :  { %70 = dma.hbm_to_vmem [thread:$0]  %s63_s26, 8192, %s65_s28, [#allocation9], %s1744_s1, %s1744_s1, %s1745_s13  }
   0xb   :  { %s52_s16 = sshll.u32 %s2060_s2, 4  ;;  %s1746_s3 = smov [#allocation2]   ;;  %s53_s16 = int_to_ptr.hbm [resolvable:$true] %s52_s16 }
   0xc   :  { %s27_s17 = sshll.u32 %s1746_s3, 4  ;;  %s1747_s0 = smov [#allocation7]   ;;  %s28_s17 = int_to_ptr.vmem [resolvable:$true] %s27_s17 }
   0xd   :  { %33 = dma.hbm_to_vmem [thread:$0]  %s26_s12, 256, %s28_s17, [#allocation3], %s1744_s1, %s1744_s1, %s1745_s13  }
   0xe   :  { %s54_s18 = sshll.u32 %s1747_s0, 4  ;;  %s77_s21 = sshll.u32 %s2063_s5, 4  ;;  %s55_s18 = int_to_ptr.vmem [resolvable:$true] %s54_s18  ;;  %s78_s21 = int_to_ptr.hbm [resolvable:$true] %s77_s21 }
   0xf   :  { %57 = dma.hbm_to_vmem [thread:$0]  %s53_s16, 192, %s55_s18, [#allocation6]  }
  0x10   :  { %s92_s2 = sshll.u32 %s2065_s7, 4  ;;  %s1748_s24 = smov [#allocation10]   ;;  %s93_s2 = int_to_ptr.hbm [resolvable:$true] %s92_s2 }
  0x11   :  { %s79_s25 = sshll.u32 %s1748_s24, 4  ;;  %s1749_s26 = smov [#allocation11]   ;;  %s80_s25 = int_to_ptr.vmem [resolvable:$true] %s79_s25 }
  0x12   :  { %85 = dma.hbm_to_vmem [thread:$0]  %s78_s21, 2048, %s80_s25, [#allocation9], %s1744_s1, %s1744_s1, %s1745_s13  }
  0x13   :  { %s94_s27 = sshll.u32 %s1749_s26, 4  ;;  %s95_s27 = int_to_ptr.vmem [resolvable:$true] %s94_s27 }
  0x14   :  { %100 = dma.hbm_to_vmem [thread:$0]  %s93_s2, 2048, %s95_s27, [#allocation12], %s1744_s1, %s1744_s1, %s1745_s13  }
  0x15   :  { %1730 = dma.done.wait [#allocation3], 256  }
  0x16   :  { %1731 = vsyncadd [#allocation3], 4294967040 }
  0x17   :  { %1732 = dma.done.wait [#allocation6], 24768  }
  0x18   :  { %1733 = vsyncadd [#allocation6], 4294942528 }
  0x19   :  { %1734 = dma.done.wait [#allocation9], 10240  }
  0x1a   :  { %1735 = vsyncadd [#allocation9], 4294957056 }
  0x1b   :  { %1736 = dma.done.wait [#allocation12], 2048  }
  0x1c   :  { %1737 = vsyncadd [#allocation12], 4294965248  ;;  %v313_v0 = vld [vmem:[#allocation5 + $0x5a0] sm:$0xff]  ;;  %v315_v2 = vld [vmem:[#allocation5 + $0x5b0] sm:$0xff]  ;;  %vm671_vm0 = vcmask 64512   ;;  %s1750_s16 = smov [#allocation13]  }
  0x1d   :  { %v301_v1 = vld [vmem:[#allocation5 + $0x540] sm:$0xff]  ;;  %353 = vmatpush.msra.mxu0 %v313_v0  ;;  %399 = vmatpush.msra.mxu2 %v315_v2  ;;  %v303_v4 = vld [vmem:[#allocation5 + $0x550] sm:$0xff]  ;;  %v316_v7 = vld [vmem:[#allocation5 + $0x5b8] sm:$0xff]  ;;  %s1478_s3 = sshll.u32 %s1750_s16, 4  ;;  %s1479_s3 = int_to_ptr.vmem [resolvable:$true] %s1478_s3 }
  0x1e   :  { %v289_v3 = vld [vmem:[#allocation5 + $0x4e0] sm:$0xff]  ;;  %v291_v5 = vld [vmem:[#allocation5 + $0x4f0] sm:$0xff]  ;;  %422 = vmatpush.msra.mxu3 %v316_v7  ;;  %v304_v9 = vld [vmem:[#allocation5 + $0x558] sm:$0xff] }
  0x1f   :  { %354 = vmatpush.msra.mxu0 %v301_v1  ;;  %v277_v6 = vld [vmem:[#allocation5 + $0x480] sm:$0xff]  ;;  %400 = vmatpush.msra.mxu2 %v303_v4  ;;  %v279_v8 = vld [vmem:[#allocation5 + $0x490] sm:$0xff]  ;;  %v292_v11 = vld [vmem:[#allocation5 + $0x4f8] sm:$0xff] }
  0x20   :  { %v265_v10 = vld [vmem:[#allocation5 + $0x420] sm:$0xff]  ;;  %v267_v12 = vld [vmem:[#allocation5 + $0x430] sm:$0xff]  ;;  %423 = vmatpush.msra.mxu3 %v304_v9  ;;  %v280_v14 = vld [vmem:[#allocation5 + $0x498] sm:$0xff] }
  0x21   :  { %355 = vmatpush.msra.mxu0 %v289_v3  ;;  %401 = vmatpush.msra.mxu2 %v291_v5  ;;  %v253_v13 = vld [vmem:[#allocation5 + $0x3c0] sm:$0xff]  ;;  %v255_v15 = vld [vmem:[#allocation5 + $0x3d0] sm:$0xff]  ;;  %v268_v17 = vld [vmem:[#allocation5 + $0x438] sm:$0xff] }
  0x22   :  { %424 = vmatpush.msra.mxu3 %v292_v11  ;;  %v241_v16 = vld [vmem:[#allocation5 + $0x360] sm:$0xff]  ;;  %v243_v18 = vld [vmem:[#allocation5 + $0x370] sm:$0xff]  ;;  %v256_v20 = vld [vmem:[#allocation5 + $0x3d8] sm:$0xff] }
  0x23   :  { %356 = vmatpush.msra.mxu0 %v277_v6  ;;  %402 = vmatpush.msra.mxu2 %v279_v8  ;;  %v229_v19 = vld [vmem:[#allocation5 + $0x300] sm:$0xff]  ;;  %v231_v21 = vld [vmem:[#allocation5 + $0x310] sm:$0xff]  ;;  %v244_v23 = vld [vmem:[#allocation5 + $0x378] sm:$0xff] }
  0x24   :  { %425 = vmatpush.msra.mxu3 %v280_v14  ;;  %v217_v22 = vld [vmem:[#allocation5 + $0x2a0] sm:$0xff]  ;;  %v219_v24 = vld [vmem:[#allocation5 + $0x2b0] sm:$0xff]  ;;  %v232_v26 = vld [vmem:[#allocation5 + $0x318] sm:$0xff] }
  0x25   :  { %357 = vmatpush.msra.mxu0 %v265_v10  ;;  %403 = vmatpush.msra.mxu2 %v267_v12  ;;  %v205_v25 = vld [vmem:[#allocation5 + $0x240] sm:$0xff]  ;;  %v207_v27 = vld [vmem:[#allocation5 + $0x250] sm:$0xff]  ;;  %v220_v29 = vld [vmem:[#allocation5 + $0x2b8] sm:$0xff] }
  0x26   :  { %426 = vmatpush.msra.mxu3 %v268_v17  ;;  %v193_v28 = vld [vmem:[#allocation5 + $0x1e0] sm:$0xff]  ;;  %v195_v30 = vld [vmem:[#allocation5 + $0x1f0] sm:$0xff]  ;;  %v208_v32 = vld [vmem:[#allocation5 + $0x258] sm:$0xff] }
  0x27   :  { %358 = vmatpush.msra.mxu0 %v253_v13  ;;  %404 = vmatpush.msra.mxu2 %v255_v15  ;;  %v181_v31 = vld [vmem:[#allocation5 + $0x180] sm:$0xff]  ;;  %v183_v33 = vld [vmem:[#allocation5 + $0x190] sm:$0xff]  ;;  %v196_v35 = vld [vmem:[#allocation5 + $0x1f8] sm:$0xff] }
  0x28   :  { %427 = vmatpush.msra.mxu3 %v256_v20  ;;  %v169_v34 = vld [vmem:[#allocation5 + $0x120] sm:$0xff]  ;;  %v171_v36 = vld [vmem:[#allocation5 + $0x130] sm:$0xff]  ;;  %v184_v38 = vld [vmem:[#allocation5 + $0x198] sm:$0xff] }
  0x29   :  { %359 = vmatpush.msra.mxu0 %v241_v16  ;;  %405 = vmatpush.msra.mxu2 %v243_v18  ;;  %v157_v37 = vld [vmem:[#allocation5 + $0xc0] sm:$0xff]  ;;  %v159_v39 = vld [vmem:[#allocation5 + $0xd0] sm:$0xff]  ;;  %v172_v41 = vld [vmem:[#allocation5 + $0x138] sm:$0xff] }
  0x2a   :  { %428 = vmatpush.msra.mxu3 %v244_v23  ;;  %v145_v40 = vld [vmem:[#allocation5 + $0x60] sm:$0xff]  ;;  %v147_v43 = vld [vmem:[#allocation5 + $0x70] sm:$0xff]  ;;  %v160_v44 = vld [vmem:[#allocation5 + $0xd8] sm:$0xff] }
  0x2b   :  { %360 = vmatpush.msra.mxu0 %v229_v19  ;;  %406 = vmatpush.msra.mxu2 %v231_v21  ;;  %v133_v42 = vld [vmem:[#allocation5] sm:$0xff]  ;;  %v135_v46 = vld [vmem:[#allocation5 + $0x10] sm:$0xff]  ;;  %v148_v48 = vld [vmem:[#allocation5 + $0x78] sm:$0xff] }
  0x2c   :  { %429 = vmatpush.msra.mxu3 %v232_v26  ;;  %v317_v45 = vld [vmem:[#allocation5 + $0x5c0] sm:$0xff]  ;;  %v319_v47 = vld [vmem:[#allocation5 + $0x5d0] sm:$0xff]  ;;  %v136_v53 = vld [vmem:[#allocation5 + $0x18] sm:$0xff] }
  0x2d   :  { %361 = vmatpush.msra.mxu0 %v217_v22  ;;  %407 = vmatpush.msra.mxu2 %v219_v24  ;;  %v305_v49 = vld [vmem:[#allocation5 + $0x560] sm:$0xff]  ;;  %v307_v50 = vld [vmem:[#allocation5 + $0x570] sm:$0xff]  ;;  %v320_v55 = vld [vmem:[#allocation5 + $0x5d8] sm:$0xff] }
  0x2e   :  { %430 = vmatpush.msra.mxu3 %v220_v29  ;;  %v1841_v51 = vld [vmem:[#allocation2] sm:$0xff]  ;;  %v293_v52 = vld [vmem:[#allocation5 + $0x500] sm:$0xff]  ;;  %v308_v58 = vld [vmem:[#allocation5 + $0x578] sm:$0xff] }
  0x2f   :  { %362 = vmatpush.msra.mxu0 %v205_v25  ;;  %408 = vmatpush.msra.mxu2 %v207_v27  ;;  %v295_v54 = vld [vmem:[#allocation5 + $0x510] sm:$0xff]  ;;  %v281_v56 = vld [vmem:[#allocation5 + $0x4a0] sm:$0xff]  ;;  %v296_v61 = vld [vmem:[#allocation5 + $0x518] sm:$0xff] }
  0x30   :  { %431 = vmatpush.msra.mxu3 %v208_v32  ;;  %v283_v57 = vld [vmem:[#allocation5 + $0x4b0] sm:$0xff]  ;;  %v269_v59 = vld [vmem:[#allocation5 + $0x440] sm:$0xff]  ;;  %v284_v0 = vld [vmem:[#allocation5 + $0x4b8] sm:$0xff] }
  0x31   :  { %363 = vmatpush.msra.mxu0 %v193_v28  ;;  %409 = vmatpush.msra.mxu2 %v195_v30  ;;  %v271_v60 = vld [vmem:[#allocation5 + $0x450] sm:$0xff]  ;;  %v257_v62 = vld [vmem:[#allocation5 + $0x3e0] sm:$0xff]  ;;  %v1846_v2 = vld [vmem:[#allocation2 + $0x8] sm:$0xff] }
  0x32   :  { %432 = vmatpush.msra.mxu3 %v196_v35  ;;  %v259_v63 = vld [vmem:[#allocation5 + $0x3f0] sm:$0xff]  ;;  %v245_v1 = vld [vmem:[#allocation5 + $0x380] sm:$0xff]  ;;  %v272_v5 = vld [vmem:[#allocation5 + $0x458] sm:$0xff] }
  0x33   :  { %364 = vmatpush.msra.mxu0 %v181_v31  ;;  %410 = vmatpush.msra.mxu2 %v183_v33  ;;  %v247_v3 = vld [vmem:[#allocation5 + $0x390] sm:$0xff]  ;;  %v233_v4 = vld [vmem:[#allocation5 + $0x320] sm:$0xff]  ;;  %v260_v8 = vld [vmem:[#allocation5 + $0x3f8] sm:$0xff] }
  0x34   :  { %433 = vmatpush.msra.mxu3 %v184_v38  ;;  %v235_v6 = vld [vmem:[#allocation5 + $0x330] sm:$0xff]  ;;  %v221_v7 = vld [vmem:[#allocation5 + $0x2c0] sm:$0xff]  ;;  %v314_v10 = vld [vmem:[#allocation5 + $0x5a8] sm:$0xff] }
  0x35   :  { %365 = vmatpush.msra.mxu0 %v169_v34  ;;  %411 = vmatpush.msra.mxu2 %v171_v36  ;;  %v223_v9 = vld [vmem:[#allocation5 + $0x2d0] sm:$0xff]  ;;  %v209_v11 = vld [vmem:[#allocation5 + $0x260] sm:$0xff]  ;;  %v248_v12 = vld [vmem:[#allocation5 + $0x398] sm:$0xff] }
  0x36   :  { %434 = vmatpush.msra.mxu3 %v172_v41  ;;  %v211_v13 = vld [vmem:[#allocation5 + $0x270] sm:$0xff]  ;;  %v302_v14 = vld [vmem:[#allocation5 + $0x548] sm:$0xff]  ;;  %v197_v15 = vld [vmem:[#allocation5 + $0x200] sm:$0xff]  ;;  %376 = vmatpush.msra.mxu1 %v314_v10 }
  0x37   :  { %366 = vmatpush.msra.mxu0 %v157_v37  ;;  %412 = vmatpush.msra.mxu2 %v159_v39  ;;  %v236_v16 = vld [vmem:[#allocation5 + $0x338] sm:$0xff]  ;;  %v199_v17 = vld [vmem:[#allocation5 + $0x210] sm:$0xff]  ;;  %v290_v18 = vld [vmem:[#allocation5 + $0x4e8] sm:$0xff] }
  0x38   :  { %435 = vmatpush.msra.mxu3 %v160_v44  ;;  %v185_v19 = vld [vmem:[#allocation5 + $0x1a0] sm:$0xff]  ;;  %v224_v20 = vld [vmem:[#allocation5 + $0x2d8] sm:$0xff]  ;;  %377 = vmatpush.msra.mxu1 %v302_v14  ;;  %v187_v21 = vld [vmem:[#allocation5 + $0x1b0] sm:$0xff] }
  0x39   :  { %367 = vmatpush.msra.mxu0 %v145_v40  ;;  %413 = vmatpush.msra.mxu2 %v147_v43  ;;  %v278_v22 = vld [vmem:[#allocation5 + $0x488] sm:$0xff]  ;;  %v173_v23 = vld [vmem:[#allocation5 + $0x140] sm:$0xff]  ;;  %v212_v24 = vld [vmem:[#allocation5 + $0x278] sm:$0xff] }
  0x3a   :  { %436 = vmatpush.msra.mxu3 %v148_v48  ;;  %378 = vmatpush.msra.mxu1 %v290_v18  ;;  %v175_v25 = vld [vmem:[#allocation5 + $0x150] sm:$0xff]  ;;  %v266_v26 = vld [vmem:[#allocation5 + $0x428] sm:$0xff]  ;;  %v161_v27 = vld [vmem:[#allocation5 + $0xe0] sm:$0xff] }
  0x3b   :  { %368 = vmatpush.msra.mxu0 %v133_v42  ;;  %414 = vmatpush.msra.mxu2 %v135_v46  ;;  %v200_v28 = vld [vmem:[#allocation5 + $0x218] sm:$0xff]  ;;  %v163_v29 = vld [vmem:[#allocation5 + $0xf0] sm:$0xff]  ;;  %v254_v30 = vld [vmem:[#allocation5 + $0x3c8] sm:$0xff] }
  0x3c   :  { %415 = vmatmul.f32.vlgmr.msra.gmra.mxu2 %v1841_v51  ;;  %369 = vmatmul.f32.vlgmr.msra.gmra.mxu0 %v1841_v51  ;;  %v149_v31 = vld [vmem:[#allocation5 + $0x80] sm:$0xff]  ;;  %v188_v32 = vld [vmem:[#allocation5 + $0x1b8] sm:$0xff]  ;;  %v151_v33 = vld [vmem:[#allocation5 + $0x90] sm:$0xff] }
  0x3d   :  { %445 = vmatpush.msrb.mxu0 %v317_v45  ;;  %491 = vmatpush.msrb.mxu2 %v319_v47  ;;  %v242_v34 = vld [vmem:[#allocation5 + $0x368] sm:$0xff]  ;;  %v137_v35 = vld [vmem:[#allocation5 + $0x20] sm:$0xff]  ;;  %v176_v36 = vld [vmem:[#allocation5 + $0x158] sm:$0xff] }
  0x3e   :  { %437 = vmatpush.msra.mxu3 %v136_v53  ;;  %379 = vmatpush.msra.mxu1 %v278_v22  ;;  %v139_v37 = vld [vmem:[#allocation5 + $0x30] sm:$0xff]  ;;  %v164_v38 = vld [vmem:[#allocation5 + $0xf8] sm:$0xff]  ;;  %v230_v39 = vld [vmem:[#allocation5 + $0x308] sm:$0xff] }
  0x3f   :  { %446 = vmatpush.msrb.mxu0 %v305_v49  ;;  %492 = vmatpush.msrb.mxu2 %v307_v50  ;;  %v323_v40 = vld [vmem:[#allocation5 + $0x5f0] sm:$0xff]  ;;  %v152_v41 = vld [vmem:[#allocation5 + $0x98] sm:$0xff]  ;;  %v218_v42 = vld [vmem:[#allocation5 + $0x2a8] sm:$0xff] }
  0x40   :  { %514 = vmatpush.msrb.mxu3 %v320_v55  ;;  %380 = vmatpush.msra.mxu1 %v266_v26  ;;  %v311_v43 = vld [vmem:[#allocation5 + $0x590] sm:$0xff]  ;;  %v140_v44 = vld [vmem:[#allocation5 + $0x38] sm:$0xff]  ;;  %v206_v45 = vld [vmem:[#allocation5 + $0x248] sm:$0xff] }
  0x41   :  { %447 = vmatpush.msrb.mxu0 %v293_v52  ;;  %493 = vmatpush.msrb.mxu2 %v295_v54  ;;  %v299_v46 = vld [vmem:[#allocation5 + $0x530] sm:$0xff]  ;;  %v324_v47 = vld [vmem:[#allocation5 + $0x5f8] sm:$0xff]  ;;  %v194_v48 = vld [vmem:[#allocation5 + $0x1e8] sm:$0xff] }
  0x42   :  { %438 = vmatmul.f32.vlgmr.msra.gmra.mxu3 %v1841_v51  ;;  %381 = vmatpush.msra.mxu1 %v254_v30  ;;  %v312_v49 = vld [vmem:[#allocation5 + $0x598] sm:$0xff]  ;;  %v182_v50 = vld [vmem:[#allocation5 + $0x188] sm:$0xff]  ;;  %v287_v52 = vld [vmem:[#allocation5 + $0x4d0] sm:$0xff] }
  0x43   :  { %448 = vmatpush.msrb.mxu0 %v281_v56  ;;  %494 = vmatpush.msrb.mxu2 %v283_v57  ;;  %v300_v53 = vld [vmem:[#allocation5 + $0x538] sm:$0xff]  ;;  %v170_v54 = vld [vmem:[#allocation5 + $0x128] sm:$0xff]  ;;  %v275_v55 = vld [vmem:[#allocation5 + $0x470] sm:$0xff] }
  0x44   :  { %515 = vmatpush.msrb.mxu3 %v308_v58  ;;  %418 = vmatmul.f32.gmra.mxu2 %v1846_v2  ;;  %v288_v56 = vld [vmem:[#allocation5 + $0x4d8] sm:$0xff]  ;;  %v158_v57 = vld [vmem:[#allocation5 + $0xc8] sm:$0xff]  ;;  %v263_v58 = vld [vmem:[#allocation5 + $0x410] sm:$0xff] }
  0x45   :  { %449 = vmatpush.msrb.mxu0 %v269_v59  ;;  %495 = vmatpush.msrb.mxu2 %v271_v60  ;;  %v276_v59 = vld [vmem:[#allocation5 + $0x478] sm:$0xff]  ;;  %v146_v60 = vld [vmem:[#allocation5 + $0x68] sm:$0xff]  ;;  %v215_v10 = vld [vmem:[#allocation5 + $0x290] sm:$0xff] }
  0x46   :  { %516 = vmatpush.msrb.mxu3 %v296_v61  ;;  %372 = vmatmul.f32.gmra.mxu0 %v1846_v2  ;;  %v251_v61 = vld [vmem:[#allocation5 + $0x3b0] sm:$0xff]  ;;  %v270_v14 = vld [vmem:[#allocation5 + $0x448] sm:$0xff]  ;;  %v297_v30 = vld [vmem:[#allocation5 + $0x520] sm:$0xff] }
  0x47   :  { %450 = vmatpush.msrb.mxu0 %v257_v62  ;;  %496 = vmatpush.msrb.mxu2 %v259_v63  ;;  %v264_v62 = vld [vmem:[#allocation5 + $0x418] sm:$0xff]  ;;  %v134_v63 = vld [vmem:[#allocation5 + $0x8] sm:$0xff] }
  0x48   :  { %517 = vmatpush.msrb.mxu3 %v284_v0  ;;  %382 = vmatpush.msra.mxu1 %v242_v34  ;;  %v318_v0 = vld [vmem:[#allocation5 + $0x5c8] sm:$0xff]  ;;  %v285_v34 = vld [vmem:[#allocation5 + $0x4c0] sm:$0xff] }
  0x49   :  { %451 = vmatpush.msrb.mxu0 %v245_v1  ;;  %497 = vmatpush.msrb.mxu2 %v247_v3  ;;  %v239_v1 = vld [vmem:[#allocation5 + $0x350] sm:$0xff]  ;;  %v252_v3 = vld [vmem:[#allocation5 + $0x3b8] sm:$0xff]  ;;  %v246_v18 = vld [vmem:[#allocation5 + $0x388] sm:$0xff] }
  0x4a   :  { %518 = vmatpush.msrb.mxu3 %v272_v5  ;;  %383 = vmatpush.msra.mxu1 %v230_v39  ;;  %v306_v5 = vld [vmem:[#allocation5 + $0x568] sm:$0xff] }
  0x4b   :  { %452 = vmatpush.msrb.mxu0 %v233_v4  ;;  %498 = vmatpush.msrb.mxu2 %v235_v6  ;;  %v321_v4 = vld [vmem:[#allocation5 + $0x5e0] sm:$0xff]  ;;  %v227_v6 = vld [vmem:[#allocation5 + $0x2f0] sm:$0xff]  ;;  %v198_v22 = vld [vmem:[#allocation5 + $0x208] sm:$0xff] }
  0x4c   :  { %441 = vmatmul.f32.gmra.mxu3 %v1846_v2  ;;  %384 = vmatpush.msra.mxu1 %v218_v42  ;;  %v150_v26 = vld [vmem:[#allocation5 + $0x88] sm:$0xff]  ;;  %v261_v42 = vld [vmem:[#allocation5 + $0x400] sm:$0xff] }
  0x4d   :  { %453 = vmatpush.msrb.mxu0 %v221_v7  ;;  %519 = vmatpush.msrb.mxu3 %v260_v8  ;;  %v240_v7 = vld [vmem:[#allocation5 + $0x358] sm:$0xff]  ;;  %v309_v8 = vld [vmem:[#allocation5 + $0x580] sm:$0xff]  ;;  %v274_v39 = vld [vmem:[#allocation5 + $0x468] sm:$0xff] }
  0x4e   :  { %499 = vmatpush.msrb.mxu2 %v223_v9  ;;  %385 = vmatpush.msra.mxu1 %v206_v45  ;;  %v294_v9 = vld [vmem:[#allocation5 + $0x508] sm:$0xff]  ;;  %v249_v45 = vld [vmem:[#allocation5 + $0x3a0] sm:$0xff] }
  0x4f   :  { %454 = vmatpush.msrb.mxu0 %v209_v11  ;;  %520 = vmatpush.msrb.mxu3 %v248_v12  ;;  %v228_v11 = vld [vmem:[#allocation5 + $0x2f8] sm:$0xff]  ;;  %v282_v12 = vld [vmem:[#allocation5 + $0x4a8] sm:$0xff] }
  0x50   :  { %500 = vmatpush.msrb.mxu2 %v211_v13  ;;  %386 = vmatpush.msra.mxu1 %v194_v48  ;;  %v203_v13 = vld [vmem:[#allocation5 + $0x230] sm:$0xff]  ;;  %v237_v48 = vld [vmem:[#allocation5 + $0x340] sm:$0xff] }
  0x51   :  { %455 = vmatpush.msrb.mxu0 %v197_v15  ;;  %521 = vmatpush.msrb.mxu3 %v236_v16  ;;  %v191_v15 = vld [vmem:[#allocation5 + $0x1d0] sm:$0xff]  ;;  %v258_v16 = vld [vmem:[#allocation5 + $0x3e8] sm:$0xff] }
  0x52   :  { %501 = vmatpush.msrb.mxu2 %v199_v17  ;;  %387 = vmatpush.msra.mxu1 %v182_v50  ;;  %v179_v17 = vld [vmem:[#allocation5 + $0x170] sm:$0xff]  ;;  %v156_v50 = vld [vmem:[#allocation5 + $0xb8] sm:$0xff] }
  0x53   :  { %456 = vmatpush.msrb.mxu0 %v185_v19  ;;  %522 = vmatpush.msrb.mxu3 %v224_v20  ;;  %v234_v19 = vld [vmem:[#allocation5 + $0x328] sm:$0xff] }
  0x54   :  { %502 = vmatpush.msrb.mxu2 %v187_v21  ;;  %388 = vmatpush.msra.mxu1 %v170_v54  ;;  %v222_v20 = vld [vmem:[#allocation5 + $0x2c8] sm:$0xff]  ;;  %v144_v54 = vld [vmem:[#allocation5 + $0x58] sm:$0xff] }
  0x55   :  { %457 = vmatpush.msrb.mxu0 %v173_v23  ;;  %523 = vmatpush.msrb.mxu3 %v212_v24  ;;  %v210_v21 = vld [vmem:[#allocation5 + $0x268] sm:$0xff] }
  0x56   :  { %503 = vmatpush.msrb.mxu2 %v175_v25  ;;  %389 = vmatpush.msra.mxu1 %v158_v57  ;;  %v186_v23 = vld [vmem:[#allocation5 + $0x1a8] sm:$0xff]  ;;  %v201_v57 = vld [vmem:[#allocation5 + $0x220] sm:$0xff] }
  0x57   :  { %458 = vmatpush.msrb.mxu0 %v161_v27  ;;  %524 = vmatpush.msrb.mxu3 %v200_v28  ;;  %v174_v24 = vld [vmem:[#allocation5 + $0x148] sm:$0xff] }
  0x58   :  { %504 = vmatpush.msrb.mxu2 %v163_v29  ;;  %390 = vmatpush.msra.mxu1 %v146_v60  ;;  %v162_v25 = vld [vmem:[#allocation5 + $0xe8] sm:$0xff] }
  0x59   :  { %459 = vmatpush.msrb.mxu0 %v149_v31  ;;  %525 = vmatpush.msrb.mxu3 %v188_v32  ;;  %v138_v27 = vld [vmem:[#allocation5 + $0x28] sm:$0xff]  ;;  %v167_v32 = vld [vmem:[#allocation5 + $0x110] sm:$0xff] }
  0x5a   :  { %505 = vmatpush.msrb.mxu2 %v151_v33  ;;  %391 = vmatpush.msra.mxu1 %v134_v63  ;;  %v322_v28 = vld [vmem:[#allocation5 + $0x5e8] sm:$0xff]  ;;  %v216_v33 = vld [vmem:[#allocation5 + $0x298] sm:$0xff]  ;;  %v165_v63 = vld [vmem:[#allocation5 + $0x100] sm:$0xff] }
  0x5b   :  { %460 = vmatpush.msrb.mxu0 %v137_v35  ;;  %526 = vmatpush.msrb.mxu3 %v176_v36  ;;  %v310_v29 = vld [vmem:[#allocation5 + $0x588] sm:$0xff]  ;;  %v155_v36 = vld [vmem:[#allocation5 + $0xb0] sm:$0xff] }
  0x5c   :  { %461 = vmatmul.f32.vlgmr.msrb.gmra.mxu0 %v1841_v51  ;;  %506 = vmatpush.msrb.mxu2 %v139_v37  ;;  %v298_v31 = vld [vmem:[#allocation5 + $0x528] sm:$0xff]  ;;  %v204_v37 = vld [vmem:[#allocation5 + $0x238] sm:$0xff] }
  0x5d   :  { %507 = vmatmul.f32.vlgmr.msrb.gmra.mxu2 %v1841_v51  ;;  %527 = vmatpush.msrb.mxu3 %v164_v38  ;;  %v286_v35 = vld [vmem:[#allocation5 + $0x4c8] sm:$0xff]  ;;  %v273_v38 = vld [vmem:[#allocation5 + $0x460] sm:$0xff] }
  0x5e   :  { %583 = vmatpush.msra.mxu2 %v323_v40  ;;  %537 = vmatpush.msra.mxu0 %v321_v4  ;;  %v143_v40 = vld [vmem:[#allocation5 + $0x50] sm:$0xff]  ;;  %v190_v60 = vld [vmem:[#allocation5 + $0x1c8] sm:$0xff]  ;;  %v141_v4 = vld [vmem:[#allocation5 + $0x40] sm:$0xff] }
  0x5f   :  { %528 = vmatpush.msrb.mxu3 %v152_v41  ;;  %468 = vmatpush.msrb.mxu1 %v318_v0  ;;  %v192_v41 = vld [vmem:[#allocation5 + $0x1d8] sm:$0xff]  ;;  %v166_v0 = vld [vmem:[#allocation5 + $0x108] sm:$0xff] }
  0x60   :  { %584 = vmatpush.msra.mxu2 %v311_v43  ;;  %392 = vmatmul.f32.vlgmr.msra.gmra.mxu1 %v1841_v51  ;;  %v262_v43 = vld [vmem:[#allocation5 + $0x408] sm:$0xff] }
  0x61   :  { %529 = vmatpush.msrb.mxu3 %v140_v44  ;;  %469 = vmatpush.msrb.mxu1 %v306_v5  ;;  %v180_v44 = vld [vmem:[#allocation5 + $0x178] sm:$0xff]  ;;  %v142_v5 = vld [vmem:[#allocation5 + $0x48] sm:$0xff] }
  0x62   :  { %530 = vmatmul.f32.vlgmr.msrb.gmra.mxu3 %v1841_v51  ;;  %585 = vmatpush.msra.mxu2 %v299_v46  ;;  %v250_v46 = vld [vmem:[#allocation5 + $0x3a8] sm:$0xff] }
  0x63   :  { %606 = vmatpush.msra.mxu3 %v324_v47  ;;  %538 = vmatpush.msra.mxu0 %v309_v8  ;;  %v168_v47 = vld [vmem:[#allocation5 + $0x118] sm:$0xff] }
  0x64   :  { %464 = vmatmul.f32.gmra.mxu0 %v1846_v2  ;;  %586 = vmatpush.msra.mxu2 %v287_v52  ;;  %v225_v52 = vld [vmem:[#allocation5 + $0x2e0] sm:$0xff] }
  0x65   :  { %510 = vmatmul.f32.gmra.mxu2 %v1846_v2  ;;  %607 = vmatpush.msra.mxu3 %v312_v49  ;;  %v238_v49 = vld [vmem:[#allocation5 + $0x348] sm:$0xff] }
  0x66   :  { %587 = vmatpush.msra.mxu2 %v275_v55  ;;  %470 = vmatpush.msrb.mxu1 %v294_v9  ;;  %v213_v55 = vld [vmem:[#allocation5 + $0x280] sm:$0xff] }
  0x67   :  { %608 = vmatpush.msra.mxu3 %v300_v53  ;;  %539 = vmatpush.msra.mxu0 %v297_v30  ;;  %v226_v53 = vld [vmem:[#allocation5 + $0x2e8] sm:$0xff] }
  0x68   :  { %588 = vmatpush.msra.mxu2 %v263_v58  ;;  %471 = vmatpush.msrb.mxu1 %v282_v12  ;;  %v202_v58 = vld [vmem:[#allocation5 + $0x228] sm:$0xff] }
  0x69   :  { %609 = vmatpush.msra.mxu3 %v288_v56  ;;  %395 = vmatmul.f32.gmra.mxu1 %v1846_v2  ;;  %v214_v56 = vld [vmem:[#allocation5 + $0x288] sm:$0xff] }
  0x6a   :  { %533 = vmatmul.f32.gmra.mxu3 %v1846_v2  ;;  %589 = vmatpush.msra.mxu2 %v251_v61  ;;  %v177_v61 = vld [vmem:[#allocation5 + $0x160] sm:$0xff] }
  0x6b   :  { %610 = vmatpush.msra.mxu3 %v276_v59  ;;  %472 = vmatpush.msrb.mxu1 %v270_v14  ;;  %v189_v59 = vld [vmem:[#allocation5 + $0x1c0] sm:$0xff] }
  0x6c   :  { %590 = vmatpush.msra.mxu2 %v239_v1  ;;  %540 = vmatpush.msra.mxu0 %v285_v34  ;;  %v153_v1 = vld [vmem:[#allocation5 + $0xa0] sm:$0xff] }
  0x6d   :  { %611 = vmatpush.msra.mxu3 %v264_v62  ;;  %473 = vmatpush.msrb.mxu1 %v258_v16  ;;  %v178_v62 = vld [vmem:[#allocation5 + $0x168] sm:$0xff] }
  0x6e   :  { %591 = vmatpush.msra.mxu2 %v227_v6  ;;  %541 = vmatpush.msra.mxu0 %v273_v38 }
  0x6f   :  { %612 = vmatpush.msra.mxu3 %v252_v3  ;;  %474 = vmatpush.msrb.mxu1 %v246_v18  ;;  %v154_v3 = vld [vmem:[#allocation5 + $0xa8] sm:$0xff] }
  0x70   :  { %592 = vmatpush.msra.mxu2 %v215_v10  ;;  %542 = vmatpush.msra.mxu0 %v261_v42  ;;  %v1869_v10 = vld [vmem:[#allocation7] sm:$0xff] }
  0x71   :  { %613 = vmatpush.msra.mxu3 %v240_v7  ;;  %475 = vmatpush.msrb.mxu1 %v234_v19  ;;  %v331_v18 = vperm.slane %v1869_v10, 2 }
  0x72   :  { %593 = vmatpush.msra.mxu2 %v203_v13  ;;  %543 = vmatpush.msra.mxu0 %v249_v45  ;;  %v329_v13 = vperm.slane %v1869_v10, 0 }
  0x73   :  { %614 = vmatpush.msra.mxu3 %v228_v11  ;;  %476 = vmatpush.msrb.mxu1 %v222_v20  ;;  %v333_v11 = vperm.slane %v1869_v10, 4 }
  0x74   :  { %594 = vmatpush.msra.mxu2 %v191_v15  ;;  %544 = vmatpush.msra.mxu0 %v237_v48 }
  0x75   :  { %477 = vmatpush.msrb.mxu1 %v210_v21  ;;  %615 = vmatpush.msra.mxu3 %v216_v33 }
  0x76   :  { %595 = vmatpush.msra.mxu2 %v179_v17  ;;  %545 = vmatpush.msra.mxu0 %v225_v52 }
  0x77   :  { %478 = vmatpush.msrb.mxu1 %v198_v22  ;;  %616 = vmatpush.msra.mxu3 %v204_v37 }
  0x78   :  { %596 = vmatpush.msra.mxu2 %v167_v32  ;;  %546 = vmatpush.msra.mxu0 %v213_v55 }
  0x79   :  { %479 = vmatpush.msrb.mxu1 %v186_v23  ;;  %617 = vmatpush.msra.mxu3 %v192_v41  ;;  %v336_v23 = vperm.slane %v1869_v10, 7 }
  0x7a   :  { %597 = vmatpush.msra.mxu2 %v155_v36  ;;  %547 = vmatpush.msra.mxu0 %v201_v57  ;;  %v326_v36 = vld [vmem:[#allocation7 + $0x8] sm:$0xf] }
  0x7b   :  { %480 = vmatpush.msrb.mxu1 %v174_v24  ;;  %618 = vmatpush.msra.mxu3 %v180_v44  ;;  %v339_v38 = vperm.slane %v326_v36, 2  ;;  %v340_v42 = vperm.slane %v326_v36, 3  ;;  %v337_v52 = vperm.slane %v326_v36, 0 }
  0x7c   :  { %598 = vmatpush.msra.mxu2 %v143_v40  ;;  %548 = vmatpush.msra.mxu0 %v189_v59 }
  0x7d   :  { %481 = vmatpush.msrb.mxu1 %v162_v25  ;;  %599 = vmatmul.f32.vlgmr.msra.gmra.mxu2 %v1841_v51 }
  0x7e   :  { %619 = vmatpush.msra.mxu3 %v168_v47  ;;  %549 = vmatpush.msra.mxu0 %v177_v61 }
  0x7f   :  { %482 = vmatpush.msrb.mxu1 %v150_v26 }
  0x80   :  { %620 = vmatpush.msra.mxu3 %v156_v50  ;;  %550 = vmatpush.msra.mxu0 %v165_v63  ;;  %v334_v50 = vperm.slane %v1869_v10, 5 }
  0x81   :  { %483 = vmatpush.msrb.mxu1 %v138_v27  ;;  %v332_v27 = vperm.slane %v1869_v10, 3 }
  0x82   :  { %484 = vmatmul.f32.vlgmr.msrb.gmra.mxu1 %v1841_v51  ;;  %621 = vmatpush.msra.mxu3 %v144_v54 }
  0x83   :  { %560 = vmatpush.msra.mxu1 %v322_v28  ;;  %622 = vmatmul.f32.vlgmr.msra.gmra.mxu3 %v1841_v51 }
  0x84   :  { %551 = vmatpush.msra.mxu0 %v153_v1 }
  0x85   :  { %561 = vmatpush.msra.mxu1 %v310_v29  ;;  %602 = vmatmul.f32.gmra.mxu2 %v1846_v2 }
  0x86   :  { %552 = vmatpush.msra.mxu0 %v141_v4 }
  0x87   :  { %562 = vmatpush.msra.mxu1 %v298_v31  ;;  %553 = vmatmul.f32.vlgmr.msra.gmra.mxu0 %v1841_v51 }
  0x89   :  { %563 = vmatpush.msra.mxu1 %v286_v35 }
  0x8a   :  { %487 = vmatmul.f32.gmra.mxu1 %v1846_v2 }
  0x8b   :  { %564 = vmatpush.msra.mxu1 %v274_v39  ;;  %625 = vmatmul.f32.gmra.mxu3 %v1846_v2 }
  0x8d   :  { %565 = vmatpush.msra.mxu1 %v262_v43 }
  0x8f   :  { %566 = vmatpush.msra.mxu1 %v250_v46  ;;  %556 = vmatmul.f32.gmra.mxu0 %v1846_v2 }
  0x91   :  { %567 = vmatpush.msra.mxu1 %v238_v49 }
  0x93   :  { %568 = vmatpush.msra.mxu1 %v226_v53  ;;  %v338_v53 = vperm.slane %v326_v36, 1 }
  0x95   :  { %569 = vmatpush.msra.mxu1 %v214_v56 }
  0x97   :  { %570 = vmatpush.msra.mxu1 %v202_v58 }
  0x99   :  { %571 = vmatpush.msra.mxu1 %v190_v60 }
  0x9b   :  { %572 = vmatpush.msra.mxu1 %v178_v62 }
  0x9d   :  { %573 = vmatpush.msra.mxu1 %v166_v0 }
  0x9f   :  { %574 = vmatpush.msra.mxu1 %v154_v3 }
  0xa1   :  { %575 = vmatpush.msra.mxu1 %v142_v5 }
  0xa2   :  { %576 = vmatmul.f32.vlgmr.msra.gmra.mxu1 %v1841_v51  ;;  %v335_v51 = vperm.slane %v1869_v10, 6 }
  0xaa   :  { %579 = vmatmul.f32.gmra.mxu1 %v1846_v2 }
  0xb9   :  { %v370_v6 = vpop.f32.mrf.mxu0 }
  0xba   :  { %v371_v17 = vadd.f32 %v370_v6, %v329_v13 }
  0xbf   :  { %v416_v7 = vpop.f32.mrf.mxu2 }
  0xc0   :  { %v417_v21 = vadd.f32 %v416_v7, %v331_v18 }
  0xc3   :  { %v373_v8 = vpop.f32.mrf.mxu0 }
  0xc4   :  { %v374_v24 = vadd.f32 %v373_v8, %v329_v13 }
  0xc5   :  { %v439_v9 = vpop.f32.mrf.mxu3 }
  0xc6   :  { %v440_v31 = vadd.f32 %v439_v9, %v332_v27 }
  0xc7   :  { %v419_v12 = vpop.f32.mrf.mxu2 }
  0xc8   :  { %v420_v30 = vadd.f32 %v419_v12, %v331_v18 }
  0xcf   :  { %v442_v16 = vpop.f32.mrf.mxu3 }
  0xd0   :  { %v443_v34 = vadd.f32 %v442_v16, %v332_v27 }
  0xd9   :  { %v462_v14 = vpop.f32.mrf.mxu0 }
  0xda   :  { %v463_v15 = vadd.f32 %v462_v14, %v333_v11 }
  0xdc   :  { %644 = vmatpush.xpose.msrb.mxu2 %v463_v15 }
  0xdd   :  { %v1877_v35 = vpop.f32.mrf.mxu1 }
  0xdf   :  { %645 = vmatmul.f32.vlgmr.msrb.gmra.mxu2 %v371_v17 }
  0xe0   :  { %v508_v2 = vpop.f32.mrf.mxu2 }
  0xe1   :  { %v465_v19 = vpop.f32.mrf.mxu0  ;;  %v509_v20 = vadd.f32 %v508_v2, %v335_v51 }
  0xe2   :  { %v466_v22 = vadd.f32 %v465_v19, %v333_v11 }
  0xe3   :  { %917 = vmatpush.xpose.msrb.mxu0 %v509_v20 }
  0xe4   :  { %664 = vmatpush.xpose.msrb.mxu3 %v466_v22 }
  0xe5   :  { %v531_v25 = vpop.f32.mrf.mxu3 }
  0xe6   :  { %v532_v26 = vadd.f32 %v531_v25, %v336_v23  ;;  %918 = vmatmul.f32.vlgmr.msrb.gmra.mxu0 %v417_v21  ;;  %v1879_v37 = vpop.f32.mrf.mxu1 }
  0xe7   :  { %665 = vmatmul.f32.vlgmr.msrb.gmra.mxu3 %v374_v24 }
  0xe8   :  { %v511_v28 = vpop.f32.mrf.mxu2  ;;  %1053 = vmatpush.xpose.msra.mxu0 %v532_v26 }
  0xe9   :  { %v512_v29 = vadd.f32 %v511_v28, %v335_v51 }
  0xeb   :  { %937 = vmatpush.xpose.msrb.mxu1 %v512_v29 }
  0xed   :  { %v534_v32 = vpop.f32.mrf.mxu3 }
  0xee   :  { %938 = vmatmul.f32.vlgmr.msrb.gmra.mxu1 %v420_v30  ;;  %v535_v33 = vadd.f32 %v534_v32, %v336_v23  ;;  %1054 = vmatmul.f32.vlgmr.msra.gmra.mxu0 %v440_v31 }
  0xf0   :  { %1073 = vmatpush.xpose.msra.mxu1 %v535_v33 }
  0xf6   :  { %1074 = vmatmul.f32.vlgmr.msra.gmra.mxu1 %v443_v34 }
  0xff   :  { %v485_v41 = vpop.f32.mrf.mxu1 }
 0x100   :  { %v600_v39 = vpop.f32.mrf.mxu2  ;;  %v486_v54 = vadd.f32 %v485_v41, %v334_v50 }
 0x101   :  { %v1881_v40 = vadd.f32 %v600_v39, %v339_v38 }
 0x104   :  { %v554_v55 = vpop.f32.mrf.mxu0 }
 0x105   :  { %v555_v57 = vadd.f32 %v554_v55, %v337_v52 }
 0x106   :  { %v623_v45 = vpop.f32.mrf.mxu3 }
 0x107   :  { %v1885_v46 = vadd.f32 %v623_v45, %v340_v42  ;;  %v488_v47 = vpop.f32.mrf.mxu1  ;;  %738 = vmatpush.msra.mxu2 %v555_v57  ;;  %v1188_v45 = vld [vmem:[#allocation8 + $0x70] sm:$0xff] }
 0x108   :  { %v603_v43 = vpop.f32.mrf.mxu2  ;;  %v489_v59 = vadd.f32 %v488_v47, %v334_v50 }
 0x109   :  { %v1883_v44 = vadd.f32 %v603_v43, %v339_v38  ;;  %781 = vmatpush.xpose.msrb.mxu2 %v486_v54  ;;  %v1189_v43 = vld [vmem:[#allocation8 + $0x78] sm:$0xff]  ;;  %v1186_v54 = vld [vmem:[#allocation8 + $0x60] sm:$0xff] }
 0x10a   :  { %1242 = vmatpush.msrb.mxu0 %v1189_v43 }
 0x10c   :  { %v557_v60 = vpop.f32.mrf.mxu0  ;;  %1243 = vmatpush.msrb.mxu0 %v1188_v45 }
 0x10d   :  { %v558_v62 = vadd.f32 %v557_v60, %v337_v52  ;;  %v1187_v52 = vld [vmem:[#allocation8 + $0x68] sm:$0xff]  ;;  %v1185_v60 = vld [vmem:[#allocation8 + $0x58] sm:$0xff] }
 0x10e   :  { %v626_v48 = vpop.f32.mrf.mxu3  ;;  %1244 = vmatpush.msrb.mxu0 %v1187_v52 }
 0x10f   :  { %v1887_v49 = vadd.f32 %v626_v48, %v340_v42  ;;  %761 = vmatpush.msra.mxu3 %v558_v62 }
 0x110   :  { %1245 = vmatpush.msrb.mxu0 %v1186_v54 }
 0x111   :  { %801 = vmatpush.xpose.msrb.mxu3 %v489_v59 }
 0x112   :  { %1246 = vmatpush.msrb.mxu0 %v1185_v60 }
 0x11f   :  { %v577_v56 = vpop.f32.mrf.mxu1 }
 0x120   :  { %v1890_v58 = vadd.f32 %v577_v56, %v338_v53 }
 0x127   :  { %v580_v61 = vpop.f32.mrf.mxu1 }
 0x128   :  { %v1892_v63 = vadd.f32 %v580_v61, %v338_v53 }
 0x162   :  { %v646_v0 = vpop.f32.mrf.mxu2 }
 0x163   :  { %v669_v1 = vmul.f32 0.35355338, %v646_v0  ;;  %v919_v7 = vpop.f32.mrf.mxu0 }
 0x164   :  { %v942_v9 = vmul.f32 0.35355338, %v919_v7  ;;  %v330_v7 = vperm.slane %v1869_v10, 1  ;;  %v1179_v10 = vld [vmem:[#allocation8 + $0x28] sm:$0xff] }
 0x165   :  { %v672_v3 = vsel %vm671_vm0, %v669_v1, -inf }
 0x166   :  { %673 = vmax.xlane.f32.xlu0 %v672_v3  ;;  %v944_v11 = vsel %vm671_vm0, %v942_v9, -inf }
 0x16a   :  { %v666_v4 = vpop.f32.mrf.mxu3 }
 0x16b   :  { %v670_v5 = vmul.f32 0.35355338, %v666_v4  ;;  %v939_v6 = vpop.f32.mrf.mxu1 }
 0x16c   :  { %v1903_v26 = vmul.f32 0.35355338, %v939_v6  ;;  %v1183_v6 = vld [vmem:[#allocation8 + $0x48] sm:$0xff] }
 0x16d   :  { %v675_v8 = vsel %vm671_vm0, %v670_v5, -inf }
 0x16e   :  { %676 = vmax.xlane.f32.xlu0 %v675_v8  ;;  %v947_v31 = vsel %vm671_vm0, %v1903_v26, -inf }
 0x173   :  { %v1075_v12 = vpop.f32.mrf.mxu1 }
 0x174   :  { %v1079_v13 = vmul.f32 0.35355338, %v1075_v12 }
 0x176   :  { %945 = vmax.xlane.f32.xlu0 %v944_v11  ;;  %v1083_v14 = vsel %vm671_vm0, %v1079_v13, -inf }
 0x17e   :  { %1084 = vmax.xlane.f32.xlu0 %v1083_v14 }
 0x1d9   :  { %v674_v15 = vpop.xlane.xlu0 %673 }
 0x1da   :  { %v678_v16 = vsub.f32 %v669_v1, %v674_v15  ;;  %v1184_v1 = vld [vmem:[#allocation8 + $0x50] sm:$0xff]  ;;  %v394_v15 = vadd.f32 %v1877_v35, %v330_v7 }
 0x1db   :  { %1247 = vmatpush.msrb.mxu0 %v1184_v1  ;;  %v1176_v35 = vld [vmem:[#allocation8 + $0x10] sm:$0xff] }
 0x1dc   :  { %v680_v17 = vmul.f32 1.442695, %v678_v16 }
 0x1dd   :  { %1248 = vmatpush.msrb.mxu0 %v1183_v6 }
 0x1de   :  { %1522 = vpow2.f32 %v680_v17  ;;  %v1178_v17 = vld [vmem:[#allocation8 + $0x20] sm:$0xff] }
 0x1e1   :  { %v677_v51 = vpop.xlane.xlu0 %676 }
 0x1e2   :  { %v679_v18 = vsub.f32 %v670_v5, %v677_v51  ;;  %v1177_v51 = vld [vmem:[#allocation8 + $0x18] sm:$0xff] }
 0x1e4   :  { %v1523_v2 = vpop.eup %1522  ;;  %v682_v19 = vmul.f32 1.442695, %v679_v18  ;;  %v397_v18 = vadd.f32 %v1879_v37, %v330_v7 }
 0x1e5   :  { %v684_v20 = vsel %vm671_vm0, %v1523_v2, 0.0 }
 0x1e6   :  { %1524 = vpow2.f32 %v682_v19  ;;  %685 = vadd.xlane.f32.xlu1 %v684_v20  ;;  %v1174_v19 = vld [vmem:[#allocation8] sm:$0xff] }
 0x1e9   :  { %v946_v21 = vpop.xlane.xlu0 %945 }
 0x1ea   :  { %v950_v22 = vsub.f32 %v942_v9, %v946_v21  ;;  %v1182_v9 = vld [vmem:[#allocation8 + $0x40] sm:$0xff] }
 0x1eb   :  { %1249 = vmatpush.msrb.mxu0 %v1182_v9 }
 0x1ec   :  { %v1899_v23 = vpop.eup %1524  ;;  %v952_v24 = vmul.f32 1.442695, %v950_v22 }
 0x1ed   :  { %v687_v25 = vsel %vm671_vm0, %v1899_v23, 0.0 }
 0x1ee   :  { %1526 = vpow2.f32 %v952_v24  ;;  %688 = vadd.xlane.f32.xlu1 %v687_v25  ;;  %v1055_v25 = vpop.f32.mrf.mxu0 }
 0x1f1   :  { %v1085_v27 = vpop.xlane.xlu0 %1084 }
 0x1f2   :  { %v1087_v28 = vsub.f32 %v1079_v13, %v1085_v27  ;;  %v1181_v13 = vld [vmem:[#allocation8 + $0x38] sm:$0xff] }
 0x1f3   :  { %1250 = vmatpush.msrb.mxu0 %v1181_v13 }
 0x1f4   :  { %v1905_v29 = vpop.eup %1526  ;;  %v1090_v30 = vmul.f32 1.442695, %v1087_v28 }
 0x1f5   :  { %v956_v32 = vsel %vm671_vm0, %v1905_v29, 0.0 }
 0x1f6   :  { %1528 = vpow2.f32 %v1090_v30  ;;  %948 = vmax.xlane.f32.xlu1 %v947_v31  ;;  %957 = vadd.xlane.f32.xlu0 %v956_v32 }
 0x1fc   :  { %v1911_v33 = vpop.eup %1528 }
 0x1fd   :  { %v1095_v34 = vsel %vm671_vm0, %v1911_v33, 0.0 }
 0x1fe   :  { %1096 = vadd.xlane.f32.xlu0 %v1095_v34 }
 0x259   :  { %v686_v36 = vpop.xlane.xlu1 %685 }
 0x25a   :  { %1530 = vrcp.f32 %v686_v36  ;;  %v701_v47 = vand.u32 2147483648, %v686_v36  ;;  %v699_v50 = vand.u32 2147483647, %v686_v36  ;;  %vm695_vm2 = vweird.f32 %v686_v36 }
 0x25c   :  { %v702_v56 = vor.u32 1.1754944e-38, %v701_v47  ;;  %vm700_vm4 = vcmp.eq.f32.partialorder %v699_v50, 8.507059e+37 }
 0x260   :  { %v1531_v38 = vpop.eup %1530 }
 0x261   :  { %v691_v39 = vmul.f32 %v1531_v38, %v686_v36  ;;  %v689_v41 = vpop.xlane.xlu1 %688  ;;  %vm696_vm1 = vweird.f32 %v1531_v38 }
 0x262   :  { %1532 = vrcp.f32 %v689_v41  ;;  %vm697_vm3 = vmor %vm695_vm2, %vm696_vm1  ;;  %v715_v3 = vand.u32 2147483648, %v689_v41  ;;  %v713_v5 = vand.u32 2147483647, %v689_v41  ;;  %vm709_vm6 = vweird.f32 %v689_v41 }
 0x263   :  { %v692_v42 = vsub.f32 1.0, %v691_v39 }
 0x264   :  { %v716_v11 = vor.u32 1.1754944e-38, %v715_v3  ;;  %vm714_vm8 = vcmp.eq.f32.partialorder %v713_v5, 8.507059e+37 }
 0x265   :  { %v693_v48 = vmul.f32 %v1531_v38, %v692_v42 }
 0x267   :  { %v694_v53 = vadd.f32 %v1531_v38, %v693_v48 }
 0x268   :  { %v1533_v55 = vpop.eup %1532 }
 0x269   :  { %v698_v57 = vsel %vm697_vm3, %v1531_v38, %v694_v53  ;;  %v705_v59 = vmul.f32 %v1533_v55, %v689_v41  ;;  %vm710_vm5 = vweird.f32 %v1533_v55  ;;  %v949_v28 = vpop.xlane.xlu1 %948 }
 0x26a   :  { %v703_v61 = vsel %vm700_vm4, %v702_v56, %v698_v57  ;;  %vm711_vm7 = vmor %vm709_vm6, %vm710_vm5  ;;  %v951_v32 = vsub.f32 %v1903_v26, %v949_v28  ;;  %v1945_v56 = vpop.xlane.xlu0 %957 }
 0x26b   :  { %v706_v62 = vsub.f32 1.0, %v705_v59  ;;  %v718_v0 = vmul.f32 %v1523_v2, %v703_v61  ;;  %v1175_v2 = vld [vmem:[#allocation8 + $0x8] sm:$0xff]  ;;  %vm967_vm14 = vweird.f32 %v1945_v56 }
 0x26c   :  { %v954_v36 = vmul.f32 1.442695, %v951_v32 }
 0x26d   :  { %v707_v4 = vmul.f32 %v1533_v55, %v706_v62  ;;  %1496 = vmatmul.msk.f32.vlgmr.msra.gmra.mxu2 %vm671_vm0, %v718_v0 }
 0x26e   :  { %874 = vmatpush.msra.mxu2 %v1890_v58  ;;  %v1180_v58 = vld [vmem:[#allocation8 + $0x30] sm:$0xff] }
 0x26f   :  { %v708_v8 = vadd.f32 %v1533_v55, %v707_v4  ;;  %1251 = vmatpush.msrb.mxu0 %v1180_v58 }
 0x271   :  { %v712_v12 = vsel %vm711_vm7, %v1533_v55, %v708_v8  ;;  %1252 = vmatpush.msrb.mxu0 %v1179_v10 }
 0x272   :  { %v717_v14 = vsel %vm714_vm8, %v716_v11, %v712_v12  ;;  %v1952_v61 = vpop.xlane.xlu0 %1096  ;;  %v1205_v11 = vld [vmem:[#allocation8 + $0xf8] sm:$0xff]  ;;  %v1204_v12 = vld [vmem:[#allocation8 + $0xf0] sm:$0xff] }
 0x273   :  { %v719_v16 = vmul.f32 %v1899_v23, %v717_v14  ;;  %1253 = vmatpush.msrb.mxu0 %v1178_v17  ;;  %1265 = vmatpush.msrb.mxu1 %v1205_v11 }
 0x275   :  { %1497 = vmatmul.msk.f32.vlgmr.msra.gmra.mxu3 %vm671_vm0, %v719_v16  ;;  %782 = vmatmul.f32.vlgmr.msrb.gmra.mxu2 %v394_v15  ;;  %v1203_v15 = vld [vmem:[#allocation8 + $0xe8] sm:$0xff] }
 0x276   :  { %1010 = vmatpush.msrb.mxu2 %v1881_v40  ;;  %897 = vmatpush.msra.mxu3 %v1892_v63 }
 0x277   :  { %1254 = vmatpush.msrb.mxu0 %v1177_v51  ;;  %1266 = vmatpush.msrb.mxu1 %v1204_v12  ;;  %v1219_v12 = vld [vmem:[#allocation8 + $0x168] sm:$0xff] }
 0x279   :  { %1255 = vmatpush.msrb.mxu0 %v1176_v35  ;;  %1267 = vmatpush.msrb.mxu1 %v1203_v15 }
 0x27b   :  { %1256 = vmatpush.msrb.mxu0 %v1175_v2  ;;  %v1202_v2 = vld [vmem:[#allocation8 + $0xe0] sm:$0xff] }
 0x27c   :  { %1268 = vmatpush.msrb.mxu1 %v1202_v2 }
 0x27d   :  { %802 = vmatmul.f32.vlgmr.msrb.gmra.mxu3 %v397_v18  ;;  %1257 = vmatpush.msrb.mxu0 %v1174_v19  ;;  %v973_v19 = vand.u32 2147483648, %v1945_v56 }
 0x27e   :  { %1033 = vmatpush.msrb.mxu3 %v1883_v44  ;;  %v1078_v44 = vmul.f32 0.35355338, %v1055_v25 }
 0x27f   :  { %v974_v32 = vor.u32 1.1754944e-38, %v973_v19  ;;  %v1217_v19 = vld [vmem:[#allocation8 + $0x158] sm:$0xff] }
 0x280   :  { %v1080_v27 = vsel %vm671_vm0, %v1078_v44, -inf }
 0x2f0   :  { %v740_v40 = vpop.f32.mrf.mxu2 }
 0x2f1   :  { %1258 = vmatmul.f32.vlgmr.msrb.gmra.mxu0 %v740_v40 }
 0x2f8   :  { %v763_v63 = vpop.f32.mrf.mxu3  ;;  %v783_v20 = vpop.f32.mrf.mxu2 }
 0x2f9   :  { %v806_v21 = vmul.f32 0.35355338, %v783_v20  ;;  %1261 = vmatmul.f32.gmra.mxu0 %v763_v63  ;;  %v971_v20 = vand.u32 2147483647, %v1945_v56 }
 0x2fb   :  { %v808_v22 = vsel %vm671_vm0, %v806_v21, -inf  ;;  %vm972_vm2 = vcmp.eq.f32.partialorder %v971_v20, 8.507059e+37  ;;  %v1193_v20 = vld [vmem:[#allocation8 + $0x98] sm:$0xff] }
 0x2fc   :  { %809 = vmax.xlane.f32.xlu2 %v808_v22 }
 0x300   :  { %v803_v37 = vpop.f32.mrf.mxu3 }
 0x301   :  { %v807_v23 = vmul.f32 0.35355338, %v803_v37  ;;  %v1201_v37 = vld [vmem:[#allocation8 + $0xd8] sm:$0xff] }
 0x302   :  { %1269 = vmatpush.msrb.mxu1 %v1201_v37  ;;  %v1215_v37 = vld [vmem:[#allocation8 + $0x148] sm:$0xff] }
 0x303   :  { %v811_v24 = vsel %vm671_vm0, %v807_v23, -inf }
 0x304   :  { %812 = vmax.xlane.f32.xlu2 %v811_v24 }
 0x30c   :  { %1081 = vmax.xlane.f32.xlu2 %v1080_v27 }
 0x36f   :  { %v810_v30 = vpop.xlane.xlu2 %809 }
 0x370   :  { %v814_v31 = vsub.f32 %v806_v21, %v810_v30 }
 0x372   :  { %v816_v34 = vmul.f32 1.442695, %v814_v31  ;;  %v1200_v31 = vld [vmem:[#allocation8 + $0xd0] sm:$0xff] }
 0x373   :  { %1270 = vmatpush.msrb.mxu1 %v1200_v31  ;;  %v1212_v31 = vld [vmem:[#allocation8 + $0x130] sm:$0xff] }
 0x374   :  { %1534 = vpow2.f32 %v816_v34 }
 0x375   :  { %1536 = vpow2.f32 %v954_v36 }
 0x377   :  { %v813_v38 = vpop.xlane.xlu2 %812 }
 0x378   :  { %v815_v39 = vsub.f32 %v807_v23, %v813_v38  ;;  %v1199_v38 = vld [vmem:[#allocation8 + $0xc8] sm:$0xff]  ;;  %v1192_v23 = vld [vmem:[#allocation8 + $0x90] sm:$0xff] }
 0x379   :  { %1271 = vmatpush.msrb.mxu1 %v1199_v38  ;;  %v1230_v38 = vld [vmem:[#allocation8 + $0x1c0] sm:$0xff] }
 0x37a   :  { %v1929_v41 = vpop.eup %1534  ;;  %v818_v42 = vmul.f32 1.442695, %v815_v39 }
 0x37b   :  { %v820_v43 = vsel %vm671_vm0, %v1929_v41, 0.0  ;;  %v1933_v47 = vpop.eup %1536 }
 0x37c   :  { %1538 = vpow2.f32 %v818_v42  ;;  %821 = vadd.xlane.f32.xlu1 %v820_v43  ;;  %v959_v53 = vsel %vm671_vm0, %v1933_v47, 0.0 }
 0x37f   :  { %v1082_v45 = vpop.xlane.xlu2 %1081 }
 0x380   :  { %v1086_v48 = vsub.f32 %v1078_v44, %v1082_v45 }
 0x382   :  { %v1935_v50 = vpop.eup %1538  ;;  %v1088_v26 = vmul.f32 1.442695, %v1086_v48 }
 0x383   :  { %v823_v52 = vsel %vm671_vm0, %v1935_v50, 0.0 }
 0x384   :  { %1540 = vpow2.f32 %v1088_v26  ;;  %824 = vadd.xlane.f32.xlu2 %v823_v52  ;;  %960 = vadd.xlane.f32.xlu1 %v959_v53  ;;  %v1198_v52 = vld [vmem:[#allocation8 + $0xc0] sm:$0xff] }
 0x385   :  { %1542 = vrcp.f32 %v1945_v56  ;;  %1272 = vmatpush.msrb.mxu1 %v1198_v52  ;;  %v1226_v52 = vld [vmem:[#allocation8 + $0x1a0] sm:$0xff] }
 0x38a   :  { %v1941_v54 = vpop.eup %1540 }
 0x38b   :  { %v1092_v55 = vsel %vm671_vm0, %v1941_v54, 0.0  ;;  %v1948_v59 = vpop.eup %1542 }
 0x38c   :  { %1093 = vadd.xlane.f32.xlu2 %v1092_v55  ;;  %v963_v60 = vmul.f32 %v1948_v59, %v1945_v56  ;;  %vm968_vm11 = vweird.f32 %v1948_v59 }
 0x38d   :  { %vm1981_vm15 = vmor %vm967_vm14, %vm968_vm11 }
 0x38e   :  { %v964_v0 = vsub.f32 1.0, %v963_v60  ;;  %v1347_v60 = vld [vmem:[#allocation10 + $0x68] sm:$0xff] }
 0x390   :  { %v965_v7 = vmul.f32 %v1948_v59, %v964_v0 }
 0x392   :  { %v966_v17 = vadd.f32 %v1948_v59, %v965_v7  ;;  %v1220_v7 = vld [vmem:[#allocation8 + $0x170] sm:$0xff] }
 0x394   :  { %v970_v28 = vsel %vm1981_vm15, %v1948_v59, %v966_v17  ;;  %vm1117_vm15 = vweird.f32 %v1952_v61  ;;  %v1121_v17 = vand.u32 2147483647, %v1952_v61 }
 0x3ef   :  { %v822_v57 = vpop.xlane.xlu1 %821 }
 0x3f0   :  { %1544 = vrcp.f32 %v822_v57  ;;  %v837_v6 = vand.u32 2147483648, %v822_v57  ;;  %v835_v9 = vand.u32 2147483647, %v822_v57  ;;  %vm831_vm10 = vweird.f32 %v822_v57 }
 0x3f1   :  { %1546 = vrcp.f32 %v1952_v61 }
 0x3f2   :  { %v838_v58 = vor.u32 1.1754944e-38, %v837_v6  ;;  %vm836_vm13 = vcmp.eq.f32.partialorder %v835_v9, 8.507059e+37 }
 0x3f6   :  { %v1545_v62 = vpop.eup %1544 }
 0x3f7   :  { %v827_v1 = vmul.f32 %v1545_v62, %v822_v57  ;;  %v1955_v3 = vpop.xlane.xlu2 %824  ;;  %v1957_v4 = vpop.xlane.xlu1 %960  ;;  %vm832_vm9 = vweird.f32 %v1545_v62 }
 0x3f8   :  { %1548 = vrcp.f32 %v1955_v3  ;;  %v1962_v13 = vpop.eup %1546  ;;  %vm833_vm12 = vmor %vm831_vm10, %vm832_vm9  ;;  %v849_v24 = vand.u32 2147483647, %v1955_v3  ;;  %v851_v25 = vand.u32 2147483648, %v1955_v3  ;;  %vm845_vm3 = vweird.f32 %v1955_v3 }
 0x3f9   :  { %v828_v5 = vsub.f32 1.0, %v827_v1  ;;  %1550 = vrcp.f32 %v1957_v4  ;;  %v1113_v21 = vmul.f32 %v1962_v13, %v1952_v61  ;;  %v987_v55 = vand.u32 2147483648, %v1957_v4  ;;  %v1221_v1 = vld [vmem:[#allocation8 + $0x178] sm:$0xff] }
 0x3fa   :  { %vm850_vm5 = vcmp.eq.f32.partialorder %v849_v24, 8.507059e+37  ;;  %v852_v43 = vor.u32 1.1754944e-38, %v851_v25  ;;  %vm981_vm7 = vweird.f32 %v1957_v4  ;;  %v1214_v24 = vld [vmem:[#allocation8 + $0x140] sm:$0xff] }
 0x3fb   :  { %v829_v8 = vmul.f32 %v1545_v62, %v828_v5  ;;  %v1114_v42 = vsub.f32 1.0, %v1113_v21  ;;  %v988_v6 = vor.u32 1.1754944e-38, %v987_v55  ;;  %v1235_v21 = vld [vmem:[#allocation8 + $0x1e8] sm:$0xff]  ;;  %v1224_v55 = vld [vmem:[#allocation8 + $0x190] sm:$0xff] }
 0x3fd   :  { %v830_v14 = vadd.f32 %v1545_v62, %v829_v8  ;;  %v1115_v59 = vmul.f32 %v1962_v13, %v1114_v42  ;;  %v1208_v42 = vld [vmem:[#allocation8 + $0x110] sm:$0xff] }
 0x3fe   :  { %v1549_v16 = vpop.eup %1548 }
 0x3ff   :  { %v1965_v10 = vpop.eup %1550  ;;  %v834_v51 = vsel %vm833_vm12, %v1545_v62, %v830_v14  ;;  %v841_v18 = vmul.f32 %v1549_v16, %v1955_v3  ;;  %v1969_v35 = vpop.xlane.xlu2 %1093  ;;  %vm846_vm1 = vweird.f32 %v1549_v16  ;;  %v1197_v3 = vld [vmem:[#allocation8 + $0xb8] sm:$0xff]  ;;  %v1195_v14 = vld [vmem:[#allocation8 + $0xa8] sm:$0xff]  ;;  %v1116_v15 = vadd.f32 %v1962_v13, %v1115_v59  ;;  %v1348_v59 = vld [vmem:[#allocation10 + $0x70] sm:$0xff] }
 0x400   :  { %v839_v40 = vsel %vm836_vm13, %v838_v58, %v834_v51  ;;  %v977_v63 = vmul.f32 %v1965_v10, %v1957_v4  ;;  %1552 = vrcp.f32 %v1969_v35  ;;  %vm847_vm4 = vmor %vm845_vm3, %vm846_vm1  ;;  %vm982_vm6 = vweird.f32 %v1965_v10  ;;  %1273 = vmatpush.msrb.mxu1 %v1197_v3 }
 0x401   :  { %v842_v22 = vsub.f32 1.0, %v841_v18  ;;  %v854_v27 = vmul.f32 %v1929_v41, %v839_v40  ;;  %v975_v41 = vsel %vm972_vm2, %v974_v32, %v970_v28  ;;  %vm2003_vm8 = vmor %vm981_vm7, %vm982_vm6  ;;  %v1109_v62 = vand.u32 2147483648, %v1969_v35  ;;  %v1194_v40 = vld [vmem:[#allocation8 + $0xa0] sm:$0xff]  ;;  %v1213_v28 = vld [vmem:[#allocation8 + $0x138] sm:$0xff] }
 0x402   :  { %v978_v44 = vsub.f32 1.0, %v977_v63  ;;  %v990_v0 = vmul.f32 %v1905_v29, %v975_v41  ;;  %v1196_v29 = vld [vmem:[#allocation8 + $0xb0] sm:$0xff]  ;;  %vm1103_vm11 = vweird.f32 %v1969_v35  ;;  %vm1118_vm13 = vweird.f32 %v1962_v13  ;;  %v1231_v32 = vld [vmem:[#allocation8 + $0x1c8] sm:$0xff]  ;;  %v1229_v41 = vld [vmem:[#allocation8 + $0x1b8] sm:$0xff] }
 0x403   :  { %v843_v30 = vmul.f32 %v1549_v16, %v842_v22  ;;  %1498 = vmatmul.msk.f32.vlgmr.msra.gmra.mxu2 %vm671_vm0, %v854_v27  ;;  %v1110_v11 = vor.u32 1.1754944e-38, %v1109_v62  ;;  %1274 = vmatpush.msrb.mxu1 %v1196_v29  ;;  %vm2026_vm1 = vmor %vm1117_vm15, %vm1118_vm13  ;;  %vm1122_vm2 = vcmp.eq.f32.partialorder %v1121_v17, 8.507059e+37  ;;  %v1191_v27 = vld [vmem:[#allocation8 + $0x88] sm:$0xff]  ;;  %v1517_v17 = vld [vmem:[%s2062_s4] ss:$0 sm:$0xff] }
 0x404   :  { %v979_v34 = vmul.f32 %v1965_v10, %v978_v44  ;;  %1146 = vmatpush.msra.mxu2 %v1885_v46  ;;  %v985_v46 = vand.u32 2147483647, %v1957_v4  ;;  %v1120_v63 = vsel %vm2026_vm1, %v1962_v13, %v1116_v15  ;;  %v1234_v13 = vld [vmem:[#allocation8 + $0x1e0] sm:$0xff]  ;;  %v1233_v44 = vld [vmem:[#allocation8 + $0x1d8] sm:$0xff]  ;;  %v1343_v29 = vld [vmem:[#allocation10 + $0x48] sm:$0xff] }
 0x405   :  { %v844_v36 = vadd.f32 %v1549_v16, %v843_v30  ;;  %1275 = vmatpush.msrb.mxu1 %v1195_v14  ;;  %v1232_v30 = vld [vmem:[#allocation8 + $0x1d0] sm:$0xff]  ;;  %v1338_v14 = vld [vmem:[#allocation10 + $0x20] sm:$0xff]  ;;  %v1337_v15 = vld [vmem:[#allocation10 + $0x18] sm:$0xff] }
 0x406   :  { %v1553_v39 = vpop.eup %1552  ;;  %v980_v48 = vadd.f32 %v1965_v10, %v979_v34  ;;  %vm986_vm10 = vcmp.eq.f32.partialorder %v985_v46, 8.507059e+37  ;;  %v1211_v34 = vld [vmem:[#allocation8 + $0x128] sm:$0xff] }
 0x407   :  { %v848_v45 = vsel %vm847_vm4, %v1549_v16, %v844_v36  ;;  %v1099_v26 = vmul.f32 %v1553_v39, %v1969_v35  ;;  %vm1104_vm9 = vweird.f32 %v1553_v39  ;;  %1276 = vmatpush.msrb.mxu1 %v1194_v40  ;;  %v1210_v36 = vld [vmem:[#allocation8 + $0x120] sm:$0xff]  ;;  %v1223_v46 = vld [vmem:[#allocation8 + $0x188] sm:$0xff] }
 0x408   :  { %v853_v53 = vsel %vm850_vm5, %v852_v43, %v848_v45  ;;  %v984_v4 = vsel %vm2003_vm8, %v1965_v10, %v980_v48  ;;  %vm1105_vm12 = vmor %vm1103_vm11, %vm1104_vm9  ;;  %v1218_v10 = vld [vmem:[#allocation8 + $0x160] sm:$0xff]  ;;  %v1228_v43 = vld [vmem:[#allocation8 + $0x1b0] sm:$0xff] }
 0x409   :  { %v1100_v56 = vsub.f32 1.0, %v1099_v26  ;;  %v855_v57 = vmul.f32 %v1935_v50, %v853_v53  ;;  %v1107_v50 = vand.u32 2147483647, %v1969_v35  ;;  %v989_v9 = vsel %vm986_vm10, %v988_v6, %v984_v4  ;;  %v1237_v35 = vld [vmem:[#allocation8 + $0x1f8] sm:$0xff]  ;;  %1277 = vmatpush.msrb.mxu1 %v1193_v20  ;;  %v1207_v45 = vld [vmem:[#allocation8 + $0x108] sm:$0xff]  ;;  %v1206_v26 = vld [vmem:[#allocation8 + $0x100] sm:$0xff] }
 0x40a   :  { %v991_v51 = vmul.f32 %v1933_v47, %v989_v9  ;;  %v1236_v47 = vld [vmem:[#allocation8 + $0x1f0] sm:$0xff]  ;;  %v1227_v48 = vld [vmem:[#allocation8 + $0x1a8] sm:$0xff]  ;;  %v1225_v53 = vld [vmem:[#allocation8 + $0x198] sm:$0xff] }
 0x40b   :  { %v1101_v5 = vmul.f32 %v1553_v39, %v1100_v56  ;;  %1499 = vmatmul.msk.f32.vlgmr.msra.gmra.mxu3 %vm671_vm0, %v855_v57  ;;  %1500 = vmatmul.msk.f32.vlgmr.msrb.gmra.mxu2 %vm671_vm0, %v990_v0  ;;  %vm1108_vm14 = vcmp.eq.f32.partialorder %v1107_v50, 8.507059e+37  ;;  %v1222_v56 = vld [vmem:[#allocation8 + $0x180] sm:$0xff]  ;;  %v1349_v57 = vld [vmem:[#allocation10 + $0x78] sm:$0xff] }
 0x40c   :  { %1169 = vmatpush.msra.mxu3 %v1887_v49  ;;  %1288 = vmatpush.msrb.mxu2 %v1221_v1  ;;  %v1123_v49 = vand.u32 2147483648, %v1952_v61  ;;  %v1216_v61 = vld [vmem:[#allocation8 + $0x150] sm:$0xff]  ;;  %v1346_v50 = vld [vmem:[#allocation10 + $0x60] sm:$0xff]  ;;  %v1345_v6 = vld [vmem:[#allocation10 + $0x58] sm:$0xff] }
 0x40d   :  { %v1102_v8 = vadd.f32 %v1553_v39, %v1101_v5  ;;  %1278 = vmatpush.msrb.mxu1 %v1192_v23  ;;  %1354 = vmatpush.msra.mxu0 %v1349_v57  ;;  %v1341_v9 = vld [vmem:[#allocation10 + $0x38] sm:$0xff] }
 0x40e   :  { %1289 = vmatpush.msrb.mxu2 %v1220_v7  ;;  %v1344_v7 = vld [vmem:[#allocation10 + $0x50] sm:$0xff] }
 0x40f   :  { %v1106_v16 = vsel %vm1105_vm12, %v1553_v39, %v1102_v8  ;;  %1279 = vmatpush.msrb.mxu1 %v1191_v27  ;;  %v1209_v39 = vld [vmem:[#allocation8 + $0x118] sm:$0xff]  ;;  %1355 = vmatpush.msra.mxu0 %v1348_v59  ;;  %v1342_v8 = vld [vmem:[#allocation10 + $0x40] sm:$0xff] }
 0x410   :  { %v1111_v58 = vsel %vm1108_vm14, %v1110_v11, %v1106_v16  ;;  %1290 = vmatpush.msrb.mxu2 %v1219_v12  ;;  %v1340_v11 = vld [vmem:[#allocation10 + $0x30] sm:$0xff]  ;;  %v1339_v12 = vld [vmem:[#allocation10 + $0x28] sm:$0xff]  ;;  %v1428_v27 = vld [vmem:[#allocation11 + $0x58] sm:$0xff] }
 0x411   :  { %v1126_v18 = vmul.f32 %v1941_v54, %v1111_v58  ;;  %v1124_v54 = vor.u32 1.1754944e-38, %v1123_v49  ;;  %1356 = vmatpush.msra.mxu0 %v1347_v60  ;;  %v1336_v16 = vld [vmem:[#allocation10 + $0x10] sm:$0xff]  ;;  %v1335_v49 = vld [vmem:[#allocation10 + $0x8] sm:$0xff]  ;;  %v1334_v58 = vld [vmem:[#allocation10] sm:$0xff] }
 0x412   :  { %1291 = vmatpush.msrb.mxu2 %v1218_v10  ;;  %v1259_v10 = vpop.f32.mrf.mxu0 }
 0x413   :  { %1501 = vmatmul.msk.f32.vlgmr.msrb.gmra.mxu3 %vm671_vm0, %v991_v51  ;;  %1502 = vmatmul.msk.f32.vlgmr.msra.gmra.mxu2 %vm671_vm0, %v1126_v18  ;;  %v1125_v22 = vsel %vm1122_vm2, %v1124_v54, %v1120_v63 }
 0x414   :  { %1311 = vmatpush.msrb.mxu3 %v1237_v35  ;;  %1292 = vmatpush.msrb.mxu2 %v1217_v19  ;;  %v1127_v25 = vmul.f32 %v1911_v33, %v1125_v22  ;;  %v1190_v33 = vld [vmem:[#allocation8 + $0x80] sm:$0xff]  ;;  %v1260_v35 = vadd.f32 %v1517_v17, %v1259_v10 }
 0x415   :  { %1280 = vmatpush.msrb.mxu1 %v1190_v33  ;;  %1357 = vmatpush.msra.mxu0 %v1346_v50  ;;  %v1422_v33 = vld [vmem:[#allocation11 + $0x28] sm:$0xff] }
 0x416   :  { %1312 = vmatpush.msrb.mxu3 %v1236_v47  ;;  %1293 = vmatpush.msrb.mxu2 %v1216_v61 }
 0x417   :  { %1358 = vmatpush.msra.mxu0 %v1345_v6 }
 0x418   :  { %1313 = vmatpush.msrb.mxu3 %v1235_v21  ;;  %1294 = vmatpush.msrb.mxu2 %v1215_v37 }
 0x419   :  { %1359 = vmatpush.msra.mxu0 %v1344_v7 }
 0x41a   :  { %1314 = vmatpush.msrb.mxu3 %v1234_v13  ;;  %1295 = vmatpush.msrb.mxu2 %v1214_v24  ;;  %v1262_v40 = vpop.f32.mrf.mxu0  ;;  %v1432_v13 = vld [vmem:[#allocation11 + $0x78] sm:$0xff]  ;;  %v1431_v24 = vld [vmem:[#allocation11 + $0x70] sm:$0xff] }
 0x41b   :  { %1503 = vmatmul.msk.f32.vlgmr.msra.gmra.mxu3 %vm671_vm0, %v1127_v25  ;;  %1360 = vmatpush.msra.mxu0 %v1343_v29  ;;  %v1263_v61 = vadd.f32 %v1517_v17, %v1262_v40  ;;  %v1430_v25 = vld [vmem:[#allocation11 + $0x68] sm:$0xff] }
 0x41c   :  { %1315 = vmatpush.msrb.mxu3 %v1233_v44  ;;  %1296 = vmatpush.msrb.mxu2 %v1213_v28  ;;  %v1429_v44 = vld [vmem:[#allocation11 + $0x60] sm:$0xff]  ;;  %v1427_v28 = vld [vmem:[#allocation11 + $0x50] sm:$0xff] }
 0x41d   :  { %1361 = vmatpush.msra.mxu0 %v1342_v8  ;;  %1437 = vmatpush.msra.mxu1 %v1432_v13 }
 0x41e   :  { %1316 = vmatpush.msrb.mxu3 %v1232_v30  ;;  %1297 = vmatpush.msrb.mxu2 %v1212_v31  ;;  %v1426_v30 = vld [vmem:[#allocation11 + $0x48] sm:$0xff]  ;;  %v1425_v31 = vld [vmem:[#allocation11 + $0x40] sm:$0xff] }
 0x41f   :  { %1362 = vmatpush.msra.mxu0 %v1341_v9  ;;  %1438 = vmatpush.msra.mxu1 %v1431_v24 }
 0x420   :  { %1317 = vmatpush.msrb.mxu3 %v1231_v32  ;;  %1298 = vmatpush.msrb.mxu2 %v1211_v34  ;;  %v1424_v32 = vld [vmem:[#allocation11 + $0x38] sm:$0xff]  ;;  %v1423_v34 = vld [vmem:[#allocation11 + $0x30] sm:$0xff] }
 0x421   :  { %1363 = vmatpush.msra.mxu0 %v1340_v11  ;;  %1439 = vmatpush.msra.mxu1 %v1430_v25 }
 0x422   :  { %1299 = vmatpush.msrb.mxu2 %v1210_v36  ;;  %1318 = vmatpush.msrb.mxu3 %v1230_v38  ;;  %v1421_v36 = vld [vmem:[#allocation11 + $0x20] sm:$0xff]  ;;  %v1420_v38 = vld [vmem:[#allocation11 + $0x18] sm:$0xff] }
 0x423   :  { %1364 = vmatpush.msra.mxu0 %v1339_v12  ;;  %1440 = vmatpush.msra.mxu1 %v1429_v44 }
 0x424   :  { %1300 = vmatpush.msrb.mxu2 %v1209_v39  ;;  %1319 = vmatpush.msrb.mxu3 %v1229_v41  ;;  %v1419_v39 = vld [vmem:[#allocation11 + $0x10] sm:$0xff]  ;;  %v1518_v41 = vld [vmem:[%s2064_s6] ss:$0 sm:$0xff] }
 0x425   :  { %1365 = vmatpush.msra.mxu0 %v1338_v14  ;;  %1441 = vmatpush.msra.mxu1 %v1428_v27 }
 0x426   :  { %1301 = vmatpush.msrb.mxu2 %v1208_v42  ;;  %1320 = vmatpush.msrb.mxu3 %v1228_v43  ;;  %v1418_v42 = vld [vmem:[#allocation11 + $0x8] sm:$0xff]  ;;  %v1417_v43 = vld [vmem:[#allocation11] sm:$0xff] }
 0x427   :  { %1366 = vmatpush.msra.mxu0 %v1337_v15  ;;  %1442 = vmatpush.msra.mxu1 %v1427_v28 }
 0x428   :  { %1302 = vmatpush.msrb.mxu2 %v1207_v45  ;;  %1321 = vmatpush.msrb.mxu3 %v1227_v48 }
 0x429   :  { %1367 = vmatpush.msra.mxu0 %v1336_v16  ;;  %1443 = vmatpush.msra.mxu1 %v1426_v30 }
 0x42a   :  { %1303 = vmatpush.msrb.mxu2 %v1206_v26  ;;  %1322 = vmatpush.msrb.mxu3 %v1226_v52 }
 0x42b   :  { %1368 = vmatpush.msra.mxu0 %v1335_v49  ;;  %1444 = vmatpush.msra.mxu1 %v1425_v31 }
 0x42c   :  { %1323 = vmatpush.msrb.mxu3 %v1225_v53 }
 0x42d   :  { %1369 = vmatpush.msra.mxu0 %v1334_v58  ;;  %1445 = vmatpush.msra.mxu1 %v1424_v32 }
 0x42e   :  { %1324 = vmatpush.msrb.mxu3 %v1224_v55 }
 0x42f   :  { %1446 = vmatpush.msra.mxu1 %v1423_v34 }
 0x430   :  { %1325 = vmatpush.msrb.mxu3 %v1223_v46 }
 0x431   :  { %1447 = vmatpush.msra.mxu1 %v1422_v33 }
 0x432   :  { %1326 = vmatpush.msrb.mxu3 %v1222_v56 }
 0x433   :  { %1448 = vmatpush.msra.mxu1 %v1421_v36 }
 0x435   :  { %1449 = vmatpush.msra.mxu1 %v1420_v38 }
 0x437   :  { %1450 = vmatpush.msra.mxu1 %v1419_v39 }
 0x439   :  { %1451 = vmatpush.msra.mxu1 %v1418_v42 }
 0x43b   :  { %1452 = vmatpush.msra.mxu1 %v1417_v43 }
 0x486   :  { %v876_v62 = vpop.f32.mrf.mxu2 }
 0x487   :  { %1281 = vmatmul.f32.vlgmr.msrb.gmra.mxu1 %v876_v62 }
 0x48e   :  { %v899_v0 = vpop.f32.mrf.mxu3  ;;  %v1012_v1 = vpop.f32.mrf.mxu2 }
 0x48f   :  { %1284 = vmatmul.f32.gmra.mxu1 %v899_v0  ;;  %1304 = vmatmul.f32.vlgmr.msrb.gmra.mxu2 %v1012_v1 }
 0x496   :  { %v1035_v3 = vpop.f32.mrf.mxu3  ;;  %v1148_v4 = vpop.f32.mrf.mxu2 }
 0x497   :  { %1307 = vmatmul.f32.gmra.mxu2 %v1035_v3  ;;  %1327 = vmatmul.f32.vlgmr.msrb.gmra.mxu3 %v1148_v4 }
 0x49e   :  { %v1171_v5 = vpop.f32.mrf.mxu3 }
 0x49f   :  { %1330 = vmatmul.f32.gmra.mxu3 %v1171_v5 }
 0x504   :  { %v1282_v51 = vpop.f32.mrf.mxu1 }
 0x505   :  { %v1283_v2 = vadd.f32 %v1282_v51, %v1260_v35  ;;  %v1519_v51 = vld [vmem:[%s2066_s8] ss:$0 sm:$0xff]  ;;  %s1480_s8 = sshll.u32 %s2069_s11, 4  ;;  %s1481_s8 = int_to_ptr.hbm [resolvable:$true] %s1480_s8 }
 0x50c   :  { %v1285_v54 = vpop.f32.mrf.mxu1 }
 0x50d   :  { %v1286_v21 = vadd.f32 %v1285_v54, %v1263_v61 }
 0x512   :  { %v1305_v18 = vpop.f32.mrf.mxu2 }
 0x513   :  { %v1306_v19 = vadd.f32 %v1305_v18, %v1283_v2  ;;  %v1520_v18 = vld [vmem:[%s2067_s9] ss:$0 sm:$0xff] }
 0x51a   :  { %v1328_v63 = vpop.f32.mrf.mxu3  ;;  %v1308_v20 = vpop.f32.mrf.mxu2 }
 0x51b   :  { %v1329_v47 = vadd.f32 %v1328_v63, %v1306_v19  ;;  %v1309_v22 = vadd.f32 %v1308_v20, %v1286_v21  ;;  %v1521_v19 = vld [vmem:[%s2068_s10] ss:$0 sm:$0xff] }
 0x51d   :  { %1370 = vmatmul.f32.vlgmr.msra.gmra.mxu0 %v1329_v47 }
 0x522   :  { %v1331_v37 = vpop.f32.mrf.mxu3 }
 0x523   :  { %v1332_v23 = vadd.f32 %v1331_v37, %v1309_v22 }
 0x525   :  { %1373 = vmatmul.f32.gmra.mxu0 %v1332_v23 }
 0x59a   :  { %v1371_v45 = vpop.f32.mrf.mxu0 }
 0x59b   :  { %v1372_v48 = vadd.f32 %v1518_v41, %v1371_v45 }
 0x59d   :  { %v1504_v26 = vmul.f32 -1.442695, %v1372_v48 }
 0x59f   :  { %1554 = vpow2.f32 %v1504_v26 }
 0x5a2   :  { %v1374_v52 = vpop.f32.mrf.mxu0 }
 0x5a3   :  { %v1375_v53 = vadd.f32 %v1518_v41, %v1374_v52 }
 0x5a5   :  { %v1555_v55 = vpop.eup %1554  ;;  %v1505_v46 = vmul.f32 -1.442695, %v1375_v53 }
 0x5a6   :  { %v1383_v56 = vadd.f32 1.0, %v1555_v55 }
 0x5a7   :  { %1556 = vpow2.f32 %v1505_v46 }
 0x5a8   :  { %1558 = vrcp.f32 %v1383_v56  ;;  %v1396_v1 = vand.u32 2147483648, %v1383_v56  ;;  %v1394_v4 = vand.u32 2147483647, %v1383_v56  ;;  %vm1390_vm3 = vweird.f32 %v1383_v56 }
 0x5aa   :  { %v1397_v6 = vor.u32 1.1754944e-38, %v1396_v1  ;;  %vm1395_vm5 = vcmp.eq.f32.partialorder %v1394_v4, 8.507059e+37 }
 0x5ad   :  { %v1557_v57 = vpop.eup %1556 }
 0x5ae   :  { %v1559_v59 = vpop.eup %1558  ;;  %v1384_v60 = vadd.f32 1.0, %v1557_v57 }
 0x5af   :  { %v1386_v62 = vmul.f32 %v1559_v59, %v1383_v56  ;;  %vm1391_vm0 = vweird.f32 %v1559_v59 }
 0x5b0   :  { %1560 = vrcp.f32 %v1384_v60  ;;  %vm1392_vm4 = vmor %vm1390_vm3, %vm1391_vm0  ;;  %v1411_v12 = vand.u32 2147483648, %v1384_v60  ;;  %v1409_v15 = vand.u32 2147483647, %v1384_v60  ;;  %vm1405_vm7 = vweird.f32 %v1384_v60 }
 0x5b1   :  { %v1387_v0 = vsub.f32 1.0, %v1386_v62 }
 0x5b2   :  { %v1412_v49 = vor.u32 1.1754944e-38, %v1411_v12  ;;  %vm1410_vm9 = vcmp.eq.f32.partialorder %v1409_v15, 8.507059e+37 }
 0x5b3   :  { %v1388_v3 = vmul.f32 %v1559_v59, %v1387_v0 }
 0x5b5   :  { %v1389_v5 = vadd.f32 %v1559_v59, %v1388_v3 }
 0x5b6   :  { %v1561_v50 = vpop.eup %1560 }
 0x5b7   :  { %v1393_v7 = vsel %vm1392_vm4, %v1559_v59, %v1389_v5  ;;  %v1401_v29 = vmul.f32 %v1561_v50, %v1384_v60  ;;  %vm1406_vm6 = vweird.f32 %v1561_v50 }
 0x5b8   :  { %v1398_v8 = vsel %vm1395_vm5, %v1397_v6, %v1393_v7  ;;  %vm1407_vm8 = vmor %vm1405_vm7, %vm1406_vm6 }
 0x5b9   :  { %v1415_v9 = vmul.f32 %v1398_v8, %v1372_v48  ;;  %v1402_v11 = vsub.f32 1.0, %v1401_v29 }
 0x5bb   :  { %1453 = vmatmul.f32.vlgmr.msra.gmra.mxu1 %v1415_v9  ;;  %v1403_v14 = vmul.f32 %v1561_v50, %v1402_v11 }
 0x5bd   :  { %v1404_v16 = vadd.f32 %v1561_v50, %v1403_v14 }
 0x5bf   :  { %v1408_v58 = vsel %vm1407_vm8, %v1561_v50, %v1404_v16 }
 0x5c0   :  { %v1413_v10 = vsel %vm1410_vm9, %v1412_v49, %v1408_v58 }
 0x5c1   :  { %v1416_v17 = vmul.f32 %v1413_v10, %v1375_v53 }
 0x5c3   :  { %1456 = vmatmul.f32.gmra.mxu1 %v1416_v17 }
 0x638   :  { %v1454_v35 = vpop.f32.mrf.mxu1 }
 0x639   :  { %v1455_v2 = vadd.f32 %v1519_v51, %v1454_v35 }
 0x63b   :  { %v1464_v40 = vmul.f32 %v1520_v18, %v1455_v2 }
 0x63d   :  { %v1470_v63 = vadd.f32 %v1521_v19, %v1464_v40 }
 0x63f   :  { %1472 = vst [vmem:[#allocation13] sm:$0xff] %v1470_v63 }
 0x640   :  { %v1457_v47 = vpop.f32.mrf.mxu1 }
 0x641   :  { %v1458_v54 = vadd.f32 %v1519_v51, %v1457_v47 }
 0x643   :  { %v1465_v61 = vmul.f32 %v1520_v18, %v1458_v54 }
 0x645   :  { %v1471_v20 = vadd.f32 %v1521_v19, %v1465_v61 }
 0x647   :  { %1473 = vst [vmem:[#allocation13 + $0x8] sm:$0xff] %v1471_v20 }
 0x648   :  { %1486 = dma.vmem_to_hbm [thread:$0]  %s1479_s3, 256, %s1481_s8, [#allocation4], %s1744_s1, %s1744_s1, %s1745_s13  }
 0x649   :  { %1738 = dma.done.wait [#allocation4], 256  }
 0x64a   :  { %1739 = vsyncadd [#allocation4], 4294967040 }
 0x64b   :  { %1491 = vsyncpa [#allocation3], 1 }
 0x64c   :  { %1492 = vsyncpa [#allocation6], 1 }
 0x64d   :  { %1493 = vsyncpa [#allocation9], 1 }
 0x64e   :  { %1494 = vsyncpa [#allocation12], 1 }
 0x64f   :  { %1495 = vsyncpa [#allocation4], 1 }

</bundles_post_ra>
